<compile_context>
chip_gen: v7x
topology: tpu7x:2x2x1
jax: 0.10.0
libtpu: 0.0.40
codegen_flags: <defaults>
</compile_context>

<pallas_src>
from functools import partial

import jax
import jax.numpy as jnp
from jax import lax
from jax.experimental import pallas as pl
from jax.experimental.pallas import tpu as pltpu

IN_DIM = 1024
HID = IN_DIM // 2          # 512
NEG_SLOPE = 0.01           # nn.LeakyReLU default


def _round_up(x, m):
    return ((x + m - 1) // m) * m


def _cdiv(a, b):
    return -(-a // b)


def _leaky_relu(x):
    return jnp.where(x >= 0, x, NEG_SLOPE * x)


def _choose_block_rows(b, device_kind):
    """Generation-aware batch tile.  grid>1 tiles are multiples of 128 so the
    lane-dense (1, BM) output blocks satisfy the (8,128) layout rule."""
    kind = device_kind.lower()
    single_core = ("v5" in kind) or ("v6" in kind)      # 1 TensorCore per chip
    bm_max = 512 if single_core else 256                # v6e/v5e amortize step overhead
    single_step_max = bm_max if single_core else 128    # v7x: keep >=2 steps when b > 128
    if b <= single_step_max:
        return b                                        # one block == full batch extent
    steps = _cdiv(b, bm_max)
    if not single_core:
        steps = _round_up(steps, 2)                     # even step count for 2 TCs
    return min(bm_max, _round_up(_cdiv(b, steps), 128))


# ---------------------------------------------------------------------------
# Kernels
# ---------------------------------------------------------------------------

def _selector_kernel_shared(fea_q_ref, fea_d_ref,
                            wa_ref, ba_ref, wc_ref, bc_ref,
                            w1a_ref, w1c_ref, b1_ref, w2_ref,
                            out_ref):
    """bs_anchor == bs_candi path: per-row anchor branch computed in-kernel."""
    bf16 = jnp.bfloat16

    # candidate branch: (BM, IN_DIM) -> (BM, HID)
    xc = jnp.dot(fea_d_ref[...].astype(bf16), wc_ref[...],
                 preferred_element_type=jnp.float32) + bc_ref[...]
    xc = _leaky_relu(xc)

    # anchor branch: (BM, IN_DIM) -> (BM, HID)
    xa = jnp.dot(fea_q_ref[...].astype(bf16), wa_ref[...],
                 preferred_element_type=jnp.float32) + ba_ref[...]
    xa = _leaky_relu(xa)

    # concat([xa, xc], 1) @ W1^T == xa @ W1a + xc @ W1c  (W1 split by columns)
    h = (jnp.dot(xc.astype(bf16), w1c_ref[...], preferred_element_type=jnp.float32)
         + jnp.dot(xa.astype(bf16), w1a_ref[...], preferred_element_type=jnp.float32)
         + b1_ref[...])
    h = _leaky_relu(h)                                           # (BM, HID) f32

    # Final layer as w2_row (1,HID) contracted with h's last dim -> lane-dense (1, BM).
    out_ref[...] = lax.dot_general(
        w2_ref[...], h.astype(bf16),
        dimension_numbers=(((1,), (1,)), ((), ())),
        preferred_element_type=jnp.float32)                      # (1, BM)


def _selector_kernel_single(fea_d_ref,
                            wc_ref, bc_ref, w1c_ref, b1eff_ref, w2_ref,
                            out_ref):
    """bs_anchor == 1 path: anchor contribution pre-folded into b1_eff."""
    bf16 = jnp.bfloat16

    xc = jnp.dot(fea_d_ref[...].astype(bf16), wc_ref[...],
                 preferred_element_type=jnp.float32) + bc_ref[...]
    xc = _leaky_relu(xc)

    h = (jnp.dot(xc.astype(bf16), w1c_ref[...], preferred_element_type=jnp.float32)
         + b1eff_ref[...])                                        # (1,HID) broadcasts
    h = _leaky_relu(h)

    out_ref[...] = lax.dot_general(
        w2_ref[...], h.astype(bf16),
        dimension_numbers=(((1,), (1,)), ((), ())),
        preferred_element_type=jnp.float32)                      # (1, BM)


# ---------------------------------------------------------------------------
# Wrapper
# ---------------------------------------------------------------------------

@partial(jax.jit, static_argnames=("block_rows",))
def selector_forward(fea_q, fea_d, params, block_rows=None):
    """fea_q: (bs_anchor, IN_DIM), fea_d: (bs_candi, IN_DIM); bs_anchor in {bs_candi, 1}."""
    wa_t, ba, wc_t, bc, w1a_t, w1c_t, b1, w2, b2 = params

    bs_anchor = fea_q.shape[0]
    bs_candi = fea_d.shape[0]
    assert bs_anchor == bs_candi or bs_anchor == 1
    anchor_single = bs_anchor != bs_candi            # => bs_anchor == 1

    if block_rows is None:
        bm = _choose_block_rows(bs_candi, jax.devices()[0].device_kind)
    else:
        bm = int(block_rows)
    if bm >= bs_candi:
        bm = bs_candi                                # single block == full extent
    num_blocks = _cdiv(bs_candi, bm)
    if num_blocks > 1:
        assert bm % 128 == 0, "multi-block tiles must be lane-dense (multiple of 128)"
    out_cols = num_blocks * bm                       # fresh output slab; tail sliced off

    const = lambda shape: pl.BlockSpec(shape, lambda i: (0, 0))
    d_spec = pl.BlockSpec((bm, IN_DIM), lambda i: (i, 0))
    out_spec = pl.BlockSpec((1, bm), lambda i: (0, i))
    cparams = pltpu.CompilerParams(
        dimension_semantics=("parallel",),
        vmem_limit_bytes=32 << 20,                   # fits v5e/v6e/v7x (v7x: 64 MiB VMEM)
    )

    if anchor_single:
        # Fold the single anchor row into an effective bias (tiny XLA matmuls):
        # b1_eff = b1 + LeakyReLU(fea_q @ Wa^T + ba) @ W1a^T
        bf16 = jnp.bfloat16
        xa = _leaky_relu(jnp.dot(fea_q.astype(bf16), wa_t,
                                 preferred_element_type=jnp.float32) + ba)   # (1, HID)
        b1_eff = b1 + jnp.dot(xa.astype(bf16), w1a_t,
                              preferred_element_type=jnp.float32)            # (1, HID)

        out = pl.pallas_call(
            _selector_kernel_single,
            out_shape=jax.ShapeDtypeStruct((1, out_cols), jnp.float32),
            grid_spec=pltpu.PrefetchScalarGridSpec(
                num_scalar_prefetch=0,
                grid=(num_blocks,),
                in_specs=[
                    d_spec,                    # fea_d  (f32)
                    const((IN_DIM, HID)),      # Wc^T   (bf16)
                    const((1, HID)),           # bc     (f32)
                    const((HID, HID)),         # W1c^T  (bf16)
                    const((1, HID)),           # b1_eff (f32)
                    const((1, HID)),           # W2 row (bf16)
                ],
                out_specs=out_spec,
            ),
            compiler_params=cparams,
        )(fea_d, wc_t, bc, w1c_t, b1_eff, w2)
    else:
        q_spec = pl.BlockSpec((bm, IN_DIM), lambda i: (i, 0))
        out = pl.pallas_call(
            _selector_kernel_shared,
            out_shape=jax.ShapeDtypeStruct((1, out_cols), jnp.float32),
            grid_spec=pltpu.PrefetchScalarGridSpec(
                num_scalar_prefetch=0,
                grid=(num_blocks,),
                in_specs=[
                    q_spec,                    # fea_q  (f32)
                    d_spec,                    # fea_d  (f32)
                    const((IN_DIM, HID)),      # Wa^T   (bf16)
                    const((1, HID)),           # ba     (f32)
                    const((IN_DIM, HID)),      # Wc^T   (bf16)
                    const((1, HID)),           # bc     (f32)
                    const((HID, HID)),         # W1a^T  (bf16)
                    const((HID, HID)),         # W1c^T  (bf16)
                    const((1, HID)),           # b1     (f32)
                    const((1, HID)),           # W2 row (bf16)
                ],
                out_specs=out_spec,
            ),
            compiler_params=cparams,
        )(fea_q, fea_d, wa_t, ba, wc_t, bc, w1a_t, w1c_t, b1, w2)

    # .view(-1) + final bias (b2 folded here instead of a (1,1) VMEM tile per step)
    return out[0, :bs_candi] + b2[0, 0]


# ---------------------------------------------------------------------------
# Parameters & pure-JAX reference
# ---------------------------------------------------------------------------

def init_params(key):
    """Deterministic init matching the nn.Linear shapes in Selector.__init__."""
    ks = jax.random.split(key, 8)

    def linear(kw, kb, fan_in, fan_out):
        bound = 1.0 / jnp.sqrt(fan_in)
        w = jax.random.uniform(kw, (fan_out, fan_in), jnp.float32, -bound, bound)
        b = jax.random.uniform(kb, (fan_out,), jnp.float32, -bound, bound)
        return w, b

    wa, ba = linear(ks[0], ks[1], IN_DIM, HID)     # linear_anchor
    wc, bc = linear(ks[2], ks[3], IN_DIM, HID)     # linear_candi
    w1, b1 = linear(ks[4], ks[5], IN_DIM, HID)     # linear1
    w2, b2 = linear(ks[6], ks[7], HID, 1)          # linear2

    bf16 = jnp.bfloat16
    # pre-transpose to (in, out), split W1 by columns, cast matmul weights to bf16
    return (
        wa.T.astype(bf16), ba.reshape(1, HID),
        wc.T.astype(bf16), bc.reshape(1, HID),
        w1[:, :HID].T.astype(bf16), w1[:, HID:].T.astype(bf16), b1.reshape(1, HID),
        w2.astype(bf16),                            # keep as (1, HID) row
        b2.reshape(1, 1),
    )


def reference_forward(fea_q, fea_d, params):
    """Pure-JAX reference mirroring the kernel math (bf16 operands, f32 accumulate)."""
    wa_t, ba, wc_t, bc, w1a_t, w1c_t, b1, w2, b2 = params
    bf16, f32 = jnp.bfloat16, jnp.float32
    bs_candi = fea_d.shape[0]
    xa = _leaky_relu(jnp.dot(fea_q.astype(bf16), wa_t, preferred_element_type=f32) + ba)
    xa = jnp.broadcast_to(xa, (bs_candi, HID))
    xc = _leaky_relu(jnp.dot(fea_d.astype(bf16), wc_t, preferred_element_type=f32) + bc)
    h = _leaky_relu(jnp.dot(xa.astype(bf16), w1a_t, preferred_element_type=f32)
                    + jnp.dot(xc.astype(bf16), w1c_t, preferred_element_type=f32) + b1)
    return (jnp.dot(h.astype(bf16), w2.T, preferred_element_type=f32) + b2).reshape(-1)


if __name__ == "__main__":
    key = jax.random.PRNGKey(0)
    kp, kq, kd, kd2 = jax.random.split(key, 4)

    params = init_params(kp)

    bs = 4  # small batch; feature dim fixed at IN_DIM=1024 by the module
    fea_q = jax.random.normal(kq, (bs, IN_DIM), jnp.float32)
    fea_d = jax.random.normal(kd, (bs, IN_DIM), jnp.float32)

    # shared-batch path (bs_anchor == bs_candi)
    logit = selector_forward(fea_q, fea_d, params)
    jax.block_until_ready(logit)
    ref = reference_forward(fea_q, fea_d, params)
    assert logit.shape == (bs,)
    assert jnp.allclose(logit, ref, rtol=1e-2, atol=1e-2)

    # bs_anchor == 1 broadcast path (anchor folded into b1_eff; no anchor work in-kernel)
    logit_b1 = selector_forward(fea_q[:1], fea_d, params)
    jax.block_until_ready(logit_b1)
    ref_b1 = reference_forward(fea_q[:1], fea_d, params)
    assert logit_b1.shape == (bs,)
    assert jnp.allclose(logit_b1, ref_b1, rtol=1e-2, atol=1e-2)

    # ragged multi-block path (no jnp.pad: last block is a partial block, tail sliced off)
    bs2 = 260
    fea_q2 = jax.random.normal(kq, (bs2, IN_DIM), jnp.float32)
    fea_d2 = jax.random.normal(kd2, (bs2, IN_DIM), jnp.float32)
    logit2 = selector_forward(fea_q2, fea_d2, params, block_rows=128)
    jax.block_until_ready(logit2)
    ref2 = reference_forward(fea_q2, fea_d2, params)
    assert logit2.shape == (bs2,)
    assert jnp.allclose(logit2, ref2, rtol=1e-2, atol=1e-2)

    print("KERNEL_OK")
</pallas_src>

<mosaic_0001>
module attributes {stable_mosaic.version = 11 : i64} {
  func.func @_selector_kernel_shared(%arg0: i32, %arg1: memref<4x1024xf32, #tpu.memory_space<vmem>>, %arg2: memref<4x1024xf32, #tpu.memory_space<vmem>>, %arg3: memref<1024x512xbf16, #tpu.memory_space<vmem>>, %arg4: memref<1x512xf32, #tpu.memory_space<vmem>>, %arg5: memref<1024x512xbf16, #tpu.memory_space<vmem>>, %arg6: memref<1x512xf32, #tpu.memory_space<vmem>>, %arg7: memref<512x512xbf16, #tpu.memory_space<vmem>>, %arg8: memref<512x512xbf16, #tpu.memory_space<vmem>>, %arg9: memref<1x512xf32, #tpu.memory_space<vmem>>, %arg10: memref<1x512xbf16, #tpu.memory_space<vmem>>, %arg11: memref<1x4xf32, #tpu.memory_space<vmem>>) attributes {dimension_semantics = [#tpu.dimension_semantics<parallel>], iteration_bounds = array<i64: 1>, scalar_prefetch = 0 : i64, scratch_operands = 0 : i64, tpu.core_type = #tpu.core_type<tc>, window_params = [{transform_indices = @transform_0, window_bounds = array<i64: 4, 1024>}, {transform_indices = @transform_1, window_bounds = array<i64: 4, 1024>}, {pipeline_mode = #tpu.pipeline_mode<synchronous>, transform_indices = @transform_2, window_bounds = array<i64: 1024, 512>}, {pipeline_mode = #tpu.pipeline_mode<synchronous>, transform_indices = @transform_3, window_bounds = array<i64: 1, 512>}, {pipeline_mode = #tpu.pipeline_mode<synchronous>, transform_indices = @transform_4, window_bounds = array<i64: 1024, 512>}, {pipeline_mode = #tpu.pipeline_mode<synchronous>, transform_indices = @transform_5, window_bounds = array<i64: 1, 512>}, {pipeline_mode = #tpu.pipeline_mode<synchronous>, transform_indices = @transform_6, window_bounds = array<i64: 512, 512>}, {pipeline_mode = #tpu.pipeline_mode<synchronous>, transform_indices = @transform_7, window_bounds = array<i64: 512, 512>}, {pipeline_mode = #tpu.pipeline_mode<synchronous>, transform_indices = @transform_8, window_bounds = array<i64: 1, 512>}, {pipeline_mode = #tpu.pipeline_mode<synchronous>, transform_indices = @transform_9, window_bounds = array<i64: 1, 512>}, {transform_indices = @transform_10, window_bounds = array<i64: 1, 4>}]} {
    %c0 = arith.constant 0 : index
    %c0_0 = arith.constant 0 : index
    %0 = vector.load %arg2[%c0, %c0_0] : memref<4x1024xf32, #tpu.memory_space<vmem>>, vector<4x1024xf32>
    %1 = arith.truncf %0 : vector<4x1024xf32> to vector<4x1024xbf16>
    %c0_1 = arith.constant 0 : index
    %c0_2 = arith.constant 0 : index
    %2 = vector.load %arg5[%c0_1, %c0_2] : memref<1024x512xbf16, #tpu.memory_space<vmem>>, vector<1024x512xbf16>
    %cst = arith.constant dense<0.000000e+00> : vector<4x512xf32>
    %3 = tpu.matmul %1, %2, %cst {dimension_numbers = #tpu.dot_dimension_numbers<[1], [0], [0], [1], [0, 0, 1, 1], [], []>} : vector<4x1024xbf16>, vector<1024x512xbf16>, vector<4x512xf32> -> vector<4x512xf32>
    %c0_3 = arith.constant 0 : index
    %c0_4 = arith.constant 0 : index
    %4 = vector.load %arg6[%c0_3, %c0_4] : memref<1x512xf32, #tpu.memory_space<vmem>>, vector<1x512xf32>
    %5 = vector.broadcast %4 : vector<1x512xf32> to vector<4x512xf32>
    %6 = arith.addf %3, %5 : vector<4x512xf32>
    %cst_5 = arith.constant 0.000000e+00 : f32
    %7 = vector.broadcast %cst_5 : f32 to vector<4x512xf32>
    %8 = arith.cmpf oge, %6, %7 : vector<4x512xf32>
    %cst_6 = arith.constant 0.00999999977 : f32
    %9 = vector.broadcast %cst_6 : f32 to vector<4x512xf32>
    %10 = arith.mulf %9, %6 : vector<4x512xf32>
    %11 = arith.select %8, %6, %10 : vector<4x512xi1>, vector<4x512xf32>
    %c0_7 = arith.constant 0 : index
    %c0_8 = arith.constant 0 : index
    %12 = vector.load %arg1[%c0_7, %c0_8] : memref<4x1024xf32, #tpu.memory_space<vmem>>, vector<4x1024xf32>
    %13 = arith.truncf %12 : vector<4x1024xf32> to vector<4x1024xbf16>
    %c0_9 = arith.constant 0 : index
    %c0_10 = arith.constant 0 : index
    %14 = vector.load %arg3[%c0_9, %c0_10] : memref<1024x512xbf16, #tpu.memory_space<vmem>>, vector<1024x512xbf16>
    %cst_11 = arith.constant dense<0.000000e+00> : vector<4x512xf32>
    %15 = tpu.matmul %13, %14, %cst_11 {dimension_numbers = #tpu.dot_dimension_numbers<[1], [0], [0], [1], [0, 0, 1, 1], [], []>} : vector<4x1024xbf16>, vector<1024x512xbf16>, vector<4x512xf32> -> vector<4x512xf32>
    %c0_12 = arith.constant 0 : index
    %c0_13 = arith.constant 0 : index
    %16 = vector.load %arg4[%c0_12, %c0_13] : memref<1x512xf32, #tpu.memory_space<vmem>>, vector<1x512xf32>
    %17 = vector.broadcast %16 : vector<1x512xf32> to vector<4x512xf32>
    %18 = arith.addf %15, %17 : vector<4x512xf32>
    %cst_14 = arith.constant 0.000000e+00 : f32
    %19 = vector.broadcast %cst_14 : f32 to vector<4x512xf32>
    %20 = arith.cmpf oge, %18, %19 : vector<4x512xf32>
    %cst_15 = arith.constant 0.00999999977 : f32
    %21 = vector.broadcast %cst_15 : f32 to vector<4x512xf32>
    %22 = arith.mulf %21, %18 : vector<4x512xf32>
    %23 = arith.select %20, %18, %22 : vector<4x512xi1>, vector<4x512xf32>
    %24 = arith.truncf %11 : vector<4x512xf32> to vector<4x512xbf16>
    %c0_16 = arith.constant 0 : index
    %c0_17 = arith.constant 0 : index
    %25 = vector.load %arg8[%c0_16, %c0_17] : memref<512x512xbf16, #tpu.memory_space<vmem>>, vector<512x512xbf16>
    %cst_18 = arith.constant dense<0.000000e+00> : vector<4x512xf32>
    %26 = tpu.matmul %24, %25, %cst_18 {dimension_numbers = #tpu.dot_dimension_numbers<[1], [0], [0], [1], [0, 0, 1, 1], [], []>} : vector<4x512xbf16>, vector<512x512xbf16>, vector<4x512xf32> -> vector<4x512xf32>
    %27 = arith.truncf %23 : vector<4x512xf32> to vector<4x512xbf16>
    %c0_19 = arith.constant 0 : index
    %c0_20 = arith.constant 0 : index
    %28 = vector.load %arg7[%c0_19, %c0_20] : memref<512x512xbf16, #tpu.memory_space<vmem>>, vector<512x512xbf16>
    %cst_21 = arith.constant dense<0.000000e+00> : vector<4x512xf32>
    %29 = tpu.matmul %27, %28, %cst_21 {dimension_numbers = #tpu.dot_dimension_numbers<[1], [0], [0], [1], [0, 0, 1, 1], [], []>} : vector<4x512xbf16>, vector<512x512xbf16>, vector<4x512xf32> -> vector<4x512xf32>
    %30 = arith.addf %26, %29 : vector<4x512xf32>
    %c0_22 = arith.constant 0 : index
    %c0_23 = arith.constant 0 : index
    %31 = vector.load %arg9[%c0_22, %c0_23] : memref<1x512xf32, #tpu.memory_space<vmem>>, vector<1x512xf32>
    %32 = vector.broadcast %31 : vector<1x512xf32> to vector<4x512xf32>
    %33 = arith.addf %30, %32 : vector<4x512xf32>
    %cst_24 = arith.constant 0.000000e+00 : f32
    %34 = vector.broadcast %cst_24 : f32 to vector<4x512xf32>
    %35 = arith.cmpf oge, %33, %34 : vector<4x512xf32>
    %cst_25 = arith.constant 0.00999999977 : f32
    %36 = vector.broadcast %cst_25 : f32 to vector<4x512xf32>
    %37 = arith.mulf %36, %33 : vector<4x512xf32>
    %38 = arith.select %35, %33, %37 : vector<4x512xi1>, vector<4x512xf32>
    %c0_26 = arith.constant 0 : index
    %c0_27 = arith.constant 0 : index
    %39 = vector.load %arg10[%c0_26, %c0_27] : memref<1x512xbf16, #tpu.memory_space<vmem>>, vector<1x512xbf16>
    %40 = arith.truncf %38 : vector<4x512xf32> to vector<4x512xbf16>
    %cst_28 = arith.constant dense<0.000000e+00> : vector<1x4xf32>
    %41 = tpu.matmul %39, %40, %cst_28 {dimension_numbers = #tpu.dot_dimension_numbers<[1], [1], [0], [0], [0, 0, 1, 0], [], []>} : vector<1x512xbf16>, vector<4x512xbf16>, vector<1x4xf32> -> vector<1x4xf32>
    %c0_29 = arith.constant 0 : index
    %c0_30 = arith.constant 0 : index
    %42 = vector.load %arg11[%c0_29, %c0_30] : memref<1x4xf32, #tpu.memory_space<vmem>>, vector<1x4xf32>
    tpu.vector_store %arg11[%c0_29, %c0_30], %41 {strides = array<i32>} : memref<1x4xf32, #tpu.memory_space<vmem>>, vector<1x4xf32>,
    return
  }
  func.func @transform_0(%arg0: i32) -> (i32, i32) {
    %c0_i32 = arith.constant 0 : i32
    %c0_i32_0 = arith.constant 0 : i32
    return %arg0, %c0_i32 : i32, i32
  }
  func.func @transform_1(%arg0: i32) -> (i32, i32) {
    %c0_i32 = arith.constant 0 : i32
    %c0_i32_0 = arith.constant 0 : i32
    return %arg0, %c0_i32 : i32, i32
  }
  func.func @transform_2(%arg0: i32) -> (i32, i32) {
    %c0_i32 = arith.constant 0 : i32
    %c0_i32_0 = arith.constant 0 : i32
    %c0_i32_1 = arith.constant 0 : i32
    return %c0_i32, %c0_i32_0 : i32, i32
  }
  func.func @transform_3(%arg0: i32) -> (i32, i32) {
    %c0_i32 = arith.constant 0 : i32
    %c0_i32_0 = arith.constant 0 : i32
    %c0_i32_1 = arith.constant 0 : i32
    return %c0_i32, %c0_i32_0 : i32, i32
  }
  func.func @transform_4(%arg0: i32) -> (i32, i32) {
    %c0_i32 = arith.constant 0 : i32
    %c0_i32_0 = arith.constant 0 : i32
    %c0_i32_1 = arith.constant 0 : i32
    return %c0_i32, %c0_i32_0 : i32, i32
  }
  func.func @transform_5(%arg0: i32) -> (i32, i32) {
    %c0_i32 = arith.constant 0 : i32
    %c0_i32_0 = arith.constant 0 : i32
    %c0_i32_1 = arith.constant 0 : i32
    return %c0_i32, %c0_i32_0 : i32, i32
  }
  func.func @transform_6(%arg0: i32) -> (i32, i32) {
    %c0_i32 = arith.constant 0 : i32
    %c0_i32_0 = arith.constant 0 : i32
    %c0_i32_1 = arith.constant 0 : i32
    return %c0_i32, %c0_i32_0 : i32, i32
  }
  func.func @transform_7(%arg0: i32) -> (i32, i32) {
    %c0_i32 = arith.constant 0 : i32
    %c0_i32_0 = arith.constant 0 : i32
    %c0_i32_1 = arith.constant 0 : i32
    return %c0_i32, %c0_i32_0 : i32, i32
  }
  func.func @transform_8(%arg0: i32) -> (i32, i32) {
    %c0_i32 = arith.constant 0 : i32
    %c0_i32_0 = arith.constant 0 : i32
    %c0_i32_1 = arith.constant 0 : i32
    return %c0_i32, %c0_i32_0 : i32, i32
  }
  func.func @transform_9(%arg0: i32) -> (i32, i32) {
    %c0_i32 = arith.constant 0 : i32
    %c0_i32_0 = arith.constant 0 : i32
    %c0_i32_1 = arith.constant 0 : i32
    return %c0_i32, %c0_i32_0 : i32, i32
  }
  func.func @transform_10(%arg0: i32) -> (i32, i32) {
    %c0_i32 = arith.constant 0 : i32
    %c0_i32_0 = arith.constant 0 : i32
    return %c0_i32, %arg0 : i32, i32
  }
}

</mosaic_0001>

<bundles_post_ra>
// kernel: selector_forward.1
= control target key start
LH: loop header
LB: loop body
LE: loop exit
PB: predicated region body
PF: predicated region fallthrough
CT: control target
= control target key end

     0   :  { %15 = vsyncpa [#allocation3], 0  ;;  %s8406_s0 = inlined_call_operand.hbm [shape: f32[4,1024], index: 0, kind: input, shape index: {}]   ;;  %s8407_s1 = inlined_call_operand.hbm [shape: f32[4,1024], index: 1, kind: input, shape index: {}]   ;;  %s8408_s2 = inlined_call_operand.hbm [shape: bf16[1024,512], index: 2, kind: input, shape index: {}]   ;;  %s8409_s3 = inlined_call_operand.vmem [shape: f32[1,512], index: 3, kind: input, shape index: {}]   ;;  %s8410_s4 = inlined_call_operand.hbm [shape: bf16[1024,512], index: 4, kind: input, shape index: {}]   ;;  %s8411_s5 = inlined_call_operand.vmem [shape: f32[1,512], index: 5, kind: input, shape index: {}]   ;;  %s8412_s6 = inlined_call_operand.hbm [shape: bf16[512,512], index: 6, kind: input, shape index: {}]   ;;  %s8413_s7 = inlined_call_operand.hbm [shape: bf16[512,512], index: 7, kind: input, shape index: {}]   ;;  %s8414_s8 = inlined_call_operand.vmem [shape: f32[1,512], index: 8, kind: input, shape index: {}]   ;;  %s8415_s9 = inlined_call_operand.vmem [shape: bf16[1,512], index: 9, kind: input, shape index: {}]   ;;  %s8416_s10 = inlined_call_operand.vmem [shape: f32[1,4], index: 10, kind: output, shape index: {}]  }
   0x1   :  { %16 = vsyncpa [#allocation5], 0 }
   0x2   :  { %17 = vsyncpa [#allocation8], 0 }
   0x3   :  { %18 = vsyncpa [#allocation11], 0  ;;  %s8128_s13 = smov [#allocation4]   ;;  %s7988_s17 = scalar_lea.hbm %s8407_s1, 512 }
   0x4   :  { %s35_s14 = sshll.u32 %s8128_s13, 4  ;;  %p7989_p0 = scmp.ne.s32.totalorder %s8407_s1, %s7988_s17  ;;  %s36_s14 = int_to_ptr.vmem [resolvable:$true] %s35_s14 }
   0x5   :  { %p7992_p1 = scmp.lt.u32.totalorder %s7988_s17, %s8407_s1 }
   0x7   :  { %p7994_p2 = pnand %p7992_p1, %p7989_p0 }
   0x9   :  { %7997 = shalt.err (!%p7994_p2)
}
   0xa   :  { %s7998_s22 = scalar_lea.vmem %s36_s14, 512  ;;  %p8003_p4 = scmp.lt.s32.totalorder %s36_s14, %s36_s14 }
   0xb   :  { %p7999_p3 = scmp.ne.s32.totalorder %s36_s14, %s7998_s22  ;;  %p8004_p5 = scmp.lt.s32.totalorder %s7998_s22, %s7998_s22 }
   0xd   :  { %p8005_p6 = por %p8004_p5, %p8003_p4 }
   0xf   :  { %p8006_p7 = pnand %p8005_p6, %p7999_p3 }
  0x11   :  { %8009 = shalt.err (!%p8006_p7)
}
  0x12   :  { %38 = dma.hbm_to_vmem [thread:$0]  %s8407_s1, 512, %s36_s14, [#allocation5]  }
  0x13   :  { %s8129_s25 = smov [#allocation7]   ;;  %s8130_s27 = smov [#allocation2]  }
  0x14   :  { %s58_s26 = sshll.u32 %s8129_s25, 4  ;;  %s25_s28 = sshll.u32 %s8130_s27, 4  ;;  %s59_s26 = int_to_ptr.vmem [resolvable:$true] %s58_s26  ;;  %s26_s28 = int_to_ptr.vmem [resolvable:$true] %s25_s28 }
  0x15   :  { %s8010_s11 = scalar_lea.hbm %s8410_s4, 32768 }
  0x16   :  { %p8011_p8 = scmp.ne.s32.totalorder %s8410_s4, %s8010_s11  ;;  %p8014_p9 = scmp.lt.u32.totalorder %s8010_s11, %s8410_s4 }
  0x18   :  { %p8016_p10 = pnand %p8014_p9, %p8011_p8 }
  0x1a   :  { %8019 = shalt.err (!%p8016_p10)
}
  0x1b   :  { %s8020_s1 = scalar_lea.vmem %s59_s26, 32768  ;;  %p8025_p12 = scmp.lt.s32.totalorder %s59_s26, %s59_s26 }
  0x1c   :  { %p8021_p11 = scmp.ne.s32.totalorder %s59_s26, %s8020_s1  ;;  %p8026_p13 = scmp.lt.s32.totalorder %s8020_s1, %s8020_s1 }
  0x1e   :  { %p8027_p0 = por %p8026_p13, %p8025_p12 }
  0x20   :  { %p8028_p1 = pnand %p8027_p0, %p8021_p11 }
  0x22   :  { %8031 = shalt.err (!%p8028_p1)
}
  0x23   :  { %s8131_s14 = smov 256   ;;  %s8132_s17 = smov 16  }
  0x24   :  { %64 = dma.hbm_to_vmem [thread:$0]  %s8410_s4, 32768, %s59_s26, [#allocation8], %s8131_s14, %s8131_s14, %s8132_s17  }
  0x25   :  { %s8032_s22 = scalar_lea.hbm %s8406_s0, 512 }
  0x26   :  { %p8033_p2 = scmp.ne.s32.totalorder %s8406_s0, %s8032_s22  ;;  %p8036_p3 = scmp.lt.u32.totalorder %s8032_s22, %s8406_s0 }
  0x28   :  { %p8038_p4 = pnand %p8036_p3, %p8033_p2 }
  0x2a   :  { %8041 = shalt.err (!%p8038_p4)
}
  0x2b   :  { %s8042_s29 = scalar_lea.vmem %s26_s28, 512  ;;  %p8047_p6 = scmp.lt.s32.totalorder %s26_s28, %s26_s28 }
  0x2c   :  { %p8043_p5 = scmp.ne.s32.totalorder %s26_s28, %s8042_s29  ;;  %p8048_p7 = scmp.lt.s32.totalorder %s8042_s29, %s8042_s29 }
  0x2e   :  { %p8049_p8 = por %p8048_p7, %p8047_p6 }
  0x30   :  { %p8050_p9 = pnand %p8049_p8, %p8043_p5 }
  0x32   :  { %8053 = shalt.err (!%p8050_p9)
}
  0x33   :  { %28 = dma.hbm_to_vmem [thread:$0]  %s8406_s0, 512, %s26_s28, [#allocation3]  }
  0x34   :  { %s8133_s30 = smov [#allocation6]   ;;  %s8134_s12 = smov [#allocation9]  }
  0x35   :  { %s44_s11 = sshll.u32 %s8133_s30, 4  ;;  %s72_s13 = sshll.u32 %s8134_s12, 4  ;;  %s45_s11 = int_to_ptr.vmem [resolvable:$true] %s44_s11  ;;  %s73_s13 = int_to_ptr.vmem [resolvable:$true] %s72_s13 }
  0x36   :  { %s8054_s1 = scalar_lea.hbm %s8408_s2, 32768 }
  0x37   :  { %p8055_p10 = scmp.ne.s32.totalorder %s8408_s2, %s8054_s1  ;;  %p8058_p11 = scmp.lt.u32.totalorder %s8054_s1, %s8408_s2 }
  0x39   :  { %p8060_p12 = pnand %p8058_p11, %p8055_p10 }
  0x3b   :  { %8063 = shalt.err (!%p8060_p12)
}
  0x3c   :  { %s8064_s0 = scalar_lea.vmem %s45_s11, 32768  ;;  %p8069_p0 = scmp.lt.s32.totalorder %s45_s11, %s45_s11 }
  0x3d   :  { %p8065_p13 = scmp.ne.s32.totalorder %s45_s11, %s8064_s0  ;;  %p8070_p1 = scmp.lt.s32.totalorder %s8064_s0, %s8064_s0 }
  0x3f   :  { %p8071_p2 = por %p8070_p1, %p8069_p0 }
  0x41   :  { %p8072_p3 = pnand %p8071_p2, %p8065_p13 }
  0x43   :  { %8075 = shalt.err (!%p8072_p3)
}
  0x44   :  { %50 = dma.hbm_to_vmem [thread:$0]  %s8408_s2, 32768, %s45_s11, [#allocation5], %s8131_s14, %s8131_s14, %s8132_s17  }
  0x45   :  { %s8076_s25 = scalar_lea.hbm %s8412_s6, 16384 }
  0x46   :  { %p8077_p4 = scmp.ne.s32.totalorder %s8412_s6, %s8076_s25  ;;  %p8080_p5 = scmp.lt.u32.totalorder %s8076_s25, %s8412_s6 }
  0x48   :  { %p8082_p6 = pnand %p8080_p5, %p8077_p4 }
  0x4a   :  { %8085 = shalt.err (!%p8082_p6)
}
  0x4b   :  { %s8086_s30 = scalar_lea.vmem %s73_s13, 16384  ;;  %p8091_p8 = scmp.lt.s32.totalorder %s73_s13, %s73_s13 }
  0x4c   :  { %p8087_p7 = scmp.ne.s32.totalorder %s73_s13, %s8086_s30  ;;  %p8092_p9 = scmp.lt.s32.totalorder %s8086_s30, %s8086_s30 }
  0x4e   :  { %p8093_p10 = por %p8092_p9, %p8091_p8 }
  0x50   :  { %p8094_p11 = pnand %p8093_p10, %p8087_p7 }
  0x52   :  { %8097 = shalt.err (!%p8094_p11)
}
  0x53   :  { %78 = dma.hbm_to_vmem [thread:$0]  %s8412_s6, 16384, %s73_s13, [#allocation8], %s8131_s14, %s8131_s14, %s8132_s17  }
  0x54   :  { %s8135_s12 = smov [#allocation10]   ;;  %s8098_s18 = scalar_lea.hbm %s8413_s7, 16384 }
  0x55   :  { %s84_s15 = sshll.u32 %s8135_s12, 4  ;;  %p8099_p12 = scmp.ne.s32.totalorder %s8413_s7, %s8098_s18  ;;  %s85_s15 = int_to_ptr.vmem [resolvable:$true] %s84_s15 }
  0x56   :  { %p8102_p13 = scmp.lt.u32.totalorder %s8098_s18, %s8413_s7 }
  0x58   :  { %p8104_p0 = pnand %p8102_p13, %p8099_p12 }
  0x5a   :  { %8107 = shalt.err (!%p8104_p0)
}
  0x5b   :  { %s8108_s28 = scalar_lea.vmem %s85_s15, 16384  ;;  %p8113_p2 = scmp.lt.s32.totalorder %s85_s15, %s85_s15 }
  0x5c   :  { %p8109_p1 = scmp.ne.s32.totalorder %s85_s15, %s8108_s28  ;;  %p8114_p3 = scmp.lt.s32.totalorder %s8108_s28, %s8108_s28 }
  0x5e   :  { %p8115_p4 = por %p8114_p3, %p8113_p2 }
  0x60   :  { %p8116_p5 = pnand %p8115_p4, %p8109_p1 }
  0x62   :  { %8119 = shalt.err (!%p8116_p5)
}
  0x63   :  { %90 = dma.hbm_to_vmem [thread:$0]  %s8413_s7, 16384, %s85_s15, [#allocation11], %s8131_s14, %s8131_s14, %s8132_s17  }
  0x64   :  { %8120 = dma.done.wait [#allocation3], 512  }
  0x65   :  { %8121 = vsyncadd [#allocation3], 4294966784 }
  0x66   :  { %8122 = dma.done.wait [#allocation5], 33280  }
  0x67   :  { %8123 = vsyncadd [#allocation5], 4294934016 }
  0x68   :  { %8124 = dma.done.wait [#allocation8], 49152  }
  0x69   :  { %8125 = vsyncadd [#allocation8], 4294918144 }
  0x6a   :  { %8126 = dma.done.wait [#allocation11], 16384  }
  0x6b   :  { %8127 = vsyncadd [#allocation11], 4294950912  ;;  %v6827_v0 = vld [vmem:[#allocation7 + $0x4] ss:$16 sps:$4 sm:$0xff]   ;;  %v6829_v1 = vld [vmem:[#allocation7 + $0xc] ss:$16 sps:$4 sm:$0xff]  }
  0x6c   :  { %1696 = vmatprep.subr.bf16.mxu0 %v6827_v0  ;;  %v6831_v2 = vld [vmem:[#allocation7] ss:$16 sps:$4 sm:$0xff]   ;;  %v6832_v3 = vld [vmem:[#allocation7 + $0x8] ss:$16 sps:$4 sm:$0xff]   ;;  %1860 = vmatprep.subr.bf16.mxu1 %v6829_v1  ;;  %v6833_v4 = vld [vmem:[#allocation7 + $0x24] ss:$16 sps:$4 sm:$0xff]  }
  0x6d   :  { %1697 = vmatpush1.bf16.msra.mxu0 %v6831_v2  ;;  %1861 = vmatpush1.bf16.msra.mxu1 %v6832_v3  ;;  %v6835_v5 = vld [vmem:[#allocation7 + $0x2c] ss:$16 sps:$4 sm:$0xff]   ;;  %v6837_v6 = vld [vmem:[#allocation7 + $0x20] ss:$16 sps:$4 sm:$0xff]   ;;  %v6838_v7 = vld [vmem:[#allocation7 + $0x28] ss:$16 sps:$4 sm:$0xff]  }
  0x6e   :  { %1698 = vmatprep.subr.bf16.mxu0 %v6833_v4  ;;  %1862 = vmatprep.subr.bf16.mxu1 %v6835_v5  ;;  %v6839_v8 = vld [vmem:[#allocation7 + $0x44] ss:$16 sps:$4 sm:$0xff]   ;;  %v6841_v9 = vld [vmem:[#allocation7 + $0x4c] ss:$16 sps:$4 sm:$0xff]   ;;  %v6843_v10 = vld [vmem:[#allocation7 + $0x40] ss:$16 sps:$4 sm:$0xff]  }
  0x6f   :  { %v6844_v11 = vld [vmem:[#allocation7 + $0x48] ss:$16 sps:$4 sm:$0xff]   ;;  %v6845_v12 = vld [vmem:[#allocation7 + $0x64] ss:$16 sps:$4 sm:$0xff]   ;;  %v6847_v13 = vld [vmem:[#allocation7 + $0x6c] ss:$16 sps:$4 sm:$0xff]  }
  0x70   :  { %v6849_v14 = vld [vmem:[#allocation7 + $0x60] ss:$16 sps:$4 sm:$0xff]   ;;  %v6850_v15 = vld [vmem:[#allocation7 + $0x68] ss:$16 sps:$4 sm:$0xff]   ;;  %v6851_v16 = vld [vmem:[#allocation7 + $0x84] ss:$16 sps:$4 sm:$0xff]  }
  0x71   :  { %1699 = vmatpush1.bf16.msra.mxu0 %v6837_v6  ;;  %1863 = vmatpush1.bf16.msra.mxu1 %v6838_v7  ;;  %v6853_v17 = vld [vmem:[#allocation7 + $0x8c] ss:$16 sps:$4 sm:$0xff]   ;;  %v6855_v18 = vld [vmem:[#allocation7 + $0x80] ss:$16 sps:$4 sm:$0xff]   ;;  %v6856_v19 = vld [vmem:[#allocation7 + $0x88] ss:$16 sps:$4 sm:$0xff]  }
  0x72   :  { %1700 = vmatprep.subr.bf16.mxu0 %v6839_v8  ;;  %1864 = vmatprep.subr.bf16.mxu1 %v6841_v9  ;;  %v6857_v20 = vld [vmem:[#allocation7 + $0xa4] ss:$16 sps:$4 sm:$0xff]   ;;  %v6859_v21 = vld [vmem:[#allocation7 + $0xac] ss:$16 sps:$4 sm:$0xff]   ;;  %v6861_v22 = vld [vmem:[#allocation7 + $0xa0] ss:$16 sps:$4 sm:$0xff]  }
  0x73   :  { %v6862_v23 = vld [vmem:[#allocation7 + $0xa8] ss:$16 sps:$4 sm:$0xff]   ;;  %v6863_v24 = vld [vmem:[#allocation7 + $0xc4] ss:$16 sps:$4 sm:$0xff]   ;;  %v6865_v25 = vld [vmem:[#allocation7 + $0xcc] ss:$16 sps:$4 sm:$0xff]  }
  0x74   :  { %v6867_v26 = vld [vmem:[#allocation7 + $0xc0] ss:$16 sps:$4 sm:$0xff]   ;;  %v6868_v27 = vld [vmem:[#allocation7 + $0xc8] ss:$16 sps:$4 sm:$0xff]   ;;  %v6869_v28 = vld [vmem:[#allocation7 + $0xe4] ss:$16 sps:$4 sm:$0xff]  }
  0x75   :  { %1701 = vmatpush1.bf16.msra.mxu0 %v6843_v10  ;;  %1865 = vmatpush1.bf16.msra.mxu1 %v6844_v11  ;;  %v6871_v29 = vld [vmem:[#allocation7 + $0xec] ss:$16 sps:$4 sm:$0xff]   ;;  %v6873_v30 = vld [vmem:[#allocation7 + $0xe0] ss:$16 sps:$4 sm:$0xff]   ;;  %v6874_v31 = vld [vmem:[#allocation7 + $0xe8] ss:$16 sps:$4 sm:$0xff]  }
  0x76   :  { %1702 = vmatprep.subr.bf16.mxu0 %v6845_v12  ;;  %1866 = vmatprep.subr.bf16.mxu1 %v6847_v13  ;;  %v6875_v32 = vld [vmem:[#allocation7 + $0x104] ss:$16 sps:$4 sm:$0xff]   ;;  %v6877_v33 = vld [vmem:[#allocation7 + $0x10c] ss:$16 sps:$4 sm:$0xff]   ;;  %v6879_v34 = vld [vmem:[#allocation7 + $0x100] ss:$16 sps:$4 sm:$0xff]  }
  0x77   :  { %v6880_v35 = vld [vmem:[#allocation7 + $0x108] ss:$16 sps:$4 sm:$0xff]   ;;  %v6881_v36 = vld [vmem:[#allocation7 + $0x124] ss:$16 sps:$4 sm:$0xff]   ;;  %v6883_v37 = vld [vmem:[#allocation7 + $0x12c] ss:$16 sps:$4 sm:$0xff]  }
  0x78   :  { %v6885_v38 = vld [vmem:[#allocation7 + $0x120] ss:$16 sps:$4 sm:$0xff]   ;;  %v6886_v39 = vld [vmem:[#allocation7 + $0x128] ss:$16 sps:$4 sm:$0xff]   ;;  %v6887_v40 = vld [vmem:[#allocation7 + $0x144] ss:$16 sps:$4 sm:$0xff]  }
  0x79   :  { %1703 = vmatpush1.bf16.msra.mxu0 %v6849_v14  ;;  %1867 = vmatpush1.bf16.msra.mxu1 %v6850_v15  ;;  %v6889_v41 = vld [vmem:[#allocation7 + $0x14c] ss:$16 sps:$4 sm:$0xff]   ;;  %v6891_v42 = vld [vmem:[#allocation7 + $0x140] ss:$16 sps:$4 sm:$0xff]   ;;  %v6892_v43 = vld [vmem:[#allocation7 + $0x148] ss:$16 sps:$4 sm:$0xff]  }
  0x7a   :  { %1704 = vmatprep.subr.bf16.mxu0 %v6851_v16  ;;  %1868 = vmatprep.subr.bf16.mxu1 %v6853_v17  ;;  %v6893_v44 = vld [vmem:[#allocation7 + $0x164] ss:$16 sps:$4 sm:$0xff]   ;;  %v6895_v45 = vld [vmem:[#allocation7 + $0x16c] ss:$16 sps:$4 sm:$0xff]   ;;  %v6897_v47 = vld [vmem:[#allocation7 + $0x160] ss:$16 sps:$4 sm:$0xff]  }
  0x7b   :  { %v114_v46 = vld [vmem:[#allocation4] sm:$0xff]  ;;  %v6898_v49 = vld [vmem:[#allocation7 + $0x168] ss:$16 sps:$4 sm:$0xff]   ;;  %v6901_v51 = vld [vmem:[#allocation7 + $0x18c] ss:$16 sps:$4 sm:$0xff]   ;;  %vm5982_vm12 = vcmask 24576  }
  0x7c   :  { %v122_v48 = vcombine.high %v114_v46, %v114_v46  ;;  %v6899_v50 = vld [vmem:[#allocation7 + $0x184] ss:$16 sps:$4 sm:$0xff]   ;;  %v6903_v53 = vld [vmem:[#allocation7 + $0x180] ss:$16 sps:$4 sm:$0xff]   ;;  %v6904_v54 = vld [vmem:[#allocation7 + $0x188] ss:$16 sps:$4 sm:$0xff]   ;;  %v130_v6 = vpack.c.bf16 %v114_v46, %v114_v46 }
  0x7d   :  { %1705 = vmatpush1.bf16.msra.mxu0 %v6855_v18  ;;  %1869 = vmatpush1.bf16.msra.mxu1 %v6856_v19  ;;  %v6905_v55 = vld [vmem:[#allocation7 + $0x1a4] ss:$16 sps:$4 sm:$0xff]   ;;  %v6907_v56 = vld [vmem:[#allocation7 + $0x1ac] ss:$16 sps:$4 sm:$0xff]   ;;  %v6909_v57 = vld [vmem:[#allocation7 + $0x1a0] ss:$16 sps:$4 sm:$0xff]  }
  0x7e   :  { %1706 = vmatprep.subr.bf16.mxu0 %v6857_v20  ;;  %1870 = vmatprep.subr.bf16.mxu1 %v6859_v21  ;;  %v131_v52 = vpack.c.bf16 %v122_v48, %v122_v48  ;;  %v6910_v58 = vld [vmem:[#allocation7 + $0x1a8] ss:$16 sps:$4 sm:$0xff]   ;;  %v6911_v59 = vld [vmem:[#allocation7 + $0x1c4] ss:$16 sps:$4 sm:$0xff]   ;;  %v6913_v60 = vld [vmem:[#allocation7 + $0x1cc] ss:$16 sps:$4 sm:$0xff]  }
  0x7f   :  { %v6915_v61 = vld [vmem:[#allocation7 + $0x1c0] ss:$16 sps:$4 sm:$0xff]   ;;  %v6916_v62 = vld [vmem:[#allocation7 + $0x1c8] ss:$16 sps:$4 sm:$0xff]   ;;  %v6917_v63 = vld [vmem:[#allocation7 + $0x1e4] ss:$16 sps:$4 sm:$0xff]  }
  0x80   :  { %1728 = vmatprep.mubr.bf16.mxu0 %v131_v52  ;;  %1892 = vmatprep.mubr.bf16.mxu1 %v131_v52  ;;  %v6919_v0 = vld [vmem:[#allocation7 + $0x1ec] ss:$16 sps:$4 sm:$0xff]   ;;  %v6921_v1 = vld [vmem:[#allocation7 + $0x1e0] ss:$16 sps:$4 sm:$0xff]   ;;  %v6922_v2 = vld [vmem:[#allocation7 + $0x1e8] ss:$16 sps:$4 sm:$0xff]  }
  0x81   :  { %1707 = vmatpush1.bf16.msra.mxu0 %v6861_v22  ;;  %1871 = vmatpush1.bf16.msra.mxu1 %v6862_v23  ;;  %v6926_v3 = vld [vmem:[#allocation7 + $0x204] ss:$16 sps:$4 sm:$0xff]   ;;  %v6929_v4 = vld [vmem:[#allocation7 + $0x20c] ss:$16 sps:$4 sm:$0xff]   ;;  %v6924_v5 = vld [vmem:[#allocation7 + $0x200] ss:$16 sps:$4 sm:$0xff]  }
  0x82   :  { %1708 = vmatprep.subr.bf16.mxu0 %v6863_v24  ;;  %1872 = vmatprep.subr.bf16.mxu1 %v6865_v25  ;;  %v6927_v7 = vld [vmem:[#allocation7 + $0x208] ss:$16 sps:$4 sm:$0xff]   ;;  %v6932_v8 = vld [vmem:[#allocation7 + $0x224] ss:$16 sps:$4 sm:$0xff]   ;;  %v6935_v9 = vld [vmem:[#allocation7 + $0x22c] ss:$16 sps:$4 sm:$0xff]  }
  0x83   :  { %v6930_v10 = vld [vmem:[#allocation7 + $0x220] ss:$16 sps:$4 sm:$0xff]   ;;  %v6933_v11 = vld [vmem:[#allocation7 + $0x228] ss:$16 sps:$4 sm:$0xff]   ;;  %v6938_v12 = vld [vmem:[#allocation7 + $0x244] ss:$16 sps:$4 sm:$0xff]  }
  0x84   :  { %v6941_v13 = vld [vmem:[#allocation7 + $0x24c] ss:$16 sps:$4 sm:$0xff]   ;;  %v6936_v14 = vld [vmem:[#allocation7 + $0x240] ss:$16 sps:$4 sm:$0xff]   ;;  %v6939_v15 = vld [vmem:[#allocation7 + $0x248] ss:$16 sps:$4 sm:$0xff]  }
  0x85   :  { %1709 = vmatpush1.bf16.msra.mxu0 %v6867_v26  ;;  %1873 = vmatpush1.bf16.msra.mxu1 %v6868_v27  ;;  %v6944_v16 = vld [vmem:[#allocation7 + $0x264] ss:$16 sps:$4 sm:$0xff]   ;;  %v6947_v17 = vld [vmem:[#allocation7 + $0x26c] ss:$16 sps:$4 sm:$0xff]   ;;  %v6942_v18 = vld [vmem:[#allocation7 + $0x260] ss:$16 sps:$4 sm:$0xff]  }
  0x86   :  { %1710 = vmatprep.subr.bf16.mxu0 %v6869_v28  ;;  %1874 = vmatprep.subr.bf16.mxu1 %v6871_v29  ;;  %v6945_v19 = vld [vmem:[#allocation7 + $0x268] ss:$16 sps:$4 sm:$0xff]   ;;  %v6950_v20 = vld [vmem:[#allocation7 + $0x284] ss:$16 sps:$4 sm:$0xff]   ;;  %v6953_v21 = vld [vmem:[#allocation7 + $0x28c] ss:$16 sps:$4 sm:$0xff]  }
  0x87   :  { %v6948_v22 = vld [vmem:[#allocation7 + $0x280] ss:$16 sps:$4 sm:$0xff]   ;;  %v6951_v23 = vld [vmem:[#allocation7 + $0x288] ss:$16 sps:$4 sm:$0xff]   ;;  %v6956_v24 = vld [vmem:[#allocation7 + $0x2a4] ss:$16 sps:$4 sm:$0xff]  }
  0x88   :  { %v6959_v25 = vld [vmem:[#allocation7 + $0x2ac] ss:$16 sps:$4 sm:$0xff]   ;;  %v6954_v26 = vld [vmem:[#allocation7 + $0x2a0] ss:$16 sps:$4 sm:$0xff]   ;;  %v6957_v27 = vld [vmem:[#allocation7 + $0x2a8] ss:$16 sps:$4 sm:$0xff]  }
  0x89   :  { %1711 = vmatpush1.bf16.msra.mxu0 %v6873_v30  ;;  %1875 = vmatpush1.bf16.msra.mxu1 %v6874_v31  ;;  %v6962_v28 = vld [vmem:[#allocation7 + $0x2c4] ss:$16 sps:$4 sm:$0xff]   ;;  %v6965_v29 = vld [vmem:[#allocation7 + $0x2cc] ss:$16 sps:$4 sm:$0xff]   ;;  %v6981_v46 = vld [vmem:[#allocation7 + $0x328] ss:$16 sps:$4 sm:$0xff]  }
  0x8a   :  { %1712 = vmatprep.subr.bf16.mxu0 %v6875_v32  ;;  %1876 = vmatprep.subr.bf16.mxu1 %v6877_v33  ;;  %v8276_v30 = vld [vmem:[#allocation4 + $0x8] sm:$0xff]  ;;  %v6960_v32 = vld [vmem:[#allocation7 + $0x2c0] ss:$16 sps:$4 sm:$0xff]  }
  0x8b   :  { %v123_v31 = vcombine.high %v8276_v30, %v8276_v30  ;;  %v6963_v33 = vld [vmem:[#allocation7 + $0x2c8] ss:$16 sps:$4 sm:$0xff]   ;;  %v6989_v48 = vld [vmem:[#allocation7 + $0x34c] ss:$16 sps:$4 sm:$0xff]  }
  0x8c   :  { %v6995_v52 = vld [vmem:[#allocation7 + $0x36c] ss:$16 sps:$4 sm:$0xff]  }
  0x8d   :  { %1713 = vmatpush1.bf16.msra.mxu0 %v6879_v34  ;;  %1877 = vmatpush1.bf16.msra.mxu1 %v6880_v35  ;;  %v133_v34 = vpack.c.bf16 %v123_v31, %v123_v31  ;;  %v6968_v35 = vld [vmem:[#allocation7 + $0x2e4] ss:$16 sps:$4 sm:$0xff]  }
  0x8e   :  { %1714 = vmatprep.subr.bf16.mxu0 %v6881_v36  ;;  %1878 = vmatprep.subr.bf16.mxu1 %v6883_v37  ;;  %v6971_v36 = vld [vmem:[#allocation7 + $0x2ec] ss:$16 sps:$4 sm:$0xff]   ;;  %v6966_v37 = vld [vmem:[#allocation7 + $0x2e0] ss:$16 sps:$4 sm:$0xff]   ;;  %v7053_v31 = vld [vmem:[#allocation7 + $0x4a4] ss:$16 sps:$4 sm:$0xff]  }
  0x91   :  { %1715 = vmatpush1.bf16.msra.mxu0 %v6885_v38  ;;  %1879 = vmatpush1.bf16.msra.mxu1 %v6886_v39  ;;  %v6969_v38 = vld [vmem:[#allocation7 + $0x2e8] ss:$16 sps:$4 sm:$0xff]   ;;  %v6974_v39 = vld [vmem:[#allocation7 + $0x304] ss:$16 sps:$4 sm:$0xff]  }
  0x92   :  { %1716 = vmatprep.subr.bf16.mxu0 %v6887_v40  ;;  %1880 = vmatprep.subr.bf16.mxu1 %v6889_v41  ;;  %v6977_v40 = vld [vmem:[#allocation7 + $0x30c] ss:$16 sps:$4 sm:$0xff]   ;;  %v6972_v41 = vld [vmem:[#allocation7 + $0x300] ss:$16 sps:$4 sm:$0xff]  }
  0x95   :  { %1717 = vmatpush1.bf16.msra.mxu0 %v6891_v42  ;;  %1881 = vmatpush1.bf16.msra.mxu1 %v6892_v43  ;;  %v6975_v42 = vld [vmem:[#allocation7 + $0x308] ss:$16 sps:$4 sm:$0xff]   ;;  %v6980_v43 = vld [vmem:[#allocation7 + $0x324] ss:$16 sps:$4 sm:$0xff]  }
  0x96   :  { %1718 = vmatprep.subr.bf16.mxu0 %v6893_v44  ;;  %1882 = vmatprep.subr.bf16.mxu1 %v6895_v45  ;;  %v6983_v44 = vld [vmem:[#allocation7 + $0x32c] ss:$16 sps:$4 sm:$0xff]   ;;  %v6978_v45 = vld [vmem:[#allocation7 + $0x320] ss:$16 sps:$4 sm:$0xff]  }
  0x99   :  { %1719 = vmatpush1.bf16.msra.mxu0 %v6897_v47  ;;  %1883 = vmatpush1.bf16.msra.mxu1 %v6898_v49  ;;  %v6986_v47 = vld [vmem:[#allocation7 + $0x344] ss:$16 sps:$4 sm:$0xff]   ;;  %v6984_v49 = vld [vmem:[#allocation7 + $0x340] ss:$16 sps:$4 sm:$0xff]  }
  0x9a   :  { %1720 = vmatprep.subr.bf16.mxu0 %v6899_v50  ;;  %1884 = vmatprep.subr.bf16.mxu1 %v6901_v51  ;;  %v6987_v50 = vld [vmem:[#allocation7 + $0x348] ss:$16 sps:$4 sm:$0xff]   ;;  %v6992_v51 = vld [vmem:[#allocation7 + $0x364] ss:$16 sps:$4 sm:$0xff]  }
  0x9d   :  { %1721 = vmatpush1.bf16.msra.mxu0 %v6903_v53  ;;  %1885 = vmatpush1.bf16.msra.mxu1 %v6904_v54  ;;  %v6990_v53 = vld [vmem:[#allocation7 + $0x360] ss:$16 sps:$4 sm:$0xff]   ;;  %v6993_v54 = vld [vmem:[#allocation7 + $0x368] ss:$16 sps:$4 sm:$0xff]  }
  0x9e   :  { %1722 = vmatprep.subr.bf16.mxu0 %v6905_v55  ;;  %1886 = vmatprep.subr.bf16.mxu1 %v6907_v56  ;;  %v6998_v55 = vld [vmem:[#allocation7 + $0x384] ss:$16 sps:$4 sm:$0xff]   ;;  %v7001_v56 = vld [vmem:[#allocation7 + $0x38c] ss:$16 sps:$4 sm:$0xff]  }
  0xa1   :  { %1723 = vmatpush1.bf16.msra.mxu0 %v6909_v57  ;;  %1887 = vmatpush1.bf16.msra.mxu1 %v6910_v58  ;;  %v6996_v57 = vld [vmem:[#allocation7 + $0x380] ss:$16 sps:$4 sm:$0xff]   ;;  %v6999_v58 = vld [vmem:[#allocation7 + $0x388] ss:$16 sps:$4 sm:$0xff]  }
  0xa2   :  { %1724 = vmatprep.subr.bf16.mxu0 %v6911_v59  ;;  %1888 = vmatprep.subr.bf16.mxu1 %v6913_v60  ;;  %v7004_v59 = vld [vmem:[#allocation7 + $0x3a4] ss:$16 sps:$4 sm:$0xff]   ;;  %v7007_v60 = vld [vmem:[#allocation7 + $0x3ac] ss:$16 sps:$4 sm:$0xff]  }
  0xa5   :  { %1725 = vmatpush1.bf16.msra.mxu0 %v6915_v61  ;;  %1889 = vmatpush1.bf16.msra.mxu1 %v6916_v62  ;;  %v7002_v61 = vld [vmem:[#allocation7 + $0x3a0] ss:$16 sps:$4 sm:$0xff]   ;;  %v7005_v62 = vld [vmem:[#allocation7 + $0x3a8] ss:$16 sps:$4 sm:$0xff]  }
  0xa6   :  { %1726 = vmatprep.subr.bf16.mxu0 %v6917_v63  ;;  %1890 = vmatprep.subr.bf16.mxu1 %v6919_v0  ;;  %v7010_v63 = vld [vmem:[#allocation7 + $0x3c4] ss:$16 sps:$4 sm:$0xff]   ;;  %v7013_v0 = vld [vmem:[#allocation7 + $0x3cc] ss:$16 sps:$4 sm:$0xff]  }
  0xa9   :  { %1727 = vmatpush1.bf16.msra.mxu0 %v6921_v1  ;;  %1891 = vmatpush1.bf16.msra.mxu1 %v6922_v2  ;;  %v7008_v1 = vld [vmem:[#allocation7 + $0x3c0] ss:$16 sps:$4 sm:$0xff]   ;;  %v7011_v2 = vld [vmem:[#allocation7 + $0x3c8] ss:$16 sps:$4 sm:$0xff]  }
  0xaa   :  { %1737 = vmatprep.subr.bf16.mxu0 %v6926_v3  ;;  %1901 = vmatprep.subr.bf16.mxu1 %v6929_v4  ;;  %v7016_v3 = vld [vmem:[#allocation7 + $0x3e4] ss:$16 sps:$4 sm:$0xff]   ;;  %v7019_v4 = vld [vmem:[#allocation7 + $0x3ec] ss:$16 sps:$4 sm:$0xff]  }
  0xac   :  { %1729 = vmatmul.mubr.bf16.vlgmr.msra.gmra.mrb[0].mxu0 %v130_v6  ;;  %1893 = vmatmul.mubr.bf16.vlgmr.msra.gmra.mrb[0].mxu1 %v130_v6  ;;  %v7017_v6 = vld [vmem:[#allocation7 + $0x3e8] ss:$16 sps:$4 sm:$0xff]  }
  0xad   :  { %1738 = vmatpush1.bf16.msra.mxu0 %v6924_v5  ;;  %1902 = vmatpush1.bf16.msra.mxu1 %v6927_v7  ;;  %v7014_v5 = vld [vmem:[#allocation7 + $0x3e0] ss:$16 sps:$4 sm:$0xff]   ;;  %v7023_v7 = vld [vmem:[#allocation7 + $0x404] ss:$16 sps:$4 sm:$0xff]  }
  0xae   :  { %1739 = vmatprep.subr.bf16.mxu0 %v6932_v8  ;;  %1903 = vmatprep.subr.bf16.mxu1 %v6935_v9  ;;  %v7026_v8 = vld [vmem:[#allocation7 + $0x40c] ss:$16 sps:$4 sm:$0xff]   ;;  %v132_v9 = vpack.c.bf16 %v8276_v30, %v8276_v30  ;;  %v7048_v30 = vld [vmem:[#allocation7 + $0x488] ss:$16 sps:$4 sm:$0xff]  }
  0xaf   :  { %1769 = vmatprep.mubr.bf16.mxu0 %v133_v34  ;;  %1933 = vmatprep.mubr.bf16.mxu1 %v133_v34  ;;  %v7054_v34 = vld [vmem:[#allocation7 + $0x4a8] ss:$16 sps:$4 sm:$0xff]  }
  0xb1   :  { %1740 = vmatpush1.bf16.msra.mxu0 %v6930_v10  ;;  %1904 = vmatpush1.bf16.msra.mxu1 %v6933_v11  ;;  %v7021_v10 = vld [vmem:[#allocation7 + $0x400] ss:$16 sps:$4 sm:$0xff]   ;;  %v7024_v11 = vld [vmem:[#allocation7 + $0x408] ss:$16 sps:$4 sm:$0xff]  }
  0xb2   :  { %1741 = vmatprep.subr.bf16.mxu0 %v6938_v12  ;;  %1905 = vmatprep.subr.bf16.mxu1 %v6941_v13  ;;  %v7029_v12 = vld [vmem:[#allocation7 + $0x424] ss:$16 sps:$4 sm:$0xff]  }
  0xb3   :  { %v8282_v13 = vld [vmem:[#allocation4 + $0x10] sm:$0xff] }
  0xb5   :  { %1742 = vmatpush1.bf16.msra.mxu0 %v6936_v14  ;;  %1906 = vmatpush1.bf16.msra.mxu1 %v6939_v15  ;;  %v7032_v14 = vld [vmem:[#allocation7 + $0x42c] ss:$16 sps:$4 sm:$0xff]   ;;  %v124_v15 = vcombine.high %v8282_v13, %v8282_v13 }
  0xb6   :  { %1743 = vmatprep.subr.bf16.mxu0 %v6944_v16  ;;  %1907 = vmatprep.subr.bf16.mxu1 %v6947_v17  ;;  %v7027_v16 = vld [vmem:[#allocation7 + $0x420] ss:$16 sps:$4 sm:$0xff]  }
  0xb7   :  { %v135_v17 = vpack.c.bf16 %v124_v15, %v124_v15 }
  0xb9   :  { %1744 = vmatpush1.bf16.msra.mxu0 %v6942_v18  ;;  %1908 = vmatpush1.bf16.msra.mxu1 %v6945_v19  ;;  %v7030_v18 = vld [vmem:[#allocation7 + $0x428] ss:$16 sps:$4 sm:$0xff]   ;;  %v7035_v19 = vld [vmem:[#allocation7 + $0x444] ss:$16 sps:$4 sm:$0xff]  }
  0xba   :  { %1745 = vmatprep.subr.bf16.mxu0 %v6950_v20  ;;  %1909 = vmatprep.subr.bf16.mxu1 %v6953_v21  ;;  %v7038_v20 = vld [vmem:[#allocation7 + $0x44c] ss:$16 sps:$4 sm:$0xff]   ;;  %v7033_v21 = vld [vmem:[#allocation7 + $0x440] ss:$16 sps:$4 sm:$0xff]  }
  0xbd   :  { %1746 = vmatpush1.bf16.msra.mxu0 %v6948_v22  ;;  %1910 = vmatpush1.bf16.msra.mxu1 %v6951_v23  ;;  %v7036_v22 = vld [vmem:[#allocation7 + $0x448] ss:$16 sps:$4 sm:$0xff]   ;;  %v7041_v23 = vld [vmem:[#allocation7 + $0x464] ss:$16 sps:$4 sm:$0xff]  }
  0xbe   :  { %1747 = vmatprep.subr.bf16.mxu0 %v6956_v24  ;;  %1911 = vmatprep.subr.bf16.mxu1 %v6959_v25  ;;  %v7044_v24 = vld [vmem:[#allocation7 + $0x46c] ss:$16 sps:$4 sm:$0xff]   ;;  %v7039_v25 = vld [vmem:[#allocation7 + $0x460] ss:$16 sps:$4 sm:$0xff]  }
  0xc1   :  { %1748 = vmatpush1.bf16.msra.mxu0 %v6954_v26  ;;  %1912 = vmatpush1.bf16.msra.mxu1 %v6957_v27  ;;  %v7042_v26 = vld [vmem:[#allocation7 + $0x468] ss:$16 sps:$4 sm:$0xff]   ;;  %v7047_v27 = vld [vmem:[#allocation7 + $0x484] ss:$16 sps:$4 sm:$0xff]  }
  0xc2   :  { %1749 = vmatprep.subr.bf16.mxu0 %v6962_v28  ;;  %1913 = vmatprep.subr.bf16.mxu1 %v6965_v29  ;;  %v7050_v28 = vld [vmem:[#allocation7 + $0x48c] ss:$16 sps:$4 sm:$0xff]   ;;  %v7045_v29 = vld [vmem:[#allocation7 + $0x480] ss:$16 sps:$4 sm:$0xff]  }
  0xc5   :  { %1750 = vmatpush1.bf16.msra.mxu0 %v6960_v32  ;;  %1914 = vmatpush1.bf16.msra.mxu1 %v6963_v33  ;;  %v7056_v32 = vld [vmem:[#allocation7 + $0x4ac] ss:$16 sps:$4 sm:$0xff]   ;;  %v7051_v33 = vld [vmem:[#allocation7 + $0x4a0] ss:$16 sps:$4 sm:$0xff]  }
  0xc6   :  { %1751 = vmatprep.subr.bf16.mxu0 %v6968_v35  ;;  %1915 = vmatprep.subr.bf16.mxu1 %v6971_v36  ;;  %v7059_v35 = vld [vmem:[#allocation7 + $0x4c4] ss:$16 sps:$4 sm:$0xff]   ;;  %v7062_v36 = vld [vmem:[#allocation7 + $0x4cc] ss:$16 sps:$4 sm:$0xff]  }
  0xc9   :  { %1752 = vmatpush1.bf16.msra.mxu0 %v6966_v37  ;;  %1916 = vmatpush1.bf16.msra.mxu1 %v6969_v38  ;;  %v7057_v37 = vld [vmem:[#allocation7 + $0x4c0] ss:$16 sps:$4 sm:$0xff]   ;;  %v7060_v38 = vld [vmem:[#allocation7 + $0x4c8] ss:$16 sps:$4 sm:$0xff]  }
  0xca   :  { %1753 = vmatprep.subr.bf16.mxu0 %v6974_v39  ;;  %1917 = vmatprep.subr.bf16.mxu1 %v6977_v40  ;;  %v7065_v39 = vld [vmem:[#allocation7 + $0x4e4] ss:$16 sps:$4 sm:$0xff]   ;;  %v7068_v40 = vld [vmem:[#allocation7 + $0x4ec] ss:$16 sps:$4 sm:$0xff]  }
  0xcd   :  { %1754 = vmatpush1.bf16.msra.mxu0 %v6972_v41  ;;  %1918 = vmatpush1.bf16.msra.mxu1 %v6975_v42  ;;  %v7063_v41 = vld [vmem:[#allocation7 + $0x4e0] ss:$16 sps:$4 sm:$0xff]   ;;  %v7066_v42 = vld [vmem:[#allocation7 + $0x4e8] ss:$16 sps:$4 sm:$0xff]  }
  0xce   :  { %1755 = vmatprep.subr.bf16.mxu0 %v6980_v43  ;;  %1919 = vmatprep.subr.bf16.mxu1 %v6983_v44  ;;  %v7071_v43 = vld [vmem:[#allocation7 + $0x504] ss:$16 sps:$4 sm:$0xff]   ;;  %v7074_v44 = vld [vmem:[#allocation7 + $0x50c] ss:$16 sps:$4 sm:$0xff]  }
  0xd1   :  { %1756 = vmatpush1.bf16.msra.mxu0 %v6978_v45  ;;  %1920 = vmatpush1.bf16.msra.mxu1 %v6981_v46  ;;  %v7069_v45 = vld [vmem:[#allocation7 + $0x500] ss:$16 sps:$4 sm:$0xff]   ;;  %v7072_v46 = vld [vmem:[#allocation7 + $0x508] ss:$16 sps:$4 sm:$0xff]  }
  0xd2   :  { %1757 = vmatprep.subr.bf16.mxu0 %v6986_v47  ;;  %1921 = vmatprep.subr.bf16.mxu1 %v6989_v48  ;;  %v7077_v47 = vld [vmem:[#allocation7 + $0x524] ss:$16 sps:$4 sm:$0xff]   ;;  %v7080_v48 = vld [vmem:[#allocation7 + $0x52c] ss:$16 sps:$4 sm:$0xff]  }
  0xd5   :  { %1758 = vmatpush1.bf16.msra.mxu0 %v6984_v49  ;;  %1922 = vmatpush1.bf16.msra.mxu1 %v6987_v50  ;;  %v7075_v49 = vld [vmem:[#allocation7 + $0x520] ss:$16 sps:$4 sm:$0xff]   ;;  %v7078_v50 = vld [vmem:[#allocation7 + $0x528] ss:$16 sps:$4 sm:$0xff]  }
  0xd6   :  { %1759 = vmatprep.subr.bf16.mxu0 %v6992_v51  ;;  %1923 = vmatprep.subr.bf16.mxu1 %v6995_v52  ;;  %v7083_v51 = vld [vmem:[#allocation7 + $0x544] ss:$16 sps:$4 sm:$0xff]   ;;  %v7086_v52 = vld [vmem:[#allocation7 + $0x54c] ss:$16 sps:$4 sm:$0xff]  }
  0xd9   :  { %1760 = vmatpush1.bf16.msra.mxu0 %v6990_v53  ;;  %1924 = vmatpush1.bf16.msra.mxu1 %v6993_v54  ;;  %v7081_v53 = vld [vmem:[#allocation7 + $0x540] ss:$16 sps:$4 sm:$0xff]   ;;  %v7084_v54 = vld [vmem:[#allocation7 + $0x548] ss:$16 sps:$4 sm:$0xff]  }
  0xda   :  { %1761 = vmatprep.subr.bf16.mxu0 %v6998_v55  ;;  %1925 = vmatprep.subr.bf16.mxu1 %v7001_v56  ;;  %v7089_v55 = vld [vmem:[#allocation7 + $0x564] ss:$16 sps:$4 sm:$0xff]   ;;  %v7092_v56 = vld [vmem:[#allocation7 + $0x56c] ss:$16 sps:$4 sm:$0xff]  }
  0xdd   :  { %1762 = vmatpush1.bf16.msra.mxu0 %v6996_v57  ;;  %1926 = vmatpush1.bf16.msra.mxu1 %v6999_v58  ;;  %v7087_v57 = vld [vmem:[#allocation7 + $0x560] ss:$16 sps:$4 sm:$0xff]   ;;  %v7090_v58 = vld [vmem:[#allocation7 + $0x568] ss:$16 sps:$4 sm:$0xff]  }
  0xde   :  { %1763 = vmatprep.subr.bf16.mxu0 %v7004_v59  ;;  %1927 = vmatprep.subr.bf16.mxu1 %v7007_v60  ;;  %v7095_v59 = vld [vmem:[#allocation7 + $0x584] ss:$16 sps:$4 sm:$0xff]   ;;  %v7098_v60 = vld [vmem:[#allocation7 + $0x58c] ss:$16 sps:$4 sm:$0xff]  }
  0xe1   :  { %1764 = vmatpush1.bf16.msra.mxu0 %v7002_v61  ;;  %1928 = vmatpush1.bf16.msra.mxu1 %v7005_v62  ;;  %v7093_v61 = vld [vmem:[#allocation7 + $0x580] ss:$16 sps:$4 sm:$0xff]   ;;  %v7096_v62 = vld [vmem:[#allocation7 + $0x588] ss:$16 sps:$4 sm:$0xff]  }
  0xe2   :  { %1765 = vmatprep.subr.bf16.mxu0 %v7010_v63  ;;  %1929 = vmatprep.subr.bf16.mxu1 %v7013_v0  ;;  %v7101_v63 = vld [vmem:[#allocation7 + $0x5a4] ss:$16 sps:$4 sm:$0xff]   ;;  %v7104_v0 = vld [vmem:[#allocation7 + $0x5ac] ss:$16 sps:$4 sm:$0xff]  }
  0xe5   :  { %1766 = vmatpush1.bf16.msra.mxu0 %v7008_v1  ;;  %1930 = vmatpush1.bf16.msra.mxu1 %v7011_v2  ;;  %v7099_v1 = vld [vmem:[#allocation7 + $0x5a0] ss:$16 sps:$4 sm:$0xff]   ;;  %v7102_v2 = vld [vmem:[#allocation7 + $0x5a8] ss:$16 sps:$4 sm:$0xff]  }
  0xe6   :  { %1767 = vmatprep.subr.bf16.mxu0 %v7016_v3  ;;  %1931 = vmatprep.subr.bf16.mxu1 %v7019_v4  ;;  %v7107_v3 = vld [vmem:[#allocation7 + $0x5c4] ss:$16 sps:$4 sm:$0xff]   ;;  %v7110_v4 = vld [vmem:[#allocation7 + $0x5cc] ss:$16 sps:$4 sm:$0xff]  }
  0xe9   :  { %1768 = vmatpush1.bf16.msra.mxu0 %v7014_v5  ;;  %1932 = vmatpush1.bf16.msra.mxu1 %v7017_v6  ;;  %v7105_v5 = vld [vmem:[#allocation7 + $0x5c0] ss:$16 sps:$4 sm:$0xff]   ;;  %v7108_v6 = vld [vmem:[#allocation7 + $0x5c8] ss:$16 sps:$4 sm:$0xff]  }
  0xea   :  { %1778 = vmatprep.subr.bf16.mxu0 %v7023_v7  ;;  %1942 = vmatprep.subr.bf16.mxu1 %v7026_v8  ;;  %v7113_v7 = vld [vmem:[#allocation7 + $0x5e4] ss:$16 sps:$4 sm:$0xff]   ;;  %v7116_v8 = vld [vmem:[#allocation7 + $0x5ec] ss:$16 sps:$4 sm:$0xff]  }
  0xec   :  { %1770 = vmatmul.mubr.bf16.vlgmr.msra.gmra.mrb[0].mxu0 %v132_v9  ;;  %1934 = vmatmul.mubr.bf16.vlgmr.msra.gmra.mrb[0].mxu1 %v132_v9  ;;  %v7111_v9 = vld [vmem:[#allocation7 + $0x5e0] ss:$16 sps:$4 sm:$0xff]  }
  0xed   :  { %1779 = vmatpush1.bf16.msra.mxu0 %v7021_v10  ;;  %1943 = vmatpush1.bf16.msra.mxu1 %v7024_v11  ;;  %v7114_v10 = vld [vmem:[#allocation7 + $0x5e8] ss:$16 sps:$4 sm:$0xff]  }
  0xee   :  { %1780 = vmatprep.subr.bf16.mxu0 %v7029_v12  ;;  %1944 = vmatprep.subr.bf16.mxu1 %v7032_v14  ;;  %v8286_v11 = vld [vmem:[#allocation4 + $0x18] sm:$0xff]  ;;  %v7120_v12 = vld [vmem:[#allocation7 + $0x604] ss:$16 sps:$4 sm:$0xff]  }
  0xef   :  { %1810 = vmatprep.mubr.bf16.mxu0 %v135_v17  ;;  %1974 = vmatprep.mubr.bf16.mxu1 %v135_v17  ;;  %v7123_v14 = vld [vmem:[#allocation7 + $0x60c] ss:$16 sps:$4 sm:$0xff]   ;;  %v125_v15 = vcombine.high %v8286_v11, %v8286_v11  ;;  %v7118_v17 = vld [vmem:[#allocation7 + $0x600] ss:$16 sps:$4 sm:$0xff]  }
  0xf1   :  { %1781 = vmatpush1.bf16.msra.mxu0 %v7027_v16  ;;  %1945 = vmatpush1.bf16.msra.mxu1 %v7030_v18  ;;  %v134_v16 = vpack.c.bf16 %v8282_v13, %v8282_v13  ;;  %v7121_v18 = vld [vmem:[#allocation7 + $0x608] ss:$16 sps:$4 sm:$0xff]   ;;  %v7130_v13 = vld [vmem:[#allocation7 + $0x640] ss:$16 sps:$4 sm:$0xff]  }
  0xf2   :  { %1782 = vmatprep.subr.bf16.mxu0 %v7035_v19  ;;  %1946 = vmatprep.subr.bf16.mxu1 %v7038_v20  ;;  %v7126_v19 = vld [vmem:[#allocation7 + $0x624] ss:$16 sps:$4 sm:$0xff]   ;;  %v7129_v20 = vld [vmem:[#allocation7 + $0x62c] ss:$16 sps:$4 sm:$0xff]  }
  0xf5   :  { %1783 = vmatpush1.bf16.msra.mxu0 %v7033_v21  ;;  %1947 = vmatpush1.bf16.msra.mxu1 %v7036_v22  ;;  %v137_v21 = vpack.c.bf16 %v125_v15, %v125_v15  ;;  %v7124_v22 = vld [vmem:[#allocation7 + $0x620] ss:$16 sps:$4 sm:$0xff]  }
  0xf6   :  { %1784 = vmatprep.subr.bf16.mxu0 %v7041_v23  ;;  %1948 = vmatprep.subr.bf16.mxu1 %v7044_v24  ;;  %v7127_v23 = vld [vmem:[#allocation7 + $0x628] ss:$16 sps:$4 sm:$0xff]   ;;  %v7132_v24 = vld [vmem:[#allocation7 + $0x644] ss:$16 sps:$4 sm:$0xff]   ;;  %v7208_v15 = vld [vmem:[#allocation7 + $0x7e0] ss:$16 sps:$4 sm:$0xff]  }
  0xf9   :  { %1785 = vmatpush1.bf16.msra.mxu0 %v7039_v25  ;;  %1949 = vmatpush1.bf16.msra.mxu1 %v7042_v26  ;;  %v7135_v25 = vld [vmem:[#allocation7 + $0x64c] ss:$16 sps:$4 sm:$0xff]   ;;  %v7133_v26 = vld [vmem:[#allocation7 + $0x648] ss:$16 sps:$4 sm:$0xff]  }
  0xfa   :  { %1786 = vmatprep.subr.bf16.mxu0 %v7047_v27  ;;  %1950 = vmatprep.subr.bf16.mxu1 %v7050_v28  ;;  %v7138_v27 = vld [vmem:[#allocation7 + $0x664] ss:$16 sps:$4 sm:$0xff]   ;;  %v7141_v28 = vld [vmem:[#allocation7 + $0x66c] ss:$16 sps:$4 sm:$0xff]  }
  0xfd   :  { %1787 = vmatpush1.bf16.msra.mxu0 %v7045_v29  ;;  %1951 = vmatpush1.bf16.msra.mxu1 %v7048_v30  ;;  %v7136_v29 = vld [vmem:[#allocation7 + $0x660] ss:$16 sps:$4 sm:$0xff]   ;;  %v7139_v30 = vld [vmem:[#allocation7 + $0x668] ss:$16 sps:$4 sm:$0xff]  }
  0xfe   :  { %1788 = vmatprep.subr.bf16.mxu0 %v7053_v31  ;;  %1952 = vmatprep.subr.bf16.mxu1 %v7056_v32  ;;  %v7144_v31 = vld [vmem:[#allocation7 + $0x684] ss:$16 sps:$4 sm:$0xff]   ;;  %v7147_v32 = vld [vmem:[#allocation7 + $0x68c] ss:$16 sps:$4 sm:$0xff]  }
 0x101   :  { %1789 = vmatpush1.bf16.msra.mxu0 %v7051_v33  ;;  %1953 = vmatpush1.bf16.msra.mxu1 %v7054_v34  ;;  %v7142_v33 = vld [vmem:[#allocation7 + $0x680] ss:$16 sps:$4 sm:$0xff]   ;;  %v7145_v34 = vld [vmem:[#allocation7 + $0x688] ss:$16 sps:$4 sm:$0xff]  }
 0x102   :  { %1790 = vmatprep.subr.bf16.mxu0 %v7059_v35  ;;  %1954 = vmatprep.subr.bf16.mxu1 %v7062_v36  ;;  %v7150_v35 = vld [vmem:[#allocation7 + $0x6a4] ss:$16 sps:$4 sm:$0xff]   ;;  %v7153_v36 = vld [vmem:[#allocation7 + $0x6ac] ss:$16 sps:$4 sm:$0xff]  }
 0x105   :  { %1791 = vmatpush1.bf16.msra.mxu0 %v7057_v37  ;;  %1955 = vmatpush1.bf16.msra.mxu1 %v7060_v38  ;;  %v7148_v37 = vld [vmem:[#allocation7 + $0x6a0] ss:$16 sps:$4 sm:$0xff]   ;;  %v7151_v38 = vld [vmem:[#allocation7 + $0x6a8] ss:$16 sps:$4 sm:$0xff]  }
 0x106   :  { %1792 = vmatprep.subr.bf16.mxu0 %v7065_v39  ;;  %1956 = vmatprep.subr.bf16.mxu1 %v7068_v40  ;;  %v7156_v39 = vld [vmem:[#allocation7 + $0x6c4] ss:$16 sps:$4 sm:$0xff]   ;;  %v7159_v40 = vld [vmem:[#allocation7 + $0x6cc] ss:$16 sps:$4 sm:$0xff]  }
 0x109   :  { %1793 = vmatpush1.bf16.msra.mxu0 %v7063_v41  ;;  %1957 = vmatpush1.bf16.msra.mxu1 %v7066_v42  ;;  %v7154_v41 = vld [vmem:[#allocation7 + $0x6c0] ss:$16 sps:$4 sm:$0xff]   ;;  %v7157_v42 = vld [vmem:[#allocation7 + $0x6c8] ss:$16 sps:$4 sm:$0xff]  }
 0x10a   :  { %1794 = vmatprep.subr.bf16.mxu0 %v7071_v43  ;;  %1958 = vmatprep.subr.bf16.mxu1 %v7074_v44  ;;  %v7162_v43 = vld [vmem:[#allocation7 + $0x6e4] ss:$16 sps:$4 sm:$0xff]   ;;  %v7165_v44 = vld [vmem:[#allocation7 + $0x6ec] ss:$16 sps:$4 sm:$0xff]  }
 0x10d   :  { %1795 = vmatpush1.bf16.msra.mxu0 %v7069_v45  ;;  %1959 = vmatpush1.bf16.msra.mxu1 %v7072_v46  ;;  %v7160_v45 = vld [vmem:[#allocation7 + $0x6e0] ss:$16 sps:$4 sm:$0xff]   ;;  %v7163_v46 = vld [vmem:[#allocation7 + $0x6e8] ss:$16 sps:$4 sm:$0xff]  }
 0x10e   :  { %1796 = vmatprep.subr.bf16.mxu0 %v7077_v47  ;;  %1960 = vmatprep.subr.bf16.mxu1 %v7080_v48  ;;  %v7168_v47 = vld [vmem:[#allocation7 + $0x704] ss:$16 sps:$4 sm:$0xff]   ;;  %v7171_v48 = vld [vmem:[#allocation7 + $0x70c] ss:$16 sps:$4 sm:$0xff]  }
 0x111   :  { %1797 = vmatpush1.bf16.msra.mxu0 %v7075_v49  ;;  %1961 = vmatpush1.bf16.msra.mxu1 %v7078_v50  ;;  %v7166_v49 = vld [vmem:[#allocation7 + $0x700] ss:$16 sps:$4 sm:$0xff]   ;;  %v7169_v50 = vld [vmem:[#allocation7 + $0x708] ss:$16 sps:$4 sm:$0xff]  }
 0x112   :  { %1798 = vmatprep.subr.bf16.mxu0 %v7083_v51  ;;  %1962 = vmatprep.subr.bf16.mxu1 %v7086_v52  ;;  %v7174_v51 = vld [vmem:[#allocation7 + $0x724] ss:$16 sps:$4 sm:$0xff]   ;;  %v7177_v52 = vld [vmem:[#allocation7 + $0x72c] ss:$16 sps:$4 sm:$0xff]  }
 0x115   :  { %1799 = vmatpush1.bf16.msra.mxu0 %v7081_v53  ;;  %1963 = vmatpush1.bf16.msra.mxu1 %v7084_v54  ;;  %v7172_v53 = vld [vmem:[#allocation7 + $0x720] ss:$16 sps:$4 sm:$0xff]   ;;  %v7175_v54 = vld [vmem:[#allocation7 + $0x728] ss:$16 sps:$4 sm:$0xff]  }
 0x116   :  { %1800 = vmatprep.subr.bf16.mxu0 %v7089_v55  ;;  %1964 = vmatprep.subr.bf16.mxu1 %v7092_v56  ;;  %v7180_v55 = vld [vmem:[#allocation7 + $0x744] ss:$16 sps:$4 sm:$0xff]   ;;  %v7183_v56 = vld [vmem:[#allocation7 + $0x74c] ss:$16 sps:$4 sm:$0xff]  }
 0x119   :  { %1801 = vmatpush1.bf16.msra.mxu0 %v7087_v57  ;;  %1965 = vmatpush1.bf16.msra.mxu1 %v7090_v58  ;;  %v7178_v57 = vld [vmem:[#allocation7 + $0x740] ss:$16 sps:$4 sm:$0xff]   ;;  %v7181_v58 = vld [vmem:[#allocation7 + $0x748] ss:$16 sps:$4 sm:$0xff]  }
 0x11a   :  { %1802 = vmatprep.subr.bf16.mxu0 %v7095_v59  ;;  %1966 = vmatprep.subr.bf16.mxu1 %v7098_v60  ;;  %v7186_v59 = vld [vmem:[#allocation7 + $0x764] ss:$16 sps:$4 sm:$0xff]   ;;  %v7189_v60 = vld [vmem:[#allocation7 + $0x76c] ss:$16 sps:$4 sm:$0xff]  }
 0x11d   :  { %1803 = vmatpush1.bf16.msra.mxu0 %v7093_v61  ;;  %1967 = vmatpush1.bf16.msra.mxu1 %v7096_v62  ;;  %v7184_v61 = vld [vmem:[#allocation7 + $0x760] ss:$16 sps:$4 sm:$0xff]   ;;  %v7187_v62 = vld [vmem:[#allocation7 + $0x768] ss:$16 sps:$4 sm:$0xff]  }
 0x11e   :  { %1804 = vmatprep.subr.bf16.mxu0 %v7101_v63  ;;  %1968 = vmatprep.subr.bf16.mxu1 %v7104_v0  ;;  %v7192_v63 = vld [vmem:[#allocation7 + $0x784] ss:$16 sps:$4 sm:$0xff]   ;;  %v7195_v0 = vld [vmem:[#allocation7 + $0x78c] ss:$16 sps:$4 sm:$0xff]  }
 0x121   :  { %1805 = vmatpush1.bf16.msra.mxu0 %v7099_v1  ;;  %1969 = vmatpush1.bf16.msra.mxu1 %v7102_v2  ;;  %v7190_v1 = vld [vmem:[#allocation7 + $0x780] ss:$16 sps:$4 sm:$0xff]   ;;  %v7193_v2 = vld [vmem:[#allocation7 + $0x788] ss:$16 sps:$4 sm:$0xff]  }
 0x122   :  { %1806 = vmatprep.subr.bf16.mxu0 %v7107_v3  ;;  %1970 = vmatprep.subr.bf16.mxu1 %v7110_v4  ;;  %v7198_v3 = vld [vmem:[#allocation7 + $0x7a4] ss:$16 sps:$4 sm:$0xff]   ;;  %v7201_v4 = vld [vmem:[#allocation7 + $0x7ac] ss:$16 sps:$4 sm:$0xff]  }
 0x125   :  { %1807 = vmatpush1.bf16.msra.mxu0 %v7105_v5  ;;  %1971 = vmatpush1.bf16.msra.mxu1 %v7108_v6  ;;  %v7196_v5 = vld [vmem:[#allocation7 + $0x7a0] ss:$16 sps:$4 sm:$0xff]   ;;  %v7199_v6 = vld [vmem:[#allocation7 + $0x7a8] ss:$16 sps:$4 sm:$0xff]  }
 0x126   :  { %1808 = vmatprep.subr.bf16.mxu0 %v7113_v7  ;;  %1972 = vmatprep.subr.bf16.mxu1 %v7116_v8  ;;  %v7204_v7 = vld [vmem:[#allocation7 + $0x7c4] ss:$16 sps:$4 sm:$0xff]   ;;  %v7207_v8 = vld [vmem:[#allocation7 + $0x7cc] ss:$16 sps:$4 sm:$0xff]  }
 0x129   :  { %1809 = vmatpush1.bf16.msra.mxu0 %v7111_v9  ;;  %1973 = vmatpush1.bf16.msra.mxu1 %v7114_v10  ;;  %v7202_v9 = vld [vmem:[#allocation7 + $0x7c0] ss:$16 sps:$4 sm:$0xff]   ;;  %v7205_v10 = vld [vmem:[#allocation7 + $0x7c8] ss:$16 sps:$4 sm:$0xff]  }
 0x12a   :  { %1819 = vmatprep.subr.bf16.mxu0 %v7120_v12  ;;  %1983 = vmatprep.subr.bf16.mxu1 %v7123_v14  ;;  %v7210_v12 = vld [vmem:[#allocation7 + $0x7e4] ss:$16 sps:$4 sm:$0xff]   ;;  %v7213_v14 = vld [vmem:[#allocation7 + $0x7ec] ss:$16 sps:$4 sm:$0xff]  }
 0x12c   :  { %1811 = vmatmul.mubr.bf16.vlgmr.msra.gmra.mrb[0].mxu0 %v134_v16  ;;  %1975 = vmatmul.mubr.bf16.vlgmr.msra.gmra.mrb[0].mxu1 %v134_v16  ;;  %v8292_v16 = vld [vmem:[#allocation2] sm:$0xff] }
 0x12d   :  { %1820 = vmatpush1.bf16.msra.mxu0 %v7118_v17  ;;  %1984 = vmatpush1.bf16.msra.mxu1 %v7121_v18  ;;  %v7211_v17 = vld [vmem:[#allocation7 + $0x7e8] ss:$16 sps:$4 sm:$0xff]   ;;  %v7217_v18 = vld [vmem:[#allocation6 + $0x4] ss:$16 sps:$4 sm:$0xff]  }
 0x12e   :  { %1821 = vmatprep.subr.bf16.mxu0 %v7126_v19  ;;  %1985 = vmatprep.subr.bf16.mxu1 %v7129_v20  ;;  %v7220_v19 = vld [vmem:[#allocation6 + $0xc] ss:$16 sps:$4 sm:$0xff]   ;;  %v2044_v20 = vcombine.high %v8292_v16, %v8292_v16 }
 0x12f   :  { %1851 = vmatprep.mubr.bf16.mxu0 %v137_v21  ;;  %2015 = vmatprep.mubr.bf16.mxu1 %v137_v21  ;;  %v136_v21 = vpack.c.bf16 %v8286_v11, %v8286_v11  ;;  %v7227_v11 = vld [vmem:[#allocation6 + $0x40] ss:$16 sps:$4 sm:$0xff]  }
 0x131   :  { %1822 = vmatpush1.bf16.msra.mxu0 %v7124_v22  ;;  %1986 = vmatpush1.bf16.msra.mxu1 %v7127_v23  ;;  %v7215_v22 = vld [vmem:[#allocation6] ss:$16 sps:$4 sm:$0xff]   ;;  %v7218_v23 = vld [vmem:[#allocation6 + $0x8] ss:$16 sps:$4 sm:$0xff]  }
 0x132   :  { %1823 = vmatprep.subr.bf16.mxu0 %v7132_v24  ;;  %1987 = vmatprep.subr.bf16.mxu1 %v7135_v25  ;;  %v7223_v24 = vld [vmem:[#allocation6 + $0x24] ss:$16 sps:$4 sm:$0xff]   ;;  %v7226_v25 = vld [vmem:[#allocation6 + $0x2c] ss:$16 sps:$4 sm:$0xff]  }
 0x135   :  { %1824 = vmatpush1.bf16.msra.mxu0 %v7130_v13  ;;  %1988 = vmatpush1.bf16.msra.mxu1 %v7133_v26  ;;  %v2053_v13 = vpack.c.bf16 %v2044_v20, %v2044_v20  ;;  %v7221_v26 = vld [vmem:[#allocation6 + $0x20] ss:$16 sps:$4 sm:$0xff]   ;;  %v8298_v20 = vld [vmem:[#allocation2 + $0x8] sm:$0xff] }
 0x136   :  { %1825 = vmatprep.subr.bf16.mxu0 %v7138_v27  ;;  %1989 = vmatprep.subr.bf16.mxu1 %v7141_v28  ;;  %v7224_v27 = vld [vmem:[#allocation6 + $0x28] ss:$16 sps:$4 sm:$0xff]   ;;  %v7229_v28 = vld [vmem:[#allocation6 + $0x44] ss:$16 sps:$4 sm:$0xff]  }
 0x139   :  { %1826 = vmatpush1.bf16.msra.mxu0 %v7136_v29  ;;  %1990 = vmatpush1.bf16.msra.mxu1 %v7139_v30  ;;  %v7232_v29 = vld [vmem:[#allocation6 + $0x4c] ss:$16 sps:$4 sm:$0xff]   ;;  %v7230_v30 = vld [vmem:[#allocation6 + $0x48] ss:$16 sps:$4 sm:$0xff]  }
 0x13a   :  { %1827 = vmatprep.subr.bf16.mxu0 %v7144_v31  ;;  %1991 = vmatprep.subr.bf16.mxu1 %v7147_v32  ;;  %v7235_v31 = vld [vmem:[#allocation6 + $0x64] ss:$16 sps:$4 sm:$0xff]   ;;  %v7238_v32 = vld [vmem:[#allocation6 + $0x6c] ss:$16 sps:$4 sm:$0xff]  }
 0x13d   :  { %1828 = vmatpush1.bf16.msra.mxu0 %v7142_v33  ;;  %1992 = vmatpush1.bf16.msra.mxu1 %v7145_v34  ;;  %v7233_v33 = vld [vmem:[#allocation6 + $0x60] ss:$16 sps:$4 sm:$0xff]   ;;  %v7236_v34 = vld [vmem:[#allocation6 + $0x68] ss:$16 sps:$4 sm:$0xff]  }
 0x13e   :  { %1829 = vmatprep.subr.bf16.mxu0 %v7150_v35  ;;  %1993 = vmatprep.subr.bf16.mxu1 %v7153_v36  ;;  %v7241_v35 = vld [vmem:[#allocation6 + $0x84] ss:$16 sps:$4 sm:$0xff]   ;;  %v7244_v36 = vld [vmem:[#allocation6 + $0x8c] ss:$16 sps:$4 sm:$0xff]  }
 0x141   :  { %1830 = vmatpush1.bf16.msra.mxu0 %v7148_v37  ;;  %1994 = vmatpush1.bf16.msra.mxu1 %v7151_v38  ;;  %v7239_v37 = vld [vmem:[#allocation6 + $0x80] ss:$16 sps:$4 sm:$0xff]   ;;  %v7242_v38 = vld [vmem:[#allocation6 + $0x88] ss:$16 sps:$4 sm:$0xff]  }
 0x142   :  { %1831 = vmatprep.subr.bf16.mxu0 %v7156_v39  ;;  %1995 = vmatprep.subr.bf16.mxu1 %v7159_v40  ;;  %v7247_v39 = vld [vmem:[#allocation6 + $0xa4] ss:$16 sps:$4 sm:$0xff]   ;;  %v7250_v40 = vld [vmem:[#allocation6 + $0xac] ss:$16 sps:$4 sm:$0xff]  }
 0x145   :  { %1832 = vmatpush1.bf16.msra.mxu0 %v7154_v41  ;;  %1996 = vmatpush1.bf16.msra.mxu1 %v7157_v42  ;;  %v7245_v41 = vld [vmem:[#allocation6 + $0xa0] ss:$16 sps:$4 sm:$0xff]   ;;  %v7248_v42 = vld [vmem:[#allocation6 + $0xa8] ss:$16 sps:$4 sm:$0xff]  }
 0x146   :  { %1833 = vmatprep.subr.bf16.mxu0 %v7162_v43  ;;  %1997 = vmatprep.subr.bf16.mxu1 %v7165_v44  ;;  %v7253_v43 = vld [vmem:[#allocation6 + $0xc4] ss:$16 sps:$4 sm:$0xff]   ;;  %v7256_v44 = vld [vmem:[#allocation6 + $0xcc] ss:$16 sps:$4 sm:$0xff]  }
 0x149   :  { %1834 = vmatpush1.bf16.msra.mxu0 %v7160_v45  ;;  %1998 = vmatpush1.bf16.msra.mxu1 %v7163_v46  ;;  %v7251_v45 = vld [vmem:[#allocation6 + $0xc0] ss:$16 sps:$4 sm:$0xff]   ;;  %v7254_v46 = vld [vmem:[#allocation6 + $0xc8] ss:$16 sps:$4 sm:$0xff]  }
 0x14a   :  { %1835 = vmatprep.subr.bf16.mxu0 %v7168_v47  ;;  %1999 = vmatprep.subr.bf16.mxu1 %v7171_v48  ;;  %v7259_v47 = vld [vmem:[#allocation6 + $0xe4] ss:$16 sps:$4 sm:$0xff]   ;;  %v7262_v48 = vld [vmem:[#allocation6 + $0xec] ss:$16 sps:$4 sm:$0xff]  }
 0x14d   :  { %1836 = vmatpush1.bf16.msra.mxu0 %v7166_v49  ;;  %2000 = vmatpush1.bf16.msra.mxu1 %v7169_v50  ;;  %v7257_v49 = vld [vmem:[#allocation6 + $0xe0] ss:$16 sps:$4 sm:$0xff]   ;;  %v7260_v50 = vld [vmem:[#allocation6 + $0xe8] ss:$16 sps:$4 sm:$0xff]  }
 0x14e   :  { %1837 = vmatprep.subr.bf16.mxu0 %v7174_v51  ;;  %2001 = vmatprep.subr.bf16.mxu1 %v7177_v52  ;;  %v7265_v51 = vld [vmem:[#allocation6 + $0x104] ss:$16 sps:$4 sm:$0xff]   ;;  %v7268_v52 = vld [vmem:[#allocation6 + $0x10c] ss:$16 sps:$4 sm:$0xff]  }
 0x151   :  { %1838 = vmatpush1.bf16.msra.mxu0 %v7172_v53  ;;  %2002 = vmatpush1.bf16.msra.mxu1 %v7175_v54  ;;  %v7263_v53 = vld [vmem:[#allocation6 + $0x100] ss:$16 sps:$4 sm:$0xff]   ;;  %v7266_v54 = vld [vmem:[#allocation6 + $0x108] ss:$16 sps:$4 sm:$0xff]  }
 0x152   :  { %1839 = vmatprep.subr.bf16.mxu0 %v7180_v55  ;;  %2003 = vmatprep.subr.bf16.mxu1 %v7183_v56  ;;  %v7271_v55 = vld [vmem:[#allocation6 + $0x124] ss:$16 sps:$4 sm:$0xff]   ;;  %v7274_v56 = vld [vmem:[#allocation6 + $0x12c] ss:$16 sps:$4 sm:$0xff]  }
 0x155   :  { %1840 = vmatpush1.bf16.msra.mxu0 %v7178_v57  ;;  %2004 = vmatpush1.bf16.msra.mxu1 %v7181_v58  ;;  %v7269_v57 = vld [vmem:[#allocation6 + $0x120] ss:$16 sps:$4 sm:$0xff]   ;;  %v7272_v58 = vld [vmem:[#allocation6 + $0x128] ss:$16 sps:$4 sm:$0xff]  }
 0x156   :  { %1841 = vmatprep.subr.bf16.mxu0 %v7186_v59  ;;  %2005 = vmatprep.subr.bf16.mxu1 %v7189_v60  ;;  %v7277_v59 = vld [vmem:[#allocation6 + $0x144] ss:$16 sps:$4 sm:$0xff]   ;;  %v7280_v60 = vld [vmem:[#allocation6 + $0x14c] ss:$16 sps:$4 sm:$0xff]  }
 0x159   :  { %1842 = vmatpush1.bf16.msra.mxu0 %v7184_v61  ;;  %2006 = vmatpush1.bf16.msra.mxu1 %v7187_v62  ;;  %v7275_v61 = vld [vmem:[#allocation6 + $0x140] ss:$16 sps:$4 sm:$0xff]   ;;  %v7278_v62 = vld [vmem:[#allocation6 + $0x148] ss:$16 sps:$4 sm:$0xff]  }
 0x15a   :  { %1843 = vmatprep.subr.bf16.mxu0 %v7192_v63  ;;  %2007 = vmatprep.subr.bf16.mxu1 %v7195_v0  ;;  %v7283_v63 = vld [vmem:[#allocation6 + $0x164] ss:$16 sps:$4 sm:$0xff]   ;;  %v7286_v0 = vld [vmem:[#allocation6 + $0x16c] ss:$16 sps:$4 sm:$0xff]  }
 0x15d   :  { %1844 = vmatpush1.bf16.msra.mxu0 %v7190_v1  ;;  %2008 = vmatpush1.bf16.msra.mxu1 %v7193_v2  ;;  %v7281_v1 = vld [vmem:[#allocation6 + $0x160] ss:$16 sps:$4 sm:$0xff]   ;;  %v7284_v2 = vld [vmem:[#allocation6 + $0x168] ss:$16 sps:$4 sm:$0xff]  }
 0x15e   :  { %1845 = vmatprep.subr.bf16.mxu0 %v7198_v3  ;;  %2009 = vmatprep.subr.bf16.mxu1 %v7201_v4  ;;  %v7289_v3 = vld [vmem:[#allocation6 + $0x184] ss:$16 sps:$4 sm:$0xff]   ;;  %v7292_v4 = vld [vmem:[#allocation6 + $0x18c] ss:$16 sps:$4 sm:$0xff]  }
 0x161   :  { %1846 = vmatpush1.bf16.msra.mxu0 %v7196_v5  ;;  %2010 = vmatpush1.bf16.msra.mxu1 %v7199_v6  ;;  %v7287_v5 = vld [vmem:[#allocation6 + $0x180] ss:$16 sps:$4 sm:$0xff]   ;;  %v7290_v6 = vld [vmem:[#allocation6 + $0x188] ss:$16 sps:$4 sm:$0xff]  }
 0x162   :  { %1847 = vmatprep.subr.bf16.mxu0 %v7204_v7  ;;  %2011 = vmatprep.subr.bf16.mxu1 %v7207_v8  ;;  %v7295_v7 = vld [vmem:[#allocation6 + $0x1a4] ss:$16 sps:$4 sm:$0xff]   ;;  %v7298_v8 = vld [vmem:[#allocation6 + $0x1ac] ss:$16 sps:$4 sm:$0xff]  }
 0x165   :  { %1848 = vmatpush1.bf16.msra.mxu0 %v7202_v9  ;;  %2012 = vmatpush1.bf16.msra.mxu1 %v7205_v10  ;;  %v7293_v9 = vld [vmem:[#allocation6 + $0x1a0] ss:$16 sps:$4 sm:$0xff]   ;;  %v7296_v10 = vld [vmem:[#allocation6 + $0x1a8] ss:$16 sps:$4 sm:$0xff]  }
 0x166   :  { %1849 = vmatprep.subr.bf16.mxu0 %v7210_v12  ;;  %2013 = vmatprep.subr.bf16.mxu1 %v7213_v14  ;;  %v7301_v12 = vld [vmem:[#allocation6 + $0x1c4] ss:$16 sps:$4 sm:$0xff]   ;;  %v7304_v14 = vld [vmem:[#allocation6 + $0x1cc] ss:$16 sps:$4 sm:$0xff]  }
 0x169   :  { %1850 = vmatpush1.bf16.msra.mxu0 %v7208_v15  ;;  %2014 = vmatpush1.bf16.msra.mxu1 %v7211_v17  ;;  %v7299_v15 = vld [vmem:[#allocation6 + $0x1c0] ss:$16 sps:$4 sm:$0xff]   ;;  %v7302_v17 = vld [vmem:[#allocation6 + $0x1c8] ss:$16 sps:$4 sm:$0xff]  }
 0x16a   :  { %3618 = vmatprep.subr.bf16.mxu0 %v7217_v18  ;;  %3782 = vmatprep.subr.bf16.mxu1 %v7220_v19  ;;  %v7307_v18 = vld [vmem:[#allocation6 + $0x1e4] ss:$16 sps:$4 sm:$0xff]   ;;  %v7310_v19 = vld [vmem:[#allocation6 + $0x1ec] ss:$16 sps:$4 sm:$0xff]  }
 0x16c   :  { %1852 = vmatmul.mubr.bf16.vlgmr.msra.gmra.mrb[0].mxu0 %v136_v21  ;;  %2016 = vmatmul.mubr.bf16.vlgmr.msra.gmra.mrb[0].mxu1 %v136_v21  ;;  %v7305_v21 = vld [vmem:[#allocation6 + $0x1e0] ss:$16 sps:$4 sm:$0xff]  }
 0x16d   :  { %3619 = vmatpush1.bf16.msra.mxu0 %v7215_v22  ;;  %3783 = vmatpush1.bf16.msra.mxu1 %v7218_v23  ;;  %v7308_v22 = vld [vmem:[#allocation6 + $0x1e8] ss:$16 sps:$4 sm:$0xff]   ;;  %v7314_v23 = vld [vmem:[#allocation6 + $0x204] ss:$16 sps:$4 sm:$0xff]  }
 0x16e   :  { %3620 = vmatprep.subr.bf16.mxu0 %v7223_v24  ;;  %3784 = vmatprep.subr.bf16.mxu1 %v7226_v25  ;;  %v7317_v24 = vld [vmem:[#allocation6 + $0x20c] ss:$16 sps:$4 sm:$0xff]   ;;  %v2045_v25 = vcombine.high %v8298_v20, %v8298_v20 }
 0x16f   :  { %3650 = vmatprep.mubr.bf16.mxu0 %v2053_v13  ;;  %3814 = vmatprep.mubr.bf16.mxu1 %v2053_v13  ;;  %v2052_v13 = vpack.c.bf16 %v8292_v16, %v8292_v16  ;;  %v7324_v16 = vld [vmem:[#allocation6 + $0x240] ss:$16 sps:$4 sm:$0xff]  }
 0x171   :  { %3621 = vmatpush1.bf16.msra.mxu0 %v7221_v26  ;;  %3785 = vmatpush1.bf16.msra.mxu1 %v7224_v27  ;;  %v7312_v26 = vld [vmem:[#allocation6 + $0x200] ss:$16 sps:$4 sm:$0xff]   ;;  %v7315_v27 = vld [vmem:[#allocation6 + $0x208] ss:$16 sps:$4 sm:$0xff]  }
 0x172   :  { %3622 = vmatprep.subr.bf16.mxu0 %v7229_v28  ;;  %3786 = vmatprep.subr.bf16.mxu1 %v7232_v29  ;;  %v7320_v28 = vld [vmem:[#allocation6 + $0x224] ss:$16 sps:$4 sm:$0xff]   ;;  %v7323_v29 = vld [vmem:[#allocation6 + $0x22c] ss:$16 sps:$4 sm:$0xff]  }
 0x175   :  { %3623 = vmatpush1.bf16.msra.mxu0 %v7227_v11  ;;  %3787 = vmatpush1.bf16.msra.mxu1 %v7230_v30  ;;  %v2055_v11 = vpack.c.bf16 %v2045_v25, %v2045_v25  ;;  %v7318_v30 = vld [vmem:[#allocation6 + $0x220] ss:$16 sps:$4 sm:$0xff]  }
 0x176   :  { %3624 = vmatprep.subr.bf16.mxu0 %v7235_v31  ;;  %3788 = vmatprep.subr.bf16.mxu1 %v7238_v32  ;;  %v7321_v31 = vld [vmem:[#allocation6 + $0x228] ss:$16 sps:$4 sm:$0xff]   ;;  %v7326_v32 = vld [vmem:[#allocation6 + $0x244] ss:$16 sps:$4 sm:$0xff]  }
 0x177   :  { %v8304_v25 = vld [vmem:[#allocation2 + $0x10] sm:$0xff] }
 0x179   :  { %3625 = vmatpush1.bf16.msra.mxu0 %v7233_v33  ;;  %3789 = vmatpush1.bf16.msra.mxu1 %v7236_v34  ;;  %v7329_v33 = vld [vmem:[#allocation6 + $0x24c] ss:$16 sps:$4 sm:$0xff]   ;;  %v7327_v34 = vld [vmem:[#allocation6 + $0x248] ss:$16 sps:$4 sm:$0xff]  }
 0x17a   :  { %3626 = vmatprep.subr.bf16.mxu0 %v7241_v35  ;;  %3790 = vmatprep.subr.bf16.mxu1 %v7244_v36  ;;  %v7332_v35 = vld [vmem:[#allocation6 + $0x264] ss:$16 sps:$4 sm:$0xff]   ;;  %v7335_v36 = vld [vmem:[#allocation6 + $0x26c] ss:$16 sps:$4 sm:$0xff]  }
 0x17d   :  { %3627 = vmatpush1.bf16.msra.mxu0 %v7239_v37  ;;  %3791 = vmatpush1.bf16.msra.mxu1 %v7242_v38  ;;  %v7330_v37 = vld [vmem:[#allocation6 + $0x260] ss:$16 sps:$4 sm:$0xff]   ;;  %v7333_v38 = vld [vmem:[#allocation6 + $0x268] ss:$16 sps:$4 sm:$0xff]  }
 0x17e   :  { %3628 = vmatprep.subr.bf16.mxu0 %v7247_v39  ;;  %3792 = vmatprep.subr.bf16.mxu1 %v7250_v40  ;;  %v7338_v39 = vld [vmem:[#allocation6 + $0x284] ss:$16 sps:$4 sm:$0xff]   ;;  %v7341_v40 = vld [vmem:[#allocation6 + $0x28c] ss:$16 sps:$4 sm:$0xff]  }
 0x181   :  { %3629 = vmatpush1.bf16.msra.mxu0 %v7245_v41  ;;  %3793 = vmatpush1.bf16.msra.mxu1 %v7248_v42  ;;  %v7336_v41 = vld [vmem:[#allocation6 + $0x280] ss:$16 sps:$4 sm:$0xff]   ;;  %v7339_v42 = vld [vmem:[#allocation6 + $0x288] ss:$16 sps:$4 sm:$0xff]  }
 0x182   :  { %3630 = vmatprep.subr.bf16.mxu0 %v7253_v43  ;;  %3794 = vmatprep.subr.bf16.mxu1 %v7256_v44  ;;  %v7344_v43 = vld [vmem:[#allocation6 + $0x2a4] ss:$16 sps:$4 sm:$0xff]   ;;  %v7347_v44 = vld [vmem:[#allocation6 + $0x2ac] ss:$16 sps:$4 sm:$0xff]  }
 0x185   :  { %3631 = vmatpush1.bf16.msra.mxu0 %v7251_v45  ;;  %3795 = vmatpush1.bf16.msra.mxu1 %v7254_v46  ;;  %v7342_v45 = vld [vmem:[#allocation6 + $0x2a0] ss:$16 sps:$4 sm:$0xff]   ;;  %v7345_v46 = vld [vmem:[#allocation6 + $0x2a8] ss:$16 sps:$4 sm:$0xff]  }
 0x186   :  { %3632 = vmatprep.subr.bf16.mxu0 %v7259_v47  ;;  %3796 = vmatprep.subr.bf16.mxu1 %v7262_v48  ;;  %v7350_v47 = vld [vmem:[#allocation6 + $0x2c4] ss:$16 sps:$4 sm:$0xff]   ;;  %v7353_v48 = vld [vmem:[#allocation6 + $0x2cc] ss:$16 sps:$4 sm:$0xff]  }
 0x189   :  { %3633 = vmatpush1.bf16.msra.mxu0 %v7257_v49  ;;  %3797 = vmatpush1.bf16.msra.mxu1 %v7260_v50  ;;  %v7348_v49 = vld [vmem:[#allocation6 + $0x2c0] ss:$16 sps:$4 sm:$0xff]   ;;  %v7351_v50 = vld [vmem:[#allocation6 + $0x2c8] ss:$16 sps:$4 sm:$0xff]  }
 0x18a   :  { %3634 = vmatprep.subr.bf16.mxu0 %v7265_v51  ;;  %3798 = vmatprep.subr.bf16.mxu1 %v7268_v52  ;;  %v7356_v51 = vld [vmem:[#allocation6 + $0x2e4] ss:$16 sps:$4 sm:$0xff]   ;;  %v7359_v52 = vld [vmem:[#allocation6 + $0x2ec] ss:$16 sps:$4 sm:$0xff]  }
 0x18d   :  { %3635 = vmatpush1.bf16.msra.mxu0 %v7263_v53  ;;  %3799 = vmatpush1.bf16.msra.mxu1 %v7266_v54  ;;  %v7354_v53 = vld [vmem:[#allocation6 + $0x2e0] ss:$16 sps:$4 sm:$0xff]   ;;  %v7357_v54 = vld [vmem:[#allocation6 + $0x2e8] ss:$16 sps:$4 sm:$0xff]  }
 0x18e   :  { %3636 = vmatprep.subr.bf16.mxu0 %v7271_v55  ;;  %3800 = vmatprep.subr.bf16.mxu1 %v7274_v56  ;;  %v7362_v55 = vld [vmem:[#allocation6 + $0x304] ss:$16 sps:$4 sm:$0xff]   ;;  %v7365_v56 = vld [vmem:[#allocation6 + $0x30c] ss:$16 sps:$4 sm:$0xff]  }
 0x191   :  { %3637 = vmatpush1.bf16.msra.mxu0 %v7269_v57  ;;  %3801 = vmatpush1.bf16.msra.mxu1 %v7272_v58  ;;  %v7360_v57 = vld [vmem:[#allocation6 + $0x300] ss:$16 sps:$4 sm:$0xff]   ;;  %v7363_v58 = vld [vmem:[#allocation6 + $0x308] ss:$16 sps:$4 sm:$0xff]  }
 0x192   :  { %3638 = vmatprep.subr.bf16.mxu0 %v7277_v59  ;;  %3802 = vmatprep.subr.bf16.mxu1 %v7280_v60  ;;  %v7368_v59 = vld [vmem:[#allocation6 + $0x324] ss:$16 sps:$4 sm:$0xff]   ;;  %v7371_v60 = vld [vmem:[#allocation6 + $0x32c] ss:$16 sps:$4 sm:$0xff]  }
 0x195   :  { %3639 = vmatpush1.bf16.msra.mxu0 %v7275_v61  ;;  %3803 = vmatpush1.bf16.msra.mxu1 %v7278_v62  ;;  %v7366_v61 = vld [vmem:[#allocation6 + $0x320] ss:$16 sps:$4 sm:$0xff]   ;;  %v7369_v62 = vld [vmem:[#allocation6 + $0x328] ss:$16 sps:$4 sm:$0xff]  }
 0x196   :  { %3640 = vmatprep.subr.bf16.mxu0 %v7283_v63  ;;  %3804 = vmatprep.subr.bf16.mxu1 %v7286_v0  ;;  %v7374_v63 = vld [vmem:[#allocation6 + $0x344] ss:$16 sps:$4 sm:$0xff]   ;;  %v7377_v0 = vld [vmem:[#allocation6 + $0x34c] ss:$16 sps:$4 sm:$0xff]  }
 0x199   :  { %3641 = vmatpush1.bf16.msra.mxu0 %v7281_v1  ;;  %3805 = vmatpush1.bf16.msra.mxu1 %v7284_v2  ;;  %v7372_v1 = vld [vmem:[#allocation6 + $0x340] ss:$16 sps:$4 sm:$0xff]   ;;  %v7375_v2 = vld [vmem:[#allocation6 + $0x348] ss:$16 sps:$4 sm:$0xff]  }
 0x19a   :  { %3642 = vmatprep.subr.bf16.mxu0 %v7289_v3  ;;  %3806 = vmatprep.subr.bf16.mxu1 %v7292_v4  ;;  %v7380_v3 = vld [vmem:[#allocation6 + $0x364] ss:$16 sps:$4 sm:$0xff]   ;;  %v7383_v4 = vld [vmem:[#allocation6 + $0x36c] ss:$16 sps:$4 sm:$0xff]  }
 0x19d   :  { %3643 = vmatpush1.bf16.msra.mxu0 %v7287_v5  ;;  %3807 = vmatpush1.bf16.msra.mxu1 %v7290_v6  ;;  %v7378_v5 = vld [vmem:[#allocation6 + $0x360] ss:$16 sps:$4 sm:$0xff]   ;;  %v7381_v6 = vld [vmem:[#allocation6 + $0x368] ss:$16 sps:$4 sm:$0xff]  }
 0x19e   :  { %3644 = vmatprep.subr.bf16.mxu0 %v7295_v7  ;;  %3808 = vmatprep.subr.bf16.mxu1 %v7298_v8  ;;  %v7386_v7 = vld [vmem:[#allocation6 + $0x384] ss:$16 sps:$4 sm:$0xff]   ;;  %v7389_v8 = vld [vmem:[#allocation6 + $0x38c] ss:$16 sps:$4 sm:$0xff]  }
 0x1a1   :  { %3645 = vmatpush1.bf16.msra.mxu0 %v7293_v9  ;;  %3809 = vmatpush1.bf16.msra.mxu1 %v7296_v10  ;;  %v7384_v9 = vld [vmem:[#allocation6 + $0x380] ss:$16 sps:$4 sm:$0xff]   ;;  %v7387_v10 = vld [vmem:[#allocation6 + $0x388] ss:$16 sps:$4 sm:$0xff]  }
 0x1a2   :  { %3646 = vmatprep.subr.bf16.mxu0 %v7301_v12  ;;  %3810 = vmatprep.subr.bf16.mxu1 %v7304_v14  ;;  %v7392_v12 = vld [vmem:[#allocation6 + $0x3a4] ss:$16 sps:$4 sm:$0xff]   ;;  %v7395_v14 = vld [vmem:[#allocation6 + $0x3ac] ss:$16 sps:$4 sm:$0xff]  }
 0x1a5   :  { %3647 = vmatpush1.bf16.msra.mxu0 %v7299_v15  ;;  %3811 = vmatpush1.bf16.msra.mxu1 %v7302_v17  ;;  %v7390_v15 = vld [vmem:[#allocation6 + $0x3a0] ss:$16 sps:$4 sm:$0xff]   ;;  %v7393_v17 = vld [vmem:[#allocation6 + $0x3a8] ss:$16 sps:$4 sm:$0xff]  }
 0x1a6   :  { %3648 = vmatprep.subr.bf16.mxu0 %v7307_v18  ;;  %3812 = vmatprep.subr.bf16.mxu1 %v7310_v19  ;;  %v7398_v18 = vld [vmem:[#allocation6 + $0x3c4] ss:$16 sps:$4 sm:$0xff]   ;;  %v7401_v19 = vld [vmem:[#allocation6 + $0x3cc] ss:$16 sps:$4 sm:$0xff]  }
 0x1a9   :  { %3649 = vmatpush1.bf16.msra.mxu0 %v7305_v21  ;;  %3813 = vmatpush1.bf16.msra.mxu1 %v7308_v22  ;;  %v7396_v21 = vld [vmem:[#allocation6 + $0x3c0] ss:$16 sps:$4 sm:$0xff]   ;;  %v7399_v22 = vld [vmem:[#allocation6 + $0x3c8] ss:$16 sps:$4 sm:$0xff]  }
 0x1aa   :  { %3659 = vmatprep.subr.bf16.mxu0 %v7314_v23  ;;  %3823 = vmatprep.subr.bf16.mxu1 %v7317_v24  ;;  %v7404_v23 = vld [vmem:[#allocation6 + $0x3e4] ss:$16 sps:$4 sm:$0xff]   ;;  %v7407_v24 = vld [vmem:[#allocation6 + $0x3ec] ss:$16 sps:$4 sm:$0xff]  }
 0x1ac   :  { %3651 = vmatmul.mubr.bf16.vlgmr.msra.gmra.mrb[4].mxu0 %v2052_v13  ;;  %3815 = vmatmul.mubr.bf16.vlgmr.msra.gmra.mrb[4].mxu1 %v2052_v13  ;;  %v7402_v13 = vld [vmem:[#allocation6 + $0x3e0] ss:$16 sps:$4 sm:$0xff]  }
 0x1ad   :  { %3660 = vmatpush1.bf16.msra.mxu0 %v7312_v26  ;;  %3824 = vmatpush1.bf16.msra.mxu1 %v7315_v27  ;;  %v7405_v26 = vld [vmem:[#allocation6 + $0x3e8] ss:$16 sps:$4 sm:$0xff]   ;;  %v7411_v27 = vld [vmem:[#allocation6 + $0x404] ss:$16 sps:$4 sm:$0xff]  }
 0x1ae   :  { %3661 = vmatprep.subr.bf16.mxu0 %v7320_v28  ;;  %3825 = vmatprep.subr.bf16.mxu1 %v7323_v29  ;;  %v7414_v28 = vld [vmem:[#allocation6 + $0x40c] ss:$16 sps:$4 sm:$0xff]   ;;  %v7409_v29 = vld [vmem:[#allocation6 + $0x400] ss:$16 sps:$4 sm:$0xff]  }
 0x1af   :  { %3691 = vmatprep.mubr.bf16.mxu0 %v2055_v11  ;;  %3855 = vmatprep.mubr.bf16.mxu1 %v2055_v11  ;;  %v7412_v11 = vld [vmem:[#allocation6 + $0x408] ss:$16 sps:$4 sm:$0xff]  }
 0x1b1   :  { %3662 = vmatpush1.bf16.msra.mxu0 %v7318_v30  ;;  %3826 = vmatpush1.bf16.msra.mxu1 %v7321_v31  ;;  %v2046_v30 = vcombine.high %v8304_v25, %v8304_v25  ;;  %v2054_v31 = vpack.c.bf16 %v8298_v20, %v8298_v20  ;;  %v7421_v20 = vld [vmem:[#allocation6 + $0x440] ss:$16 sps:$4 sm:$0xff]  }
 0x1b2   :  { %3663 = vmatprep.subr.bf16.mxu0 %v7326_v32  ;;  %3827 = vmatprep.subr.bf16.mxu1 %v7329_v33  ;;  %v7417_v32 = vld [vmem:[#allocation6 + $0x424] ss:$16 sps:$4 sm:$0xff]   ;;  %v7420_v33 = vld [vmem:[#allocation6 + $0x42c] ss:$16 sps:$4 sm:$0xff]  }
 0x1b5   :  { %3664 = vmatpush1.bf16.msra.mxu0 %v7324_v16  ;;  %3828 = vmatpush1.bf16.msra.mxu1 %v7327_v34  ;;  %v2057_v16 = vpack.c.bf16 %v2046_v30, %v2046_v30  ;;  %v7415_v34 = vld [vmem:[#allocation6 + $0x420] ss:$16 sps:$4 sm:$0xff]   ;;  %v7502_v30 = vld [vmem:[#allocation6 + $0x5e8] ss:$16 sps:$4 sm:$0xff]  }
 0x1b6   :  { %3665 = vmatprep.subr.bf16.mxu0 %v7332_v35  ;;  %3829 = vmatprep.subr.bf16.mxu1 %v7335_v36  ;;  %v7418_v35 = vld [vmem:[#allocation6 + $0x428] ss:$16 sps:$4 sm:$0xff]   ;;  %v7423_v36 = vld [vmem:[#allocation6 + $0x444] ss:$16 sps:$4 sm:$0xff]  }
 0x1b9   :  { %3666 = vmatpush1.bf16.msra.mxu0 %v7330_v37  ;;  %3830 = vmatpush1.bf16.msra.mxu1 %v7333_v38  ;;  %v7426_v37 = vld [vmem:[#allocation6 + $0x44c] ss:$16 sps:$4 sm:$0xff]   ;;  %v7424_v38 = vld [vmem:[#allocation6 + $0x448] ss:$16 sps:$4 sm:$0xff]  }
 0x1ba   :  { %3667 = vmatprep.subr.bf16.mxu0 %v7338_v39  ;;  %3831 = vmatprep.subr.bf16.mxu1 %v7341_v40  ;;  %v7429_v39 = vld [vmem:[#allocation6 + $0x464] ss:$16 sps:$4 sm:$0xff]   ;;  %v7432_v40 = vld [vmem:[#allocation6 + $0x46c] ss:$16 sps:$4 sm:$0xff]  }
 0x1bd   :  { %3668 = vmatpush1.bf16.msra.mxu0 %v7336_v41  ;;  %3832 = vmatpush1.bf16.msra.mxu1 %v7339_v42  ;;  %v7427_v41 = vld [vmem:[#allocation6 + $0x460] ss:$16 sps:$4 sm:$0xff]   ;;  %v7430_v42 = vld [vmem:[#allocation6 + $0x468] ss:$16 sps:$4 sm:$0xff]  }
 0x1be   :  { %3669 = vmatprep.subr.bf16.mxu0 %v7344_v43  ;;  %3833 = vmatprep.subr.bf16.mxu1 %v7347_v44  ;;  %v7435_v43 = vld [vmem:[#allocation6 + $0x484] ss:$16 sps:$4 sm:$0xff]   ;;  %v7438_v44 = vld [vmem:[#allocation6 + $0x48c] ss:$16 sps:$4 sm:$0xff]  }
 0x1c1   :  { %3670 = vmatpush1.bf16.msra.mxu0 %v7342_v45  ;;  %3834 = vmatpush1.bf16.msra.mxu1 %v7345_v46  ;;  %v7433_v45 = vld [vmem:[#allocation6 + $0x480] ss:$16 sps:$4 sm:$0xff]   ;;  %v7436_v46 = vld [vmem:[#allocation6 + $0x488] ss:$16 sps:$4 sm:$0xff]  }
 0x1c2   :  { %3671 = vmatprep.subr.bf16.mxu0 %v7350_v47  ;;  %3835 = vmatprep.subr.bf16.mxu1 %v7353_v48  ;;  %v7441_v47 = vld [vmem:[#allocation6 + $0x4a4] ss:$16 sps:$4 sm:$0xff]   ;;  %v7444_v48 = vld [vmem:[#allocation6 + $0x4ac] ss:$16 sps:$4 sm:$0xff]  }
 0x1c5   :  { %3672 = vmatpush1.bf16.msra.mxu0 %v7348_v49  ;;  %3836 = vmatpush1.bf16.msra.mxu1 %v7351_v50  ;;  %v7439_v49 = vld [vmem:[#allocation6 + $0x4a0] ss:$16 sps:$4 sm:$0xff]   ;;  %v7442_v50 = vld [vmem:[#allocation6 + $0x4a8] ss:$16 sps:$4 sm:$0xff]  }
 0x1c6   :  { %3673 = vmatprep.subr.bf16.mxu0 %v7356_v51  ;;  %3837 = vmatprep.subr.bf16.mxu1 %v7359_v52  ;;  %v7447_v51 = vld [vmem:[#allocation6 + $0x4c4] ss:$16 sps:$4 sm:$0xff]   ;;  %v7450_v52 = vld [vmem:[#allocation6 + $0x4cc] ss:$16 sps:$4 sm:$0xff]  }
 0x1c9   :  { %3674 = vmatpush1.bf16.msra.mxu0 %v7354_v53  ;;  %3838 = vmatpush1.bf16.msra.mxu1 %v7357_v54  ;;  %v7445_v53 = vld [vmem:[#allocation6 + $0x4c0] ss:$16 sps:$4 sm:$0xff]   ;;  %v7448_v54 = vld [vmem:[#allocation6 + $0x4c8] ss:$16 sps:$4 sm:$0xff]  }
 0x1ca   :  { %3675 = vmatprep.subr.bf16.mxu0 %v7362_v55  ;;  %3839 = vmatprep.subr.bf16.mxu1 %v7365_v56  ;;  %v7453_v55 = vld [vmem:[#allocation6 + $0x4e4] ss:$16 sps:$4 sm:$0xff]   ;;  %v7456_v56 = vld [vmem:[#allocation6 + $0x4ec] ss:$16 sps:$4 sm:$0xff]  }
 0x1cd   :  { %3676 = vmatpush1.bf16.msra.mxu0 %v7360_v57  ;;  %3840 = vmatpush1.bf16.msra.mxu1 %v7363_v58  ;;  %v7451_v57 = vld [vmem:[#allocation6 + $0x4e0] ss:$16 sps:$4 sm:$0xff]   ;;  %v7454_v58 = vld [vmem:[#allocation6 + $0x4e8] ss:$16 sps:$4 sm:$0xff]  }
 0x1ce   :  { %3677 = vmatprep.subr.bf16.mxu0 %v7368_v59  ;;  %3841 = vmatprep.subr.bf16.mxu1 %v7371_v60  ;;  %v7459_v59 = vld [vmem:[#allocation6 + $0x504] ss:$16 sps:$4 sm:$0xff]   ;;  %v7462_v60 = vld [vmem:[#allocation6 + $0x50c] ss:$16 sps:$4 sm:$0xff]  }
 0x1d1   :  { %3678 = vmatpush1.bf16.msra.mxu0 %v7366_v61  ;;  %3842 = vmatpush1.bf16.msra.mxu1 %v7369_v62  ;;  %v7457_v61 = vld [vmem:[#allocation6 + $0x500] ss:$16 sps:$4 sm:$0xff]   ;;  %v7460_v62 = vld [vmem:[#allocation6 + $0x508] ss:$16 sps:$4 sm:$0xff]  }
 0x1d2   :  { %3679 = vmatprep.subr.bf16.mxu0 %v7374_v63  ;;  %3843 = vmatprep.subr.bf16.mxu1 %v7377_v0  ;;  %v7465_v63 = vld [vmem:[#allocation6 + $0x524] ss:$16 sps:$4 sm:$0xff]   ;;  %v7468_v0 = vld [vmem:[#allocation6 + $0x52c] ss:$16 sps:$4 sm:$0xff]  }
 0x1d5   :  { %3680 = vmatpush1.bf16.msra.mxu0 %v7372_v1  ;;  %3844 = vmatpush1.bf16.msra.mxu1 %v7375_v2  ;;  %v7463_v1 = vld [vmem:[#allocation6 + $0x520] ss:$16 sps:$4 sm:$0xff]   ;;  %v7466_v2 = vld [vmem:[#allocation6 + $0x528] ss:$16 sps:$4 sm:$0xff]  }
 0x1d6   :  { %3681 = vmatprep.subr.bf16.mxu0 %v7380_v3  ;;  %3845 = vmatprep.subr.bf16.mxu1 %v7383_v4  ;;  %v7471_v3 = vld [vmem:[#allocation6 + $0x544] ss:$16 sps:$4 sm:$0xff]   ;;  %v7474_v4 = vld [vmem:[#allocation6 + $0x54c] ss:$16 sps:$4 sm:$0xff]  }
 0x1d9   :  { %3682 = vmatpush1.bf16.msra.mxu0 %v7378_v5  ;;  %3846 = vmatpush1.bf16.msra.mxu1 %v7381_v6  ;;  %v7469_v5 = vld [vmem:[#allocation6 + $0x540] ss:$16 sps:$4 sm:$0xff]   ;;  %v7472_v6 = vld [vmem:[#allocation6 + $0x548] ss:$16 sps:$4 sm:$0xff]  }
 0x1da   :  { %3683 = vmatprep.subr.bf16.mxu0 %v7386_v7  ;;  %3847 = vmatprep.subr.bf16.mxu1 %v7389_v8  ;;  %v7477_v7 = vld [vmem:[#allocation6 + $0x564] ss:$16 sps:$4 sm:$0xff]   ;;  %v7480_v8 = vld [vmem:[#allocation6 + $0x56c] ss:$16 sps:$4 sm:$0xff]  }
 0x1dd   :  { %3684 = vmatpush1.bf16.msra.mxu0 %v7384_v9  ;;  %3848 = vmatpush1.bf16.msra.mxu1 %v7387_v10  ;;  %v7475_v9 = vld [vmem:[#allocation6 + $0x560] ss:$16 sps:$4 sm:$0xff]   ;;  %v7478_v10 = vld [vmem:[#allocation6 + $0x568] ss:$16 sps:$4 sm:$0xff]  }
 0x1de   :  { %3685 = vmatprep.subr.bf16.mxu0 %v7392_v12  ;;  %3849 = vmatprep.subr.bf16.mxu1 %v7395_v14  ;;  %v7483_v12 = vld [vmem:[#allocation6 + $0x584] ss:$16 sps:$4 sm:$0xff]   ;;  %v7486_v14 = vld [vmem:[#allocation6 + $0x58c] ss:$16 sps:$4 sm:$0xff]  }
 0x1e1   :  { %3686 = vmatpush1.bf16.msra.mxu0 %v7390_v15  ;;  %3850 = vmatpush1.bf16.msra.mxu1 %v7393_v17  ;;  %v7481_v15 = vld [vmem:[#allocation6 + $0x580] ss:$16 sps:$4 sm:$0xff]   ;;  %v7484_v17 = vld [vmem:[#allocation6 + $0x588] ss:$16 sps:$4 sm:$0xff]  }
 0x1e2   :  { %3687 = vmatprep.subr.bf16.mxu0 %v7398_v18  ;;  %3851 = vmatprep.subr.bf16.mxu1 %v7401_v19  ;;  %v7489_v18 = vld [vmem:[#allocation6 + $0x5a4] ss:$16 sps:$4 sm:$0xff]   ;;  %v7492_v19 = vld [vmem:[#allocation6 + $0x5ac] ss:$16 sps:$4 sm:$0xff]  }
 0x1e5   :  { %3688 = vmatpush1.bf16.msra.mxu0 %v7396_v21  ;;  %3852 = vmatpush1.bf16.msra.mxu1 %v7399_v22  ;;  %v7487_v21 = vld [vmem:[#allocation6 + $0x5a0] ss:$16 sps:$4 sm:$0xff]   ;;  %v7490_v22 = vld [vmem:[#allocation6 + $0x5a8] ss:$16 sps:$4 sm:$0xff]  }
 0x1e6   :  { %3689 = vmatprep.subr.bf16.mxu0 %v7404_v23  ;;  %3853 = vmatprep.subr.bf16.mxu1 %v7407_v24  ;;  %v7495_v23 = vld [vmem:[#allocation6 + $0x5c4] ss:$16 sps:$4 sm:$0xff]   ;;  %v7498_v24 = vld [vmem:[#allocation6 + $0x5cc] ss:$16 sps:$4 sm:$0xff]  }
 0x1e9   :  { %3690 = vmatpush1.bf16.msra.mxu0 %v7402_v13  ;;  %3854 = vmatpush1.bf16.msra.mxu1 %v7405_v26  ;;  %v7493_v13 = vld [vmem:[#allocation6 + $0x5c0] ss:$16 sps:$4 sm:$0xff]   ;;  %v7496_v26 = vld [vmem:[#allocation6 + $0x5c8] ss:$16 sps:$4 sm:$0xff]  }
 0x1ea   :  { %3700 = vmatprep.subr.bf16.mxu0 %v7411_v27  ;;  %3864 = vmatprep.subr.bf16.mxu1 %v7414_v28  ;;  %v7501_v27 = vld [vmem:[#allocation6 + $0x5e4] ss:$16 sps:$4 sm:$0xff]   ;;  %v7504_v28 = vld [vmem:[#allocation6 + $0x5ec] ss:$16 sps:$4 sm:$0xff]  }
 0x1ec   :  { %3692 = vmatmul.mubr.bf16.vlgmr.msra.gmra.mrb[4].mxu0 %v2054_v31  ;;  %3856 = vmatmul.mubr.bf16.vlgmr.msra.gmra.mrb[4].mxu1 %v2054_v31  ;;  %v7508_v31 = vld [vmem:[#allocation6 + $0x604] ss:$16 sps:$4 sm:$0xff]  }
 0x1ed   :  { %3701 = vmatpush1.bf16.msra.mxu0 %v7409_v29  ;;  %3865 = vmatpush1.bf16.msra.mxu1 %v7412_v11  ;;  %v8310_v29 = vld [vmem:[#allocation2 + $0x18] sm:$0xff]  ;;  %v7499_v11 = vld [vmem:[#allocation6 + $0x5e0] ss:$16 sps:$4 sm:$0xff]  }
 0x1ee   :  { %3702 = vmatprep.subr.bf16.mxu0 %v7417_v32  ;;  %3866 = vmatprep.subr.bf16.mxu1 %v7420_v33  ;;  %v7511_v32 = vld [vmem:[#allocation6 + $0x60c] ss:$16 sps:$4 sm:$0xff]   ;;  %v7506_v33 = vld [vmem:[#allocation6 + $0x600] ss:$16 sps:$4 sm:$0xff]  }
 0x1ef   :  { %3732 = vmatprep.mubr.bf16.mxu0 %v2057_v16  ;;  %3896 = vmatprep.mubr.bf16.mxu1 %v2057_v16  ;;  %v2047_v16 = vcombine.high %v8310_v29, %v8310_v29 }
 0x1f1   :  { %3703 = vmatpush1.bf16.msra.mxu0 %v7415_v34  ;;  %3867 = vmatpush1.bf16.msra.mxu1 %v7418_v35  ;;  %v2056_v34 = vpack.c.bf16 %v8304_v25, %v8304_v25  ;;  %v7509_v35 = vld [vmem:[#allocation6 + $0x608] ss:$16 sps:$4 sm:$0xff]   ;;  %v396_v25 = vlaneseq }
 0x1f2   :  { %3704 = vmatprep.subr.bf16.mxu0 %v7423_v36  ;;  %3868 = vmatprep.subr.bf16.mxu1 %v7426_v37  ;;  %v7514_v36 = vld [vmem:[#allocation6 + $0x624] ss:$16 sps:$4 sm:$0xff]   ;;  %v7517_v37 = vld [vmem:[#allocation6 + $0x62c] ss:$16 sps:$4 sm:$0xff]  }
 0x1f5   :  { %3705 = vmatpush1.bf16.msra.mxu0 %v7421_v20  ;;  %3869 = vmatpush1.bf16.msra.mxu1 %v7424_v38  ;;  %v2059_v20 = vpack.c.bf16 %v2047_v16, %v2047_v16  ;;  %v7512_v38 = vld [vmem:[#allocation6 + $0x620] ss:$16 sps:$4 sm:$0xff]   ;;  %v7583_v16 = vld [vmem:[#allocation6 + $0x78c] ss:$16 sps:$4 sm:$0xff]  }
 0x1f6   :  { %3706 = vmatprep.subr.bf16.mxu0 %v7429_v39  ;;  %3870 = vmatprep.subr.bf16.mxu1 %v7432_v40  ;;  %v7515_v39 = vld [vmem:[#allocation6 + $0x628] ss:$16 sps:$4 sm:$0xff]   ;;  %v7520_v40 = vld [vmem:[#allocation6 + $0x644] ss:$16 sps:$4 sm:$0xff]  }
 0x1f9   :  { %3707 = vmatpush1.bf16.msra.mxu0 %v7427_v41  ;;  %3871 = vmatpush1.bf16.msra.mxu1 %v7430_v42  ;;  %v7523_v41 = vld [vmem:[#allocation6 + $0x64c] ss:$16 sps:$4 sm:$0xff]   ;;  %v7518_v42 = vld [vmem:[#allocation6 + $0x640] ss:$16 sps:$4 sm:$0xff]  }
 0x1fa   :  { %3708 = vmatprep.subr.bf16.mxu0 %v7435_v43  ;;  %3872 = vmatprep.subr.bf16.mxu1 %v7438_v44  ;;  %v7521_v43 = vld [vmem:[#allocation6 + $0x648] ss:$16 sps:$4 sm:$0xff]   ;;  %v7526_v44 = vld [vmem:[#allocation6 + $0x664] ss:$16 sps:$4 sm:$0xff]  }
 0x1fd   :  { %3709 = vmatpush1.bf16.msra.mxu0 %v7433_v45  ;;  %3873 = vmatpush1.bf16.msra.mxu1 %v7436_v46  ;;  %v7529_v45 = vld [vmem:[#allocation6 + $0x66c] ss:$16 sps:$4 sm:$0xff]   ;;  %v8316_v46 = vshrl.u32 %v396_v25, 7  ;;  %v7593_v25 = vld [vmem:[#allocation6 + $0x7c8] ss:$16 sps:$4 sm:$0xff]  }
 0x1fe   :  { %3710 = vmatprep.subr.bf16.mxu0 %v7441_v47  ;;  %3874 = vmatprep.subr.bf16.mxu1 %v7444_v48  ;;  %v7524_v47 = vld [vmem:[#allocation6 + $0x660] ss:$16 sps:$4 sm:$0xff]   ;;  %v7527_v48 = vld [vmem:[#allocation6 + $0x668] ss:$16 sps:$4 sm:$0xff]  }
 0x201   :  { %3711 = vmatpush1.bf16.msra.mxu0 %v7439_v49  ;;  %3875 = vmatpush1.bf16.msra.mxu1 %v7442_v50  ;;  %v7532_v49 = vld [vmem:[#allocation6 + $0x684] ss:$16 sps:$4 sm:$0xff]   ;;  %v7535_v50 = vld [vmem:[#allocation6 + $0x68c] ss:$16 sps:$4 sm:$0xff]  }
 0x202   :  { %3712 = vmatprep.subr.bf16.mxu0 %v7447_v51  ;;  %3876 = vmatprep.subr.bf16.mxu1 %v7450_v52  ;;  %v8319_v51 = vsub.s32 2, %v8316_v46  ;;  %v7530_v52 = vld [vmem:[#allocation6 + $0x680] ss:$16 sps:$4 sm:$0xff]  }
 0x205   :  { %3713 = vmatpush1.bf16.msra.mxu0 %v7445_v53  ;;  %3877 = vmatpush1.bf16.msra.mxu1 %v7448_v54  ;;  %v7533_v53 = vld [vmem:[#allocation6 + $0x688] ss:$16 sps:$4 sm:$0xff]   ;;  %v8324_v54 = vld [vmem:[%s8411_s5] sm:$0xf] }
 0x206   :  { %3714 = vmatprep.subr.bf16.mxu0 %v7453_v55  ;;  %3878 = vmatprep.subr.bf16.mxu1 %v7456_v56  ;;  %v7538_v55 = vld [vmem:[#allocation6 + $0x6a4] ss:$16 sps:$4 sm:$0xff]   ;;  %v7541_v56 = vld [vmem:[#allocation6 + $0x6ac] ss:$16 sps:$4 sm:$0xff]  }
 0x209   :  { %3715 = vmatpush1.bf16.msra.mxu0 %v7451_v57  ;;  %3879 = vmatpush1.bf16.msra.mxu1 %v7454_v58  ;;  %v407_v57 = vrot.slane %v8324_v54, %v8319_v51  ;;  %v7536_v58 = vld [vmem:[#allocation6 + $0x6a0] ss:$16 sps:$4 sm:$0xff]  }
 0x20a   :  { %3716 = vmatprep.subr.bf16.mxu0 %v7459_v59  ;;  %3880 = vmatprep.subr.bf16.mxu1 %v7462_v60  ;;  %v7539_v59 = vld [vmem:[#allocation6 + $0x6a8] ss:$16 sps:$4 sm:$0xff]   ;;  %v7544_v60 = vld [vmem:[#allocation6 + $0x6c4] ss:$16 sps:$4 sm:$0xff]  }
 0x20d   :  { %3717 = vmatpush1.bf16.msra.mxu0 %v7457_v61  ;;  %3881 = vmatpush1.bf16.msra.mxu1 %v7460_v62  ;;  %v7547_v61 = vld [vmem:[#allocation6 + $0x6cc] ss:$16 sps:$4 sm:$0xff]  }
 0x20e   :  { %3718 = vmatprep.subr.bf16.mxu0 %v7465_v63  ;;  %3882 = vmatprep.subr.bf16.mxu1 %v7468_v0 }
 0x211   :  { %3719 = vmatpush1.bf16.msra.mxu0 %v7463_v1  ;;  %3883 = vmatpush1.bf16.msra.mxu1 %v7466_v2 }
 0x212   :  { %3720 = vmatprep.subr.bf16.mxu0 %v7471_v3  ;;  %3884 = vmatprep.subr.bf16.mxu1 %v7474_v4 }
 0x215   :  { %3721 = vmatpush1.bf16.msra.mxu0 %v7469_v5  ;;  %3885 = vmatpush1.bf16.msra.mxu1 %v7472_v6  ;;  %v7542_v5 = vld [vmem:[#allocation6 + $0x6c0] ss:$16 sps:$4 sm:$0xff]   ;;  %v7545_v6 = vld [vmem:[#allocation6 + $0x6c8] ss:$16 sps:$4 sm:$0xff]  }
 0x216   :  { %3722 = vmatprep.subr.bf16.mxu0 %v7477_v7  ;;  %3886 = vmatprep.subr.bf16.mxu1 %v7480_v8  ;;  %v7550_v7 = vld [vmem:[#allocation6 + $0x6e4] ss:$16 sps:$4 sm:$0xff]   ;;  %v7553_v8 = vld [vmem:[#allocation6 + $0x6ec] ss:$16 sps:$4 sm:$0xff]  }
 0x219   :  { %3723 = vmatpush1.bf16.msra.mxu0 %v7475_v9  ;;  %3887 = vmatpush1.bf16.msra.mxu1 %v7478_v10 }
 0x21a   :  { %3724 = vmatprep.subr.bf16.mxu0 %v7483_v12  ;;  %3888 = vmatprep.subr.bf16.mxu1 %v7486_v14  ;;  %v7548_v12 = vld [vmem:[#allocation6 + $0x6e0] ss:$16 sps:$4 sm:$0xff]   ;;  %v7551_v14 = vld [vmem:[#allocation6 + $0x6e8] ss:$16 sps:$4 sm:$0xff]  }
 0x21d   :  { %3725 = vmatpush1.bf16.msra.mxu0 %v7481_v15  ;;  %3889 = vmatpush1.bf16.msra.mxu1 %v7484_v17  ;;  %v7556_v15 = vld [vmem:[#allocation6 + $0x704] ss:$16 sps:$4 sm:$0xff]   ;;  %v7559_v17 = vld [vmem:[#allocation6 + $0x70c] ss:$16 sps:$4 sm:$0xff]  }
 0x21e   :  { %3726 = vmatprep.subr.bf16.mxu0 %v7489_v18  ;;  %3890 = vmatprep.subr.bf16.mxu1 %v7492_v19  ;;  %v7554_v18 = vld [vmem:[#allocation6 + $0x700] ss:$16 sps:$4 sm:$0xff]   ;;  %v7557_v19 = vld [vmem:[#allocation6 + $0x708] ss:$16 sps:$4 sm:$0xff]  }
 0x221   :  { %3727 = vmatpush1.bf16.msra.mxu0 %v7487_v21  ;;  %3891 = vmatpush1.bf16.msra.mxu1 %v7490_v22  ;;  %v7562_v21 = vld [vmem:[#allocation6 + $0x724] ss:$16 sps:$4 sm:$0xff]   ;;  %v7565_v22 = vld [vmem:[#allocation6 + $0x72c] ss:$16 sps:$4 sm:$0xff]  }
 0x222   :  { %3728 = vmatprep.subr.bf16.mxu0 %v7495_v23  ;;  %3892 = vmatprep.subr.bf16.mxu1 %v7498_v24  ;;  %v7560_v23 = vld [vmem:[#allocation6 + $0x720] ss:$16 sps:$4 sm:$0xff]   ;;  %v7563_v24 = vld [vmem:[#allocation6 + $0x728] ss:$16 sps:$4 sm:$0xff]  }
 0x225   :  { %3729 = vmatpush1.bf16.msra.mxu0 %v7493_v13  ;;  %3893 = vmatpush1.bf16.msra.mxu1 %v7496_v26  ;;  %v7568_v13 = vld [vmem:[#allocation6 + $0x744] ss:$16 sps:$4 sm:$0xff]   ;;  %v7571_v26 = vld [vmem:[#allocation6 + $0x74c] ss:$16 sps:$4 sm:$0xff]  }
 0x226   :  { %3730 = vmatprep.subr.bf16.mxu0 %v7501_v27  ;;  %3894 = vmatprep.subr.bf16.mxu1 %v7504_v28  ;;  %v7566_v27 = vld [vmem:[#allocation6 + $0x740] ss:$16 sps:$4 sm:$0xff]   ;;  %v7569_v28 = vld [vmem:[#allocation6 + $0x748] ss:$16 sps:$4 sm:$0xff]  }
 0x229   :  { %3731 = vmatpush1.bf16.msra.mxu0 %v7499_v11  ;;  %3895 = vmatpush1.bf16.msra.mxu1 %v7502_v30  ;;  %v7574_v11 = vld [vmem:[#allocation6 + $0x764] ss:$16 sps:$4 sm:$0xff]   ;;  %v7577_v30 = vld [vmem:[#allocation6 + $0x76c] ss:$16 sps:$4 sm:$0xff]  }
 0x22a   :  { %3741 = vmatprep.subr.bf16.mxu0 %v7508_v31  ;;  %3905 = vmatprep.subr.bf16.mxu1 %v7511_v32  ;;  %v7572_v31 = vld [vmem:[#allocation6 + $0x760] ss:$16 sps:$4 sm:$0xff]   ;;  %v7575_v32 = vld [vmem:[#allocation6 + $0x768] ss:$16 sps:$4 sm:$0xff]  }
 0x22c   :  { %3733 = vmatmul.mubr.bf16.vlgmr.msra.gmra.mrb[4].mxu0 %v2056_v34  ;;  %3897 = vmatmul.mubr.bf16.vlgmr.msra.gmra.mrb[4].mxu1 %v2056_v34  ;;  %v7578_v34 = vld [vmem:[#allocation6 + $0x780] ss:$16 sps:$4 sm:$0xff]  }
 0x22d   :  { %3742 = vmatpush1.bf16.msra.mxu0 %v7506_v33  ;;  %3906 = vmatpush1.bf16.msra.mxu1 %v7509_v35  ;;  %v7580_v33 = vld [vmem:[#allocation6 + $0x784] ss:$16 sps:$4 sm:$0xff]   ;;  %v7581_v35 = vld [vmem:[#allocation6 + $0x788] ss:$16 sps:$4 sm:$0xff]  }
 0x22e   :  { %3743 = vmatprep.subr.bf16.mxu0 %v7514_v36  ;;  %3907 = vmatprep.subr.bf16.mxu1 %v7517_v37  ;;  %v7586_v36 = vld [vmem:[#allocation6 + $0x7a4] ss:$16 sps:$4 sm:$0xff]   ;;  %v7589_v37 = vld [vmem:[#allocation6 + $0x7ac] ss:$16 sps:$4 sm:$0xff]  }
 0x22f   :  { %3773 = vmatprep.mubr.bf16.mxu0 %v2059_v20  ;;  %3937 = vmatprep.mubr.bf16.mxu1 %v2059_v20  ;;  %v7584_v20 = vld [vmem:[#allocation6 + $0x7a0] ss:$16 sps:$4 sm:$0xff]  }
 0x231   :  { %3744 = vmatpush1.bf16.msra.mxu0 %v7512_v38  ;;  %3908 = vmatpush1.bf16.msra.mxu1 %v7515_v39  ;;  %v7587_v38 = vld [vmem:[#allocation6 + $0x7a8] ss:$16 sps:$4 sm:$0xff]   ;;  %v7592_v39 = vld [vmem:[#allocation6 + $0x7c4] ss:$16 sps:$4 sm:$0xff]  }
 0x232   :  { %3745 = vmatprep.subr.bf16.mxu0 %v7520_v40  ;;  %3909 = vmatprep.subr.bf16.mxu1 %v7523_v41  ;;  %v7595_v40 = vld [vmem:[#allocation6 + $0x7cc] ss:$16 sps:$4 sm:$0xff]   ;;  %v7590_v41 = vld [vmem:[#allocation6 + $0x7c0] ss:$16 sps:$4 sm:$0xff]  }
 0x235   :  { %3746 = vmatpush1.bf16.msra.mxu0 %v7518_v42  ;;  %3910 = vmatpush1.bf16.msra.mxu1 %v7521_v43  ;;  %v7598_v42 = vld [vmem:[#allocation6 + $0x7e4] ss:$16 sps:$4 sm:$0xff]   ;;  %v7601_v43 = vld [vmem:[#allocation6 + $0x7ec] ss:$16 sps:$4 sm:$0xff]  }
 0x236   :  { %3747 = vmatprep.subr.bf16.mxu0 %v7526_v44  ;;  %3911 = vmatprep.subr.bf16.mxu1 %v7529_v45  ;;  %v7596_v44 = vld [vmem:[#allocation6 + $0x7e0] ss:$16 sps:$4 sm:$0xff]   ;;  %v7599_v45 = vld [vmem:[#allocation6 + $0x7e8] ss:$16 sps:$4 sm:$0xff]  }
 0x239   :  { %3748 = vmatpush1.bf16.msra.mxu0 %v7524_v47  ;;  %3912 = vmatpush1.bf16.msra.mxu1 %v7527_v48  ;;  %v7605_v47 = vld [vmem:[#allocation9 + $0x4] ss:$16 sps:$4 sm:$0xff]  }
 0x23a   :  { %3749 = vmatprep.subr.bf16.mxu0 %v7532_v49  ;;  %3913 = vmatprep.subr.bf16.mxu1 %v7535_v50  ;;  %v7608_v48 = vld [vmem:[#allocation9 + $0x204] ss:$16 sps:$4 sm:$0xff]   ;;  %v2058_v49 = vpack.c.bf16 %v8310_v29, %v8310_v29  ;;  %v7603_v50 = vld [vmem:[#allocation9] ss:$16 sps:$4 sm:$0xff]  }
 0x23b   :  { %v7615_v29 = vld [vmem:[#allocation9 + $0x40] ss:$16 sps:$4 sm:$0xff]  }
 0x23d   :  { %3750 = vmatpush1.bf16.msra.mxu0 %v7530_v52  ;;  %3914 = vmatpush1.bf16.msra.mxu1 %v7533_v53  ;;  %v7606_v52 = vld [vmem:[#allocation9 + $0x200] ss:$16 sps:$4 sm:$0xff]   ;;  %v7611_v53 = vld [vmem:[#allocation9 + $0x24] ss:$16 sps:$4 sm:$0xff]  }
 0x23e   :  { %3751 = vmatprep.subr.bf16.mxu0 %v7538_v55  ;;  %3915 = vmatprep.subr.bf16.mxu1 %v7541_v56  ;;  %v7614_v55 = vld [vmem:[#allocation9 + $0x224] ss:$16 sps:$4 sm:$0xff]   ;;  %v7609_v56 = vld [vmem:[#allocation9 + $0x20] ss:$16 sps:$4 sm:$0xff]  }
 0x23f   :  { %v8328_v62 = vpop.f32.mrb[0].mxu0  ;;  %v2017_v63 = vpop.f32.mrb[0].mxu1 }
 0x240   :  { %v8330_v0 = vadd.f32 %v2017_v63, %v407_v57  ;;  %v8332_v1 = vpop.f32.mrb[1].mxu0  ;;  %v8334_v2 = vpop.f32.mrb[1].mxu1  ;;  %v7612_v57 = vld [vmem:[#allocation9 + $0x220] ss:$16 sps:$4 sm:$0xff]   ;;  %v7626_v63 = vld [vmem:[#allocation9 + $0x264] ss:$16 sps:$4 sm:$0xff]  }
 0x241   :  { %v1857_v3 = vpop.f32.mrb[2].mxu0  ;;  %v2021_v4 = vpop.f32.mrb[2].mxu1  ;;  %3752 = vmatpush1.bf16.msra.mxu0 %v7536_v58  ;;  %3916 = vmatpush1.bf16.msra.mxu1 %v7539_v59  ;;  %v7617_v58 = vld [vmem:[#allocation9 + $0x44] ss:$16 sps:$4 sm:$0xff]  }
 0x242   :  { %3753 = vmatprep.subr.bf16.mxu0 %v7544_v60  ;;  %3917 = vmatprep.subr.bf16.mxu1 %v7547_v61  ;;  %v1858_v9 = vpop.f32.mrb[3].mxu0  ;;  %v2022_v10 = vpop.f32.mrb[3].mxu1  ;;  %v7620_v59 = vld [vmem:[#allocation9 + $0x244] ss:$16 sps:$4 sm:$0xff]   ;;  %v7618_v60 = vld [vmem:[#allocation9 + $0x240] ss:$16 sps:$4 sm:$0xff]  }
 0x243   :  { %v7623_v61 = vld [vmem:[#allocation9 + $0x64] ss:$16 sps:$4 sm:$0xff]   ;;  %v7621_v3 = vld [vmem:[#allocation9 + $0x60] ss:$16 sps:$4 sm:$0xff]   ;;  %vm2026_vm7 = vcmp.ge.f32.partialorder %v8330_v0, 0.0 }
 0x244   :  { %v7624_v4 = vld [vmem:[#allocation9 + $0x260] ss:$16 sps:$4 sm:$0xff]   ;;  %v7635_v9 = vld [vmem:[#allocation9 + $0xa4] ss:$16 sps:$4 sm:$0xff]  }
 0x245   :  { %3754 = vmatpush1.bf16.msra.mxu0 %v7542_v5  ;;  %3918 = vmatpush1.bf16.msra.mxu1 %v7545_v6  ;;  %v7629_v5 = vld [vmem:[#allocation9 + $0x84] ss:$16 sps:$4 sm:$0xff]  }
 0x246   :  { %3755 = vmatprep.subr.bf16.mxu0 %v7550_v7  ;;  %3919 = vmatprep.subr.bf16.mxu1 %v7553_v8  ;;  %v7632_v6 = vld [vmem:[#allocation9 + $0x284] ss:$16 sps:$4 sm:$0xff]   ;;  %v7627_v7 = vld [vmem:[#allocation9 + $0x80] ss:$16 sps:$4 sm:$0xff]  }
 0x247   :  { %v7630_v8 = vld [vmem:[#allocation9 + $0x280] ss:$16 sps:$4 sm:$0xff]   ;;  %v7638_v10 = vld [vmem:[#allocation9 + $0x2a4] ss:$16 sps:$4 sm:$0xff]  }
 0x249   :  { %3756 = vmatpush1.bf16.msra.mxu0 %v7548_v12  ;;  %3920 = vmatpush1.bf16.msra.mxu1 %v7551_v14  ;;  %v7633_v12 = vld [vmem:[#allocation9 + $0xa0] ss:$16 sps:$4 sm:$0xff]  }
 0x24a   :  { %3757 = vmatprep.subr.bf16.mxu0 %v7556_v15  ;;  %3921 = vmatprep.subr.bf16.mxu1 %v7559_v17  ;;  %v7636_v14 = vld [vmem:[#allocation9 + $0x2a0] ss:$16 sps:$4 sm:$0xff]   ;;  %v7641_v15 = vld [vmem:[#allocation9 + $0xc4] ss:$16 sps:$4 sm:$0xff]  }
 0x24b   :  { %v7644_v17 = vld [vmem:[#allocation9 + $0x2c4] ss:$16 sps:$4 sm:$0xff]  }
 0x24d   :  { %3758 = vmatpush1.bf16.msra.mxu0 %v7554_v18  ;;  %3922 = vmatpush1.bf16.msra.mxu1 %v7557_v19  ;;  %v7639_v18 = vld [vmem:[#allocation9 + $0xc0] ss:$16 sps:$4 sm:$0xff]  }
 0x24e   :  { %3759 = vmatprep.subr.bf16.mxu0 %v7562_v21  ;;  %3923 = vmatprep.subr.bf16.mxu1 %v7565_v22  ;;  %v7642_v19 = vld [vmem:[#allocation9 + $0x2c0] ss:$16 sps:$4 sm:$0xff]   ;;  %v7647_v21 = vld [vmem:[#allocation9 + $0xe4] ss:$16 sps:$4 sm:$0xff]  }
 0x24f   :  { %v7650_v22 = vld [vmem:[#allocation9 + $0x2e4] ss:$16 sps:$4 sm:$0xff]  }
 0x251   :  { %3760 = vmatpush1.bf16.msra.mxu0 %v7560_v23  ;;  %3924 = vmatpush1.bf16.msra.mxu1 %v7563_v24  ;;  %v7645_v23 = vld [vmem:[#allocation9 + $0xe0] ss:$16 sps:$4 sm:$0xff]  }
 0x252   :  { %3761 = vmatprep.subr.bf16.mxu0 %v7568_v13  ;;  %3925 = vmatprep.subr.bf16.mxu1 %v7571_v26  ;;  %v7648_v24 = vld [vmem:[#allocation9 + $0x2e0] ss:$16 sps:$4 sm:$0xff]   ;;  %v7653_v13 = vld [vmem:[#allocation9 + $0x104] ss:$16 sps:$4 sm:$0xff]  }
 0x253   :  { %v7656_v26 = vld [vmem:[#allocation9 + $0x304] ss:$16 sps:$4 sm:$0xff]  }
 0x255   :  { %3762 = vmatpush1.bf16.msra.mxu0 %v7566_v27  ;;  %3926 = vmatpush1.bf16.msra.mxu1 %v7569_v28  ;;  %v7651_v27 = vld [vmem:[#allocation9 + $0x100] ss:$16 sps:$4 sm:$0xff]  }
 0x256   :  { %3763 = vmatprep.subr.bf16.mxu0 %v7574_v11  ;;  %3927 = vmatprep.subr.bf16.mxu1 %v7577_v30  ;;  %v7654_v28 = vld [vmem:[#allocation9 + $0x300] ss:$16 sps:$4 sm:$0xff]   ;;  %v7659_v11 = vld [vmem:[#allocation9 + $0x124] ss:$16 sps:$4 sm:$0xff]  }
 0x257   :  { %v7662_v30 = vld [vmem:[#allocation9 + $0x324] ss:$16 sps:$4 sm:$0xff]  }
 0x259   :  { %3764 = vmatpush1.bf16.msra.mxu0 %v7572_v31  ;;  %3928 = vmatpush1.bf16.msra.mxu1 %v7575_v32  ;;  %v7657_v31 = vld [vmem:[#allocation9 + $0x120] ss:$16 sps:$4 sm:$0xff]  }
 0x25a   :  { %3765 = vmatprep.subr.bf16.mxu0 %v7580_v33  ;;  %3929 = vmatprep.subr.bf16.mxu1 %v7583_v16  ;;  %v7660_v32 = vld [vmem:[#allocation9 + $0x320] ss:$16 sps:$4 sm:$0xff]   ;;  %v7665_v33 = vld [vmem:[#allocation9 + $0x144] ss:$16 sps:$4 sm:$0xff]  }
 0x25b   :  { %v7668_v16 = vld [vmem:[#allocation9 + $0x344] ss:$16 sps:$4 sm:$0xff]  }
 0x25d   :  { %3766 = vmatpush1.bf16.msra.mxu0 %v7578_v34  ;;  %3930 = vmatpush1.bf16.msra.mxu1 %v7581_v35  ;;  %v7663_v34 = vld [vmem:[#allocation9 + $0x140] ss:$16 sps:$4 sm:$0xff]  }
 0x25e   :  { %3767 = vmatprep.subr.bf16.mxu0 %v7586_v36  ;;  %3931 = vmatprep.subr.bf16.mxu1 %v7589_v37  ;;  %v7666_v35 = vld [vmem:[#allocation9 + $0x340] ss:$16 sps:$4 sm:$0xff]   ;;  %v7671_v36 = vld [vmem:[#allocation9 + $0x164] ss:$16 sps:$4 sm:$0xff]  }
 0x25f   :  { %v7674_v37 = vld [vmem:[#allocation9 + $0x364] ss:$16 sps:$4 sm:$0xff]  }
 0x261   :  { %3768 = vmatpush1.bf16.msra.mxu0 %v7584_v20  ;;  %3932 = vmatpush1.bf16.msra.mxu1 %v7587_v38  ;;  %v7669_v20 = vld [vmem:[#allocation9 + $0x160] ss:$16 sps:$4 sm:$0xff]  }
 0x262   :  { %3769 = vmatprep.subr.bf16.mxu0 %v7592_v39  ;;  %3933 = vmatprep.subr.bf16.mxu1 %v7595_v40  ;;  %v7672_v38 = vld [vmem:[#allocation9 + $0x360] ss:$16 sps:$4 sm:$0xff]   ;;  %v7677_v39 = vld [vmem:[#allocation9 + $0x184] ss:$16 sps:$4 sm:$0xff]  }
 0x263   :  { %v7680_v40 = vld [vmem:[#allocation9 + $0x384] ss:$16 sps:$4 sm:$0xff]  }
 0x265   :  { %3770 = vmatpush1.bf16.msra.mxu0 %v7590_v41  ;;  %3934 = vmatpush1.bf16.msra.mxu1 %v7593_v25  ;;  %v7675_v41 = vld [vmem:[#allocation9 + $0x180] ss:$16 sps:$4 sm:$0xff]  }
 0x266   :  { %3771 = vmatprep.subr.bf16.mxu0 %v7598_v42  ;;  %3935 = vmatprep.subr.bf16.mxu1 %v7601_v43  ;;  %v7678_v25 = vld [vmem:[#allocation9 + $0x380] ss:$16 sps:$4 sm:$0xff]   ;;  %v7683_v42 = vld [vmem:[#allocation9 + $0x1a4] ss:$16 sps:$4 sm:$0xff]  }
 0x267   :  { %v7686_v43 = vld [vmem:[#allocation9 + $0x3a4] ss:$16 sps:$4 sm:$0xff]  }
 0x269   :  { %3772 = vmatpush1.bf16.msra.mxu0 %v7596_v44  ;;  %3936 = vmatpush1.bf16.msra.mxu1 %v7599_v45  ;;  %v7681_v44 = vld [vmem:[#allocation9 + $0x1a0] ss:$16 sps:$4 sm:$0xff]  }
 0x26a   :  { %4862 = vmatprep.subr.bf16.mxu0 %v7605_v47  ;;  %4903 = vmatprep.subr.bf16.mxu1 %v7608_v48  ;;  %v7684_v45 = vld [vmem:[#allocation9 + $0x3a0] ss:$16 sps:$4 sm:$0xff]   ;;  %v7689_v47 = vld [vmem:[#allocation9 + $0x1c4] ss:$16 sps:$4 sm:$0xff]  }
 0x26b   :  { %v7692_v48 = vld [vmem:[#allocation9 + $0x3c4] ss:$16 sps:$4 sm:$0xff]  }
 0x26c   :  { %3774 = vmatmul.mubr.bf16.vlgmr.msra.gmra.mrb[4].mxu0 %v2058_v49  ;;  %3938 = vmatmul.mubr.bf16.vlgmr.msra.gmra.mrb[4].mxu1 %v2058_v49  ;;  %v7687_v49 = vld [vmem:[#allocation9 + $0x1c0] ss:$16 sps:$4 sm:$0xff]  }
 0x26d   :  { %4863 = vmatpush1.bf16.msra.mxu0 %v7603_v50  ;;  %4904 = vmatpush1.bf16.msra.mxu1 %v7606_v52  ;;  %v7690_v50 = vld [vmem:[#allocation9 + $0x3c0] ss:$16 sps:$4 sm:$0xff]   ;;  %v7695_v52 = vld [vmem:[#allocation9 + $0x1e4] ss:$16 sps:$4 sm:$0xff]  }
 0x26e   :  { %4864 = vmatprep.subr.bf16.mxu0 %v7611_v53  ;;  %4905 = vmatprep.subr.bf16.mxu1 %v7614_v55  ;;  %v7698_v53 = vld [vmem:[#allocation9 + $0x3e4] ss:$16 sps:$4 sm:$0xff]   ;;  %v7693_v55 = vld [vmem:[#allocation9 + $0x1e0] ss:$16 sps:$4 sm:$0xff]  }
 0x271   :  { %4865 = vmatpush1.bf16.msra.mxu0 %v7609_v56  ;;  %4906 = vmatpush1.bf16.msra.mxu1 %v7612_v57  ;;  %v7696_v56 = vld [vmem:[#allocation9 + $0x3e0] ss:$16 sps:$4 sm:$0xff]   ;;  %v7701_v57 = vld [vmem:[#allocation9 + $0xc] ss:$16 sps:$4 sm:$0xff]  }
 0x272   :  { %4866 = vmatprep.subr.bf16.mxu0 %v7617_v58  ;;  %4907 = vmatprep.subr.bf16.mxu1 %v7620_v59  ;;  %v7704_v58 = vld [vmem:[#allocation9 + $0x20c] ss:$16 sps:$4 sm:$0xff]   ;;  %v2316_v59 = vld [vmem:[%s8409_s3] sm:$0xf] }
 0x275   :  { %4867 = vmatpush1.bf16.msra.mxu0 %v7615_v29  ;;  %4908 = vmatpush1.bf16.msra.mxu1 %v7618_v60  ;;  %v8342_v29 = vsub.s32 0, %v8316_v46  ;;  %v8345_v60 = vsub.s32 1, %v8316_v46 }
 0x276   :  { %4868 = vmatprep.subr.bf16.mxu0 %v7623_v61  ;;  %4909 = vmatprep.subr.bf16.mxu1 %v7626_v63  ;;  %v8348_v61 = vsub.s32 3, %v8316_v46 }
 0x277   :  { %v2321_v63 = vrot.slane %v2316_v59, %v8342_v29 }
 0x279   :  { %4869 = vmatpush1.bf16.msra.mxu0 %v7621_v3  ;;  %4910 = vmatpush1.bf16.msra.mxu1 %v7624_v4  ;;  %v2329_v3 = vrot.slane %v2316_v59, %v8319_v51  ;;  %v2325_v4 = vrot.slane %v2316_v59, %v8345_v60 }
 0x27a   :  { %4870 = vmatprep.subr.bf16.mxu0 %v7629_v5  ;;  %4911 = vmatprep.subr.bf16.mxu1 %v7632_v6  ;;  %v2333_v5 = vrot.slane %v2316_v59, %v8348_v61  ;;  %v7738_v59 = vld [vmem:[#allocation9 + $0x2c8] ss:$16 sps:$4 sm:$0xff]  }
 0x27d   :  { %4871 = vmatpush1.bf16.msra.mxu0 %v7627_v7  ;;  %4912 = vmatpush1.bf16.msra.mxu1 %v7630_v8 }
 0x27e   :  { %4872 = vmatprep.subr.bf16.mxu0 %v7635_v9  ;;  %4913 = vmatprep.subr.bf16.mxu1 %v7638_v10 }
 0x281   :  { %4873 = vmatpush1.bf16.msra.mxu0 %v7633_v12  ;;  %4914 = vmatpush1.bf16.msra.mxu1 %v7636_v14 }
 0x282   :  { %4874 = vmatprep.subr.bf16.mxu0 %v7641_v15  ;;  %4915 = vmatprep.subr.bf16.mxu1 %v7644_v17 }
 0x285   :  { %4875 = vmatpush1.bf16.msra.mxu0 %v7639_v18  ;;  %4916 = vmatpush1.bf16.msra.mxu1 %v7642_v19 }
 0x286   :  { %4876 = vmatprep.subr.bf16.mxu0 %v7647_v21  ;;  %4917 = vmatprep.subr.bf16.mxu1 %v7650_v22 }
 0x289   :  { %4877 = vmatpush1.bf16.msra.mxu0 %v7645_v23  ;;  %4918 = vmatpush1.bf16.msra.mxu1 %v7648_v24 }
 0x28a   :  { %4878 = vmatprep.subr.bf16.mxu0 %v7653_v13  ;;  %4919 = vmatprep.subr.bf16.mxu1 %v7656_v26 }
 0x28d   :  { %4879 = vmatpush1.bf16.msra.mxu0 %v7651_v27  ;;  %4920 = vmatpush1.bf16.msra.mxu1 %v7654_v28 }
 0x28e   :  { %4880 = vmatprep.subr.bf16.mxu0 %v7659_v11  ;;  %4921 = vmatprep.subr.bf16.mxu1 %v7662_v30 }
 0x291   :  { %4881 = vmatpush1.bf16.msra.mxu0 %v7657_v31  ;;  %4922 = vmatpush1.bf16.msra.mxu1 %v7660_v32  ;;  %v7699_v32 = vld [vmem:[#allocation9 + $0x8] ss:$16 sps:$4 sm:$0xff]  }
 0x292   :  { %4882 = vmatprep.subr.bf16.mxu0 %v7665_v33  ;;  %4923 = vmatprep.subr.bf16.mxu1 %v7668_v16  ;;  %v7702_v33 = vld [vmem:[#allocation9 + $0x208] ss:$16 sps:$4 sm:$0xff]  }
 0x295   :  { %4883 = vmatpush1.bf16.msra.mxu0 %v7663_v34  ;;  %4924 = vmatpush1.bf16.msra.mxu1 %v7666_v35  ;;  %v7707_v35 = vld [vmem:[#allocation9 + $0x2c] ss:$16 sps:$4 sm:$0xff]  }
 0x296   :  { %4884 = vmatprep.subr.bf16.mxu0 %v7671_v36  ;;  %4925 = vmatprep.subr.bf16.mxu1 %v7674_v37  ;;  %v7710_v36 = vld [vmem:[#allocation9 + $0x22c] ss:$16 sps:$4 sm:$0xff]   ;;  %v7705_v37 = vld [vmem:[#allocation9 + $0x28] ss:$16 sps:$4 sm:$0xff]  }
 0x299   :  { %4885 = vmatpush1.bf16.msra.mxu0 %v7669_v20  ;;  %4926 = vmatpush1.bf16.msra.mxu1 %v7672_v38  ;;  %v7708_v20 = vld [vmem:[#allocation9 + $0x228] ss:$16 sps:$4 sm:$0xff]   ;;  %v7713_v38 = vld [vmem:[#allocation9 + $0x4c] ss:$16 sps:$4 sm:$0xff]  }
 0x29a   :  { %4886 = vmatprep.subr.bf16.mxu0 %v7677_v39  ;;  %4927 = vmatprep.subr.bf16.mxu1 %v7680_v40  ;;  %v7716_v39 = vld [vmem:[#allocation9 + $0x24c] ss:$16 sps:$4 sm:$0xff]   ;;  %v7711_v40 = vld [vmem:[#allocation9 + $0x48] ss:$16 sps:$4 sm:$0xff]  }
 0x29d   :  { %4887 = vmatpush1.bf16.msra.mxu0 %v7675_v41  ;;  %4928 = vmatpush1.bf16.msra.mxu1 %v7678_v25  ;;  %v7714_v41 = vld [vmem:[#allocation9 + $0x248] ss:$16 sps:$4 sm:$0xff]   ;;  %v7719_v25 = vld [vmem:[#allocation9 + $0x6c] ss:$16 sps:$4 sm:$0xff]  }
 0x29e   :  { %4888 = vmatprep.subr.bf16.mxu0 %v7683_v42  ;;  %4929 = vmatprep.subr.bf16.mxu1 %v7686_v43  ;;  %v7722_v42 = vld [vmem:[#allocation9 + $0x26c] ss:$16 sps:$4 sm:$0xff]   ;;  %v7717_v43 = vld [vmem:[#allocation9 + $0x68] ss:$16 sps:$4 sm:$0xff]  }
 0x2a1   :  { %4889 = vmatpush1.bf16.msra.mxu0 %v7681_v44  ;;  %4930 = vmatpush1.bf16.msra.mxu1 %v7684_v45  ;;  %v7720_v44 = vld [vmem:[#allocation9 + $0x268] ss:$16 sps:$4 sm:$0xff]   ;;  %v7725_v45 = vld [vmem:[#allocation9 + $0x8c] ss:$16 sps:$4 sm:$0xff]  }
 0x2a2   :  { %4890 = vmatprep.subr.bf16.mxu0 %v7689_v47  ;;  %4931 = vmatprep.subr.bf16.mxu1 %v7692_v48  ;;  %v7728_v47 = vld [vmem:[#allocation9 + $0x28c] ss:$16 sps:$4 sm:$0xff]   ;;  %v7723_v48 = vld [vmem:[#allocation9 + $0x88] ss:$16 sps:$4 sm:$0xff]  }
 0x2a5   :  { %4891 = vmatpush1.bf16.msra.mxu0 %v7687_v49  ;;  %4932 = vmatpush1.bf16.msra.mxu1 %v7690_v50  ;;  %v7726_v49 = vld [vmem:[#allocation9 + $0x288] ss:$16 sps:$4 sm:$0xff]   ;;  %v7731_v50 = vld [vmem:[#allocation9 + $0xac] ss:$16 sps:$4 sm:$0xff]  }
 0x2a6   :  { %4892 = vmatprep.subr.bf16.mxu0 %v7695_v52  ;;  %4933 = vmatprep.subr.bf16.mxu1 %v7698_v53  ;;  %v7734_v52 = vld [vmem:[#allocation9 + $0x2ac] ss:$16 sps:$4 sm:$0xff]   ;;  %v7729_v53 = vld [vmem:[#allocation9 + $0xa8] ss:$16 sps:$4 sm:$0xff]  }
 0x2a9   :  { %4893 = vmatpush1.bf16.msra.mxu0 %v7693_v55  ;;  %4934 = vmatpush1.bf16.msra.mxu1 %v7696_v56  ;;  %v7732_v55 = vld [vmem:[#allocation9 + $0x2a8] ss:$16 sps:$4 sm:$0xff]   ;;  %v7737_v56 = vld [vmem:[#allocation9 + $0xcc] ss:$16 sps:$4 sm:$0xff]  }
 0x2aa   :  { %4944 = vmatprep.subr.bf16.mxu0 %v7701_v57  ;;  %4985 = vmatprep.subr.bf16.mxu1 %v7704_v58  ;;  %v7740_v57 = vld [vmem:[#allocation9 + $0x2cc] ss:$16 sps:$4 sm:$0xff]   ;;  %v7735_v58 = vld [vmem:[#allocation9 + $0xc8] ss:$16 sps:$4 sm:$0xff]  }
 0x33f   :  { %v3775_v6 = vpop.f32.mrb[4].mxu0  ;;  %v3939_v7 = vpop.f32.mrb[4].mxu1 }
 0x340   :  { %v6765_v8 = vadd.f32 %v3775_v6, %v2321_v63  ;;  %v6767_v9 = vadd.f32 %v3939_v7, %v2329_v3  ;;  %v3777_v10 = vpop.f32.mrb[5].mxu0  ;;  %v3941_v12 = vpop.f32.mrb[5].mxu1  ;;  %v7743_v63 = vld [vmem:[#allocation9 + $0xec] ss:$16 sps:$4 sm:$0xff]  }
 0x341   :  { %v6766_v14 = vadd.f32 %v3777_v10, %v2325_v4  ;;  %v6768_v15 = vadd.f32 %v3941_v12, %v2333_v5  ;;  %v3779_v17 = vpop.f32.mrb[6].mxu0  ;;  %v3943_v18 = vpop.f32.mrb[6].mxu1  ;;  %v7746_v3 = vld [vmem:[#allocation9 + $0x2ec] ss:$16 sps:$4 sm:$0xff]   ;;  %v7741_v4 = vld [vmem:[#allocation9 + $0xe8] ss:$16 sps:$4 sm:$0xff]  }
 0x342   :  { %vm3946_vm0 = vcmp.ge.f32.partialorder %v6765_v8, 0.0  ;;  %v3950_v19 = vmul.f32 0.01, %v6765_v8  ;;  %vm3948_vm1 = vcmp.ge.f32.partialorder %v6767_v9, 0.0  ;;  %v3952_v21 = vmul.f32 0.01, %v6767_v9 }
 0x343   :  { %vm3947_vm2 = vcmp.ge.f32.partialorder %v6766_v14, 0.0  ;;  %v3951_v22 = vmul.f32 0.01, %v6766_v14  ;;  %vm3949_vm3 = vcmp.ge.f32.partialorder %v6768_v15, 0.0  ;;  %v3953_v23 = vmul.f32 0.01, %v6768_v15 }
 0x344   :  { %v3954_v24 = vsel %vm3946_vm0, %v6765_v8, %v3950_v19  ;;  %v3956_v13 = vsel %vm3948_vm1, %v6767_v9, %v3952_v21  ;;  %v3780_v26 = vpop.f32.mrb[7].mxu0  ;;  %v3944_v27 = vpop.f32.mrb[7].mxu1  ;;  %v7744_v5 = vld [vmem:[#allocation9 + $0x2e8] ss:$16 sps:$4 sm:$0xff]   ;;  %v7749_v6 = vld [vmem:[#allocation9 + $0x10c] ss:$16 sps:$4 sm:$0xff]  }
 0x345   :  { %v3955_v28 = vsel %vm3947_vm2, %v6766_v14, %v3951_v22  ;;  %v3957_v11 = vsel %vm3949_vm3, %v6768_v15, %v3953_v23  ;;  %v8354_v16 = vpack.c.bf16 %v3954_v24, %v3954_v24  ;;  %v8356_v34 = vpack.c.bf16 %v3956_v13, %v3956_v13  ;;  %v7752_v7 = vld [vmem:[#allocation9 + $0x30c] ss:$16 sps:$4 sm:$0xff]   ;;  %v7747_v8 = vld [vmem:[#allocation9 + $0x108] ss:$16 sps:$4 sm:$0xff]  }
 0x346   :  { %v4091_v30 = vpack.c.bf16 %v3955_v28, %v3955_v28  ;;  %v4093_v31 = vpack.c.bf16 %v3957_v11, %v3957_v11  ;;  %v7750_v9 = vld [vmem:[#allocation9 + $0x308] ss:$16 sps:$4 sm:$0xff]   ;;  %v7755_v10 = vld [vmem:[#allocation9 + $0x12c] ss:$16 sps:$4 sm:$0xff]  }
 0x347   :  { %v7758_v12 = vld [vmem:[#allocation9 + $0x32c] ss:$16 sps:$4 sm:$0xff]   ;;  %v7753_v14 = vld [vmem:[#allocation9 + $0x128] ss:$16 sps:$4 sm:$0xff]  }
 0x348   :  { %4894 = vmatprep.mubr.bf16.mxu0 %v4091_v30  ;;  %4935 = vmatprep.mubr.bf16.mxu1 %v4093_v31  ;;  %v7756_v15 = vld [vmem:[#allocation9 + $0x328] ss:$16 sps:$4 sm:$0xff]   ;;  %v7761_v17 = vld [vmem:[#allocation9 + $0x14c] ss:$16 sps:$4 sm:$0xff]  }
 0x349   :  { %4895 = vmatmul.mubr.bf16.vlgmr.msra.gmra.mrb[8].mxu0 %v8354_v16  ;;  %4936 = vmatmul.mubr.bf16.vlgmr.msra.gmra.mrb[8].mxu1 %v8356_v34  ;;  %v7764_v18 = vld [vmem:[#allocation9 + $0x34c] ss:$16 sps:$4 sm:$0xff]   ;;  %v7759_v19 = vld [vmem:[#allocation9 + $0x148] ss:$16 sps:$4 sm:$0xff]  }
 0x34a   :  { %4945 = vmatpush1.bf16.msra.mxu0 %v7699_v32  ;;  %4986 = vmatpush1.bf16.msra.mxu1 %v7702_v33  ;;  %v7762_v21 = vld [vmem:[#allocation9 + $0x348] ss:$16 sps:$4 sm:$0xff]   ;;  %v7767_v22 = vld [vmem:[#allocation9 + $0x16c] ss:$16 sps:$4 sm:$0xff]   ;;  %v403_v32 = vrot.slane %v8324_v54, %v8345_v60  ;;  %v411_v33 = vrot.slane %v8324_v54, %v8348_v61 }
 0x34b   :  { %4976 = vmatprep.mubr.bf16.mxu0 %v4091_v30  ;;  %5017 = vmatprep.mubr.bf16.mxu1 %v4093_v31  ;;  %v7770_v23 = vld [vmem:[#allocation9 + $0x36c] ss:$16 sps:$4 sm:$0xff]   ;;  %v7765_v24 = vld [vmem:[#allocation9 + $0x168] ss:$16 sps:$4 sm:$0xff]  }
 0x34c   :  { %4946 = vmatprep.subr.bf16.mxu0 %v7707_v35  ;;  %4987 = vmatprep.subr.bf16.mxu1 %v7710_v36  ;;  %v7768_v13 = vld [vmem:[#allocation9 + $0x368] ss:$16 sps:$4 sm:$0xff]   ;;  %v7773_v26 = vld [vmem:[#allocation9 + $0x18c] ss:$16 sps:$4 sm:$0xff]  }
 0x34d   :  { %v7776_v27 = vld [vmem:[#allocation9 + $0x38c] ss:$16 sps:$4 sm:$0xff]   ;;  %v7771_v28 = vld [vmem:[#allocation9 + $0x188] ss:$16 sps:$4 sm:$0xff]  }
 0x34e   :  { %4947 = vmatpush1.bf16.msra.mxu0 %v7705_v37  ;;  %4988 = vmatpush1.bf16.msra.mxu1 %v7708_v20  ;;  %v7774_v11 = vld [vmem:[#allocation9 + $0x388] ss:$16 sps:$4 sm:$0xff]   ;;  %v7779_v30 = vld [vmem:[#allocation9 + $0x1ac] ss:$16 sps:$4 sm:$0xff]  }
 0x34f   :  { %4948 = vmatprep.subr.bf16.mxu0 %v7713_v38  ;;  %4989 = vmatprep.subr.bf16.mxu1 %v7716_v39  ;;  %v7782_v31 = vld [vmem:[#allocation9 + $0x3ac] ss:$16 sps:$4 sm:$0xff]   ;;  %v7777_v35 = vld [vmem:[#allocation9 + $0x1a8] ss:$16 sps:$4 sm:$0xff]   ;;  %v6762_v38 = vadd.f32 %v8332_v1, %v403_v32  ;;  %v6764_v39 = vadd.f32 %v8334_v2, %v411_v33  ;;  %v7797_v1 = vld [vmem:[#allocation10 + $0x4] ss:$16 sps:$4 sm:$0xff]  }
 0x350   :  { %v7780_v36 = vld [vmem:[#allocation9 + $0x3a8] ss:$16 sps:$4 sm:$0xff]   ;;  %v7785_v37 = vld [vmem:[#allocation9 + $0x1cc] ss:$16 sps:$4 sm:$0xff]   ;;  %v7800_v2 = vld [vmem:[#allocation10 + $0x204] ss:$16 sps:$4 sm:$0xff]  }
 0x351   :  { %v7788_v20 = vld [vmem:[#allocation9 + $0x3cc] ss:$16 sps:$4 sm:$0xff]   ;;  %vm2025_vm4 = vcmp.ge.f32.partialorder %v6762_v38, 0.0  ;;  %vm2027_vm5 = vcmp.ge.f32.partialorder %v6764_v39, 0.0  ;;  %v7854_v32 = vld [vmem:[#allocation10 + $0x324] ss:$16 sps:$4 sm:$0xff]  }
 0x352   :  { %4949 = vmatpush1.bf16.msra.mxu0 %v7711_v40  ;;  %4990 = vmatpush1.bf16.msra.mxu1 %v7714_v41  ;;  %v7783_v40 = vld [vmem:[#allocation9 + $0x1c8] ss:$16 sps:$4 sm:$0xff]   ;;  %v7794_v54 = vld [vmem:[#allocation9 + $0x3ec] ss:$16 sps:$4 sm:$0xff]   ;;  %v7849_v33 = vld [vmem:[#allocation10 + $0x120] ss:$16 sps:$4 sm:$0xff]  }
 0x353   :  { %4950 = vmatprep.subr.bf16.mxu0 %v7719_v25  ;;  %4991 = vmatprep.subr.bf16.mxu1 %v7722_v42  ;;  %v7786_v41 = vld [vmem:[#allocation9 + $0x3c8] ss:$16 sps:$4 sm:$0xff]   ;;  %v7791_v25 = vld [vmem:[#allocation9 + $0x1ec] ss:$16 sps:$4 sm:$0xff]   ;;  %v2029_v42 = vmul.f32 0.01, %v6762_v38 }
 0x356   :  { %4951 = vmatpush1.bf16.msra.mxu0 %v7717_v43  ;;  %4992 = vmatpush1.bf16.msra.mxu1 %v7720_v44  ;;  %v2031_v43 = vmul.f32 0.01, %v6764_v39  ;;  %v7789_v44 = vld [vmem:[#allocation9 + $0x1e8] ss:$16 sps:$4 sm:$0xff]  }
 0x357   :  { %4952 = vmatprep.subr.bf16.mxu0 %v7725_v45  ;;  %4993 = vmatprep.subr.bf16.mxu1 %v7728_v47  ;;  %v7792_v45 = vld [vmem:[#allocation9 + $0x3e8] ss:$16 sps:$4 sm:$0xff]   ;;  %v2033_v47 = vsel %vm2025_vm4, %v6762_v38, %v2029_v42  ;;  %v7858_v38 = vld [vmem:[#allocation10 + $0x340] ss:$16 sps:$4 sm:$0xff]   ;;  %v7872_v42 = vld [vmem:[#allocation10 + $0x384] ss:$16 sps:$4 sm:$0xff]  }
 0x35a   :  { %4953 = vmatpush1.bf16.msra.mxu0 %v7723_v48  ;;  %4994 = vmatpush1.bf16.msra.mxu1 %v7726_v49  ;;  %v7795_v48 = vld [vmem:[#allocation10] ss:$16 sps:$4 sm:$0xff]   ;;  %v2035_v49 = vsel %vm2027_vm5, %v6764_v39, %v2031_v43  ;;  %v7863_v39 = vld [vmem:[#allocation10 + $0x164] ss:$16 sps:$4 sm:$0xff]  }
 0x35b   :  { %4954 = vmatprep.subr.bf16.mxu0 %v7731_v50  ;;  %4995 = vmatprep.subr.bf16.mxu1 %v7734_v52  ;;  %v7798_v50 = vld [vmem:[#allocation10 + $0x200] ss:$16 sps:$4 sm:$0xff]   ;;  %v8366_v52 = vpack.c.bf16 %v2033_v47, %v2033_v47  ;;  %v7878_v47 = vld [vmem:[#allocation10 + $0x3a4] ss:$16 sps:$4 sm:$0xff]  }
 0x35c   :  { %v7867_v43 = vld [vmem:[#allocation10 + $0x180] ss:$16 sps:$4 sm:$0xff]  }
 0x35e   :  { %4955 = vmatpush1.bf16.msra.mxu0 %v7729_v53  ;;  %4996 = vmatpush1.bf16.msra.mxu1 %v7732_v55  ;;  %v7803_v53 = vld [vmem:[#allocation10 + $0x24] ss:$16 sps:$4 sm:$0xff]  }
 0x35f   :  { %4956 = vmatprep.subr.bf16.mxu0 %v7737_v56  ;;  %4997 = vmatprep.subr.bf16.mxu1 %v7740_v57  ;;  %v7806_v55 = vld [vmem:[#allocation10 + $0x224] ss:$16 sps:$4 sm:$0xff]   ;;  %v8370_v56 = vpack.c.bf16 %v2035_v49, %v2035_v49  ;;  %v7801_v57 = vld [vmem:[#allocation10 + $0x20] ss:$16 sps:$4 sm:$0xff]  }
 0x360   :  { %v7876_v49 = vld [vmem:[#allocation10 + $0x3a0] ss:$16 sps:$4 sm:$0xff]  }
 0x362   :  { %4957 = vmatpush1.bf16.msra.mxu0 %v7735_v58  ;;  %4998 = vmatpush1.bf16.msra.mxu1 %v7738_v59  ;;  %v7804_v58 = vld [vmem:[#allocation10 + $0x220] ss:$16 sps:$4 sm:$0xff]   ;;  %v7809_v59 = vld [vmem:[#allocation10 + $0x44] ss:$16 sps:$4 sm:$0xff]  }
 0x363   :  { %4958 = vmatprep.subr.bf16.mxu0 %v7743_v63  ;;  %4999 = vmatprep.subr.bf16.mxu1 %v7746_v3  ;;  %v7812_v63 = vld [vmem:[#allocation10 + $0x244] ss:$16 sps:$4 sm:$0xff]   ;;  %v7807_v3 = vld [vmem:[#allocation10 + $0x40] ss:$16 sps:$4 sm:$0xff]  }
 0x366   :  { %4959 = vmatpush1.bf16.msra.mxu0 %v7741_v4  ;;  %5000 = vmatpush1.bf16.msra.mxu1 %v7744_v5  ;;  %v7818_v4 = vld [vmem:[#allocation10 + $0x264] ss:$16 sps:$4 sm:$0xff]   ;;  %v7813_v5 = vld [vmem:[#allocation10 + $0x60] ss:$16 sps:$4 sm:$0xff]  }
 0x367   :  { %4960 = vmatprep.subr.bf16.mxu0 %v7749_v6  ;;  %5001 = vmatprep.subr.bf16.mxu1 %v7752_v7  ;;  %v7816_v6 = vld [vmem:[#allocation10 + $0x260] ss:$16 sps:$4 sm:$0xff]   ;;  %v7821_v7 = vld [vmem:[#allocation10 + $0x84] ss:$16 sps:$4 sm:$0xff]  }
 0x36a   :  { %4961 = vmatpush1.bf16.msra.mxu0 %v7747_v8  ;;  %5002 = vmatpush1.bf16.msra.mxu1 %v7750_v9  ;;  %v7824_v8 = vld [vmem:[#allocation10 + $0x284] ss:$16 sps:$4 sm:$0xff]   ;;  %v7819_v9 = vld [vmem:[#allocation10 + $0x80] ss:$16 sps:$4 sm:$0xff]  }
 0x36b   :  { %4962 = vmatprep.subr.bf16.mxu0 %v7755_v10  ;;  %5003 = vmatprep.subr.bf16.mxu1 %v7758_v12  ;;  %v7822_v10 = vld [vmem:[#allocation10 + $0x280] ss:$16 sps:$4 sm:$0xff]   ;;  %v7827_v12 = vld [vmem:[#allocation10 + $0xa4] ss:$16 sps:$4 sm:$0xff]  }
 0x36e   :  { %4963 = vmatpush1.bf16.msra.mxu0 %v7753_v14  ;;  %5004 = vmatpush1.bf16.msra.mxu1 %v7756_v15  ;;  %v7830_v14 = vld [vmem:[#allocation10 + $0x2a4] ss:$16 sps:$4 sm:$0xff]   ;;  %v7825_v15 = vld [vmem:[#allocation10 + $0xa0] ss:$16 sps:$4 sm:$0xff]  }
 0x36f   :  { %4964 = vmatprep.subr.bf16.mxu0 %v7761_v17  ;;  %5005 = vmatprep.subr.bf16.mxu1 %v7764_v18  ;;  %v7828_v17 = vld [vmem:[#allocation10 + $0x2a0] ss:$16 sps:$4 sm:$0xff]   ;;  %v7833_v18 = vld [vmem:[#allocation10 + $0xc4] ss:$16 sps:$4 sm:$0xff]  }
 0x372   :  { %4965 = vmatpush1.bf16.msra.mxu0 %v7759_v19  ;;  %5006 = vmatpush1.bf16.msra.mxu1 %v7762_v21  ;;  %v7836_v19 = vld [vmem:[#allocation10 + $0x2c4] ss:$16 sps:$4 sm:$0xff]   ;;  %v7831_v21 = vld [vmem:[#allocation10 + $0xc0] ss:$16 sps:$4 sm:$0xff]  }
 0x373   :  { %4966 = vmatprep.subr.bf16.mxu0 %v7767_v22  ;;  %5007 = vmatprep.subr.bf16.mxu1 %v7770_v23  ;;  %v7834_v22 = vld [vmem:[#allocation10 + $0x2c0] ss:$16 sps:$4 sm:$0xff]   ;;  %v7839_v23 = vld [vmem:[#allocation10 + $0xe4] ss:$16 sps:$4 sm:$0xff]  }
 0x376   :  { %4967 = vmatpush1.bf16.msra.mxu0 %v7765_v24  ;;  %5008 = vmatpush1.bf16.msra.mxu1 %v7768_v13  ;;  %v7842_v24 = vld [vmem:[#allocation10 + $0x2e4] ss:$16 sps:$4 sm:$0xff]   ;;  %v7837_v13 = vld [vmem:[#allocation10 + $0xe0] ss:$16 sps:$4 sm:$0xff]  }
 0x377   :  { %4968 = vmatprep.subr.bf16.mxu0 %v7773_v26  ;;  %5009 = vmatprep.subr.bf16.mxu1 %v7776_v27  ;;  %v7840_v26 = vld [vmem:[#allocation10 + $0x2e0] ss:$16 sps:$4 sm:$0xff]   ;;  %v7845_v27 = vld [vmem:[#allocation10 + $0x104] ss:$16 sps:$4 sm:$0xff]  }
 0x37a   :  { %4969 = vmatpush1.bf16.msra.mxu0 %v7771_v28  ;;  %5010 = vmatpush1.bf16.msra.mxu1 %v7774_v11  ;;  %v7848_v28 = vld [vmem:[#allocation10 + $0x304] ss:$16 sps:$4 sm:$0xff]   ;;  %v7843_v11 = vld [vmem:[#allocation10 + $0x100] ss:$16 sps:$4 sm:$0xff]  }
 0x37b   :  { %4970 = vmatprep.subr.bf16.mxu0 %v7779_v30  ;;  %5011 = vmatprep.subr.bf16.mxu1 %v7782_v31  ;;  %v7846_v30 = vld [vmem:[#allocation10 + $0x300] ss:$16 sps:$4 sm:$0xff]   ;;  %v7851_v31 = vld [vmem:[#allocation10 + $0x124] ss:$16 sps:$4 sm:$0xff]  }
 0x37e   :  { %4971 = vmatpush1.bf16.msra.mxu0 %v7777_v35  ;;  %5012 = vmatpush1.bf16.msra.mxu1 %v7780_v36  ;;  %v7852_v35 = vld [vmem:[#allocation10 + $0x320] ss:$16 sps:$4 sm:$0xff]   ;;  %v7857_v36 = vld [vmem:[#allocation10 + $0x144] ss:$16 sps:$4 sm:$0xff]  }
 0x37f   :  { %4972 = vmatprep.subr.bf16.mxu0 %v7785_v37  ;;  %5013 = vmatprep.subr.bf16.mxu1 %v7788_v20  ;;  %v7860_v37 = vld [vmem:[#allocation10 + $0x344] ss:$16 sps:$4 sm:$0xff]   ;;  %v7855_v20 = vld [vmem:[#allocation10 + $0x140] ss:$16 sps:$4 sm:$0xff]  }
 0x382   :  { %4973 = vmatpush1.bf16.msra.mxu0 %v7783_v40  ;;  %5014 = vmatpush1.bf16.msra.mxu1 %v7786_v41  ;;  %v7866_v40 = vld [vmem:[#allocation10 + $0x364] ss:$16 sps:$4 sm:$0xff]   ;;  %v7861_v41 = vld [vmem:[#allocation10 + $0x160] ss:$16 sps:$4 sm:$0xff]  }
 0x383   :  { %4974 = vmatprep.subr.bf16.mxu0 %v7791_v25  ;;  %5015 = vmatprep.subr.bf16.mxu1 %v7794_v54  ;;  %v7864_v25 = vld [vmem:[#allocation10 + $0x360] ss:$16 sps:$4 sm:$0xff]   ;;  %v7869_v54 = vld [vmem:[#allocation10 + $0x184] ss:$16 sps:$4 sm:$0xff]  }
 0x386   :  { %4975 = vmatpush1.bf16.msra.mxu0 %v7789_v44  ;;  %5016 = vmatpush1.bf16.msra.mxu1 %v7792_v45  ;;  %v7870_v44 = vld [vmem:[#allocation10 + $0x380] ss:$16 sps:$4 sm:$0xff]   ;;  %v7875_v45 = vld [vmem:[#allocation10 + $0x1a4] ss:$16 sps:$4 sm:$0xff]  }
 0x387   :  { %5666 = vmatprep.subr.bf16.mxu0 %v7797_v1  ;;  %5707 = vmatprep.subr.bf16.mxu1 %v7800_v2  ;;  %v7987_v1 = vld [vmem:[%s8411_s5] sm:$0xf] }
 0x388   :  { %v399_v2 = vrot.slane %v7987_v1, %v8342_v29  ;;  %v7948_v1 = vld [vmem:[#allocation10 + $0x328] ss:$16 sps:$4 sm:$0xff]  }
 0x389   :  { %4977 = vmatmul.mubr.bf16.vlgmr.msra.gmra.mrb[12].mxu0 %v8354_v16  ;;  %5018 = vmatmul.mubr.bf16.vlgmr.msra.gmra.mrb[12].mxu1 %v8356_v34  ;;  %v7810_v16 = vld [vmem:[#allocation10 + $0x240] ss:$16 sps:$4 sm:$0xff]   ;;  %v7815_v34 = vld [vmem:[#allocation10 + $0x64] ss:$16 sps:$4 sm:$0xff]  }
 0x38a   :  { %5667 = vmatpush1.bf16.msra.mxu0 %v7795_v48  ;;  %5698 = vmatprep.mubr.bf16.mxu0 %v8366_v52  ;;  %v7873_v48 = vld [vmem:[#allocation10 + $0x1a0] ss:$16 sps:$4 sm:$0xff]  }
 0x38b   :  { %5708 = vmatpush1.bf16.msra.mxu1 %v7798_v50  ;;  %5739 = vmatprep.mubr.bf16.mxu1 %v8370_v56  ;;  %v7881_v50 = vld [vmem:[#allocation10 + $0x1c4] ss:$16 sps:$4 sm:$0xff]  }
 0x38c   :  { %5668 = vmatprep.subr.bf16.mxu0 %v7803_v53  ;;  %5709 = vmatprep.subr.bf16.mxu1 %v7806_v55  ;;  %v6761_v53 = vadd.f32 %v8328_v62, %v399_v2  ;;  %v7884_v55 = vld [vmem:[#allocation10 + $0x3c4] ss:$16 sps:$4 sm:$0xff]   ;;  %v7888_v62 = vld [vmem:[#allocation10 + $0x3e0] ss:$16 sps:$4 sm:$0xff]   ;;  %v7953_v2 = vld [vmem:[#allocation10 + $0x14c] ss:$16 sps:$4 sm:$0xff]  }
 0x38e   :  { %5669 = vmatpush1.bf16.msra.mxu0 %v7801_v57  ;;  %v7879_v57 = vld [vmem:[#allocation10 + $0x1c0] ss:$16 sps:$4 sm:$0xff]   ;;  %vm2024_vm6 = vcmp.ge.f32.partialorder %v6761_v53, 0.0 }
 0x38f   :  { %5710 = vmatpush1.bf16.msra.mxu1 %v7804_v58  ;;  %5670 = vmatprep.subr.bf16.mxu0 %v7809_v59  ;;  %v7882_v58 = vld [vmem:[#allocation10 + $0x3c0] ss:$16 sps:$4 sm:$0xff]   ;;  %v7887_v59 = vld [vmem:[#allocation10 + $0x1e4] ss:$16 sps:$4 sm:$0xff]  }
 0x390   :  { %5711 = vmatprep.subr.bf16.mxu1 %v7812_v63  ;;  %v2028_v63 = vmul.f32 0.01, %v6761_v53 }
 0x392   :  { %5671 = vmatpush1.bf16.msra.mxu0 %v7807_v3  ;;  %v7890_v3 = vld [vmem:[#allocation10 + $0x3e4] ss:$16 sps:$4 sm:$0xff]  }
 0x393   :  { %5712 = vmatpush1.bf16.msra.mxu1 %v7810_v16  ;;  %5672 = vmatprep.subr.bf16.mxu0 %v7815_v34  ;;  %v2030_v16 = vmul.f32 0.01, %v8330_v0  ;;  %v7885_v34 = vld [vmem:[#allocation10 + $0x1e0] ss:$16 sps:$4 sm:$0xff]  }
 0x394   :  { %5713 = vmatprep.subr.bf16.mxu1 %v7818_v4  ;;  %v7893_v4 = vld [vmem:[#allocation10 + $0xc] ss:$16 sps:$4 sm:$0xff]  }
 0x396   :  { %5673 = vmatpush1.bf16.msra.mxu0 %v7813_v5  ;;  %v2032_v5 = vsel %vm2024_vm6, %v6761_v53, %v2028_v63  ;;  %v7962_v53 = vld [vmem:[#allocation10 + $0x36c] ss:$16 sps:$4 sm:$0xff]   ;;  %v7963_v63 = vld [vmem:[#allocation10 + $0x188] ss:$16 sps:$4 sm:$0xff]  }
 0x397   :  { %5714 = vmatpush1.bf16.msra.mxu1 %v7816_v6  ;;  %5674 = vmatprep.subr.bf16.mxu0 %v7821_v7  ;;  %v7896_v6 = vld [vmem:[#allocation10 + $0x20c] ss:$16 sps:$4 sm:$0xff]   ;;  %v2034_v7 = vsel %vm2026_vm7, %v8330_v0, %v2030_v16  ;;  %v7900_v0 = vld [vmem:[#allocation10 + $0x228] ss:$16 sps:$4 sm:$0xff]  }
 0x398   :  { %5715 = vmatprep.subr.bf16.mxu1 %v7824_v8  ;;  %v7891_v8 = vld [vmem:[#allocation10 + $0x8] ss:$16 sps:$4 sm:$0xff]   ;;  %v7971_v16 = vld [vmem:[#allocation10 + $0x1ac] ss:$16 sps:$4 sm:$0xff]  }
 0x39a   :  { %5675 = vmatpush1.bf16.msra.mxu0 %v7819_v9  ;;  %v8382_v9 = vpack.c.bf16 %v2032_v5, %v2032_v5  ;;  %v7977_v5 = vld [vmem:[#allocation10 + $0x1cc] ss:$16 sps:$4 sm:$0xff]  }
 0x39b   :  { %5716 = vmatpush1.bf16.msra.mxu1 %v7822_v10  ;;  %5676 = vmatprep.subr.bf16.mxu0 %v7827_v12  ;;  %v7894_v10 = vld [vmem:[#allocation10 + $0x208] ss:$16 sps:$4 sm:$0xff]   ;;  %v8384_v12 = vpack.c.bf16 %v2034_v7, %v2034_v7 }
 0x39c   :  { %5717 = vmatprep.subr.bf16.mxu1 %v7830_v14  ;;  %v7899_v14 = vld [vmem:[#allocation10 + $0x2c] ss:$16 sps:$4 sm:$0xff]   ;;  %v7975_v7 = vld [vmem:[#allocation10 + $0x1c8] ss:$16 sps:$4 sm:$0xff]  }
 0x39e   :  { %5677 = vmatpush1.bf16.msra.mxu0 %v7825_v15  ;;  %v7902_v15 = vld [vmem:[#allocation10 + $0x22c] ss:$16 sps:$4 sm:$0xff]  }
 0x39f   :  { %5718 = vmatpush1.bf16.msra.mxu1 %v7828_v17  ;;  %5678 = vmatprep.subr.bf16.mxu0 %v7833_v18  ;;  %v7897_v17 = vld [vmem:[#allocation10 + $0x28] ss:$16 sps:$4 sm:$0xff]   ;;  %v7905_v18 = vld [vmem:[#allocation10 + $0x4c] ss:$16 sps:$4 sm:$0xff]  }
 0x3a0   :  { %5719 = vmatprep.subr.bf16.mxu1 %v7836_v19  ;;  %v7908_v19 = vld [vmem:[#allocation10 + $0x24c] ss:$16 sps:$4 sm:$0xff]  }
 0x3a2   :  { %5679 = vmatpush1.bf16.msra.mxu0 %v7831_v21  ;;  %v7903_v21 = vld [vmem:[#allocation10 + $0x48] ss:$16 sps:$4 sm:$0xff]  }
 0x3a3   :  { %5720 = vmatpush1.bf16.msra.mxu1 %v7834_v22  ;;  %5680 = vmatprep.subr.bf16.mxu0 %v7839_v23  ;;  %v7906_v22 = vld [vmem:[#allocation10 + $0x248] ss:$16 sps:$4 sm:$0xff]   ;;  %v7911_v23 = vld [vmem:[#allocation10 + $0x6c] ss:$16 sps:$4 sm:$0xff]  }
 0x3a4   :  { %5721 = vmatprep.subr.bf16.mxu1 %v7842_v24  ;;  %v7914_v24 = vld [vmem:[#allocation10 + $0x26c] ss:$16 sps:$4 sm:$0xff]  }
 0x3a6   :  { %5681 = vmatpush1.bf16.msra.mxu0 %v7837_v13  ;;  %v7909_v13 = vld [vmem:[#allocation10 + $0x68] ss:$16 sps:$4 sm:$0xff]  }
 0x3a7   :  { %5722 = vmatpush1.bf16.msra.mxu1 %v7840_v26  ;;  %5682 = vmatprep.subr.bf16.mxu0 %v7845_v27  ;;  %v7917_v26 = vld [vmem:[#allocation10 + $0x8c] ss:$16 sps:$4 sm:$0xff]  }
 0x3a8   :  { %5723 = vmatprep.subr.bf16.mxu1 %v7848_v28  ;;  %v7920_v27 = vld [vmem:[#allocation10 + $0x28c] ss:$16 sps:$4 sm:$0xff]   ;;  %v7918_v28 = vld [vmem:[#allocation10 + $0x288] ss:$16 sps:$4 sm:$0xff]  }
 0x3aa   :  { %5683 = vmatpush1.bf16.msra.mxu0 %v7843_v11  ;;  %v7923_v11 = vld [vmem:[#allocation10 + $0xac] ss:$16 sps:$4 sm:$0xff]  }
 0x3ab   :  { %5724 = vmatpush1.bf16.msra.mxu1 %v7846_v30  ;;  %5684 = vmatprep.subr.bf16.mxu0 %v7851_v31  ;;  %v7926_v30 = vld [vmem:[#allocation10 + $0x2ac] ss:$16 sps:$4 sm:$0xff]   ;;  %v7921_v31 = vld [vmem:[#allocation10 + $0xa8] ss:$16 sps:$4 sm:$0xff]  }
 0x3ac   :  { %5725 = vmatprep.subr.bf16.mxu1 %v7854_v32  ;;  %v7924_v32 = vld [vmem:[#allocation10 + $0x2a8] ss:$16 sps:$4 sm:$0xff]  }
 0x3ae   :  { %5685 = vmatpush1.bf16.msra.mxu0 %v7849_v33  ;;  %v7929_v33 = vld [vmem:[#allocation10 + $0xcc] ss:$16 sps:$4 sm:$0xff]  }
 0x3af   :  { %5726 = vmatpush1.bf16.msra.mxu1 %v7852_v35  ;;  %5686 = vmatprep.subr.bf16.mxu0 %v7857_v36  ;;  %v7932_v35 = vld [vmem:[#allocation10 + $0x2cc] ss:$16 sps:$4 sm:$0xff]   ;;  %v7927_v36 = vld [vmem:[#allocation10 + $0xc8] ss:$16 sps:$4 sm:$0xff]  }
 0x3b0   :  { %5727 = vmatprep.subr.bf16.mxu1 %v7860_v37  ;;  %v7930_v37 = vld [vmem:[#allocation10 + $0x2c8] ss:$16 sps:$4 sm:$0xff]  }
 0x3b2   :  { %5687 = vmatpush1.bf16.msra.mxu0 %v7855_v20  ;;  %v7935_v20 = vld [vmem:[#allocation10 + $0xec] ss:$16 sps:$4 sm:$0xff]  }
 0x3b3   :  { %5728 = vmatpush1.bf16.msra.mxu1 %v7858_v38  ;;  %5688 = vmatprep.subr.bf16.mxu0 %v7863_v39  ;;  %v7938_v38 = vld [vmem:[#allocation10 + $0x2ec] ss:$16 sps:$4 sm:$0xff]   ;;  %v7933_v39 = vld [vmem:[#allocation10 + $0xe8] ss:$16 sps:$4 sm:$0xff]  }
 0x3b4   :  { %5729 = vmatprep.subr.bf16.mxu1 %v7866_v40  ;;  %v7936_v40 = vld [vmem:[#allocation10 + $0x2e8] ss:$16 sps:$4 sm:$0xff]  }
 0x3b6   :  { %5689 = vmatpush1.bf16.msra.mxu0 %v7861_v41  ;;  %v7941_v41 = vld [vmem:[#allocation10 + $0x10c] ss:$16 sps:$4 sm:$0xff]  }
 0x3b7   :  { %5730 = vmatpush1.bf16.msra.mxu1 %v7864_v25  ;;  %5690 = vmatprep.subr.bf16.mxu0 %v7869_v54  ;;  %v7944_v25 = vld [vmem:[#allocation10 + $0x30c] ss:$16 sps:$4 sm:$0xff]   ;;  %v7939_v54 = vld [vmem:[#allocation10 + $0x108] ss:$16 sps:$4 sm:$0xff]  }
 0x3b8   :  { %5731 = vmatprep.subr.bf16.mxu1 %v7872_v42  ;;  %v7942_v42 = vld [vmem:[#allocation10 + $0x308] ss:$16 sps:$4 sm:$0xff]  }
 0x3ba   :  { %5691 = vmatpush1.bf16.msra.mxu0 %v7867_v43  ;;  %v7947_v43 = vld [vmem:[#allocation10 + $0x12c] ss:$16 sps:$4 sm:$0xff]  }
 0x3bb   :  { %5732 = vmatpush1.bf16.msra.mxu1 %v7870_v44  ;;  %5692 = vmatprep.subr.bf16.mxu0 %v7875_v45  ;;  %v7950_v44 = vld [vmem:[#allocation10 + $0x32c] ss:$16 sps:$4 sm:$0xff]   ;;  %v7945_v45 = vld [vmem:[#allocation10 + $0x128] ss:$16 sps:$4 sm:$0xff]  }
 0x3bc   :  { %5733 = vmatprep.subr.bf16.mxu1 %v7878_v47  ;;  %v7956_v47 = vld [vmem:[#allocation10 + $0x34c] ss:$16 sps:$4 sm:$0xff]  }
 0x3be   :  { %5693 = vmatpush1.bf16.msra.mxu0 %v7873_v48  ;;  %v7951_v48 = vld [vmem:[#allocation10 + $0x148] ss:$16 sps:$4 sm:$0xff]  }
 0x3bf   :  { %5734 = vmatpush1.bf16.msra.mxu1 %v7876_v49  ;;  %5694 = vmatprep.subr.bf16.mxu0 %v7881_v50  ;;  %v7954_v49 = vld [vmem:[#allocation10 + $0x348] ss:$16 sps:$4 sm:$0xff]   ;;  %v7959_v50 = vld [vmem:[#allocation10 + $0x16c] ss:$16 sps:$4 sm:$0xff]  }
 0x3c0   :  { %5735 = vmatprep.subr.bf16.mxu1 %v7884_v55  ;;  %v7957_v55 = vld [vmem:[#allocation10 + $0x168] ss:$16 sps:$4 sm:$0xff]  }
 0x3c2   :  { %5695 = vmatpush1.bf16.msra.mxu0 %v7879_v57  ;;  %v7960_v57 = vld [vmem:[#allocation10 + $0x368] ss:$16 sps:$4 sm:$0xff]  }
 0x3c3   :  { %5736 = vmatpush1.bf16.msra.mxu1 %v7882_v58  ;;  %5696 = vmatprep.subr.bf16.mxu0 %v7887_v59  ;;  %v7965_v58 = vld [vmem:[#allocation10 + $0x18c] ss:$16 sps:$4 sm:$0xff]  }
 0x3c4   :  { %5737 = vmatprep.subr.bf16.mxu1 %v7890_v3  ;;  %v7968_v59 = vld [vmem:[#allocation10 + $0x38c] ss:$16 sps:$4 sm:$0xff]   ;;  %v7966_v3 = vld [vmem:[#allocation10 + $0x388] ss:$16 sps:$4 sm:$0xff]  }
 0x3c6   :  { %5697 = vmatpush1.bf16.msra.mxu0 %v7885_v34  ;;  %v7974_v34 = vld [vmem:[#allocation10 + $0x3ac] ss:$16 sps:$4 sm:$0xff]  }
 0x3c7   :  { %5738 = vmatpush1.bf16.msra.mxu1 %v7888_v62  ;;  %5748 = vmatprep.subr.bf16.mxu0 %v7893_v4  ;;  %v7969_v62 = vld [vmem:[#allocation10 + $0x1a8] ss:$16 sps:$4 sm:$0xff]  }
 0x3c8   :  { %5789 = vmatprep.subr.bf16.mxu1 %v7896_v6  ;;  %v7972_v4 = vld [vmem:[#allocation10 + $0x3a8] ss:$16 sps:$4 sm:$0xff]   ;;  %v7980_v6 = vld [vmem:[#allocation10 + $0x3cc] ss:$16 sps:$4 sm:$0xff]  }
 0x3c9   :  { %5699 = vmatmul.mubr.bf16.vlgmr.msra.gmra.mrb[16].mxu0 %v8382_v9 }
 0x3ca   :  { %5740 = vmatmul.mubr.bf16.vlgmr.msra.gmra.mrb[16].mxu1 %v8384_v12  ;;  %5749 = vmatpush1.bf16.msra.mxu0 %v7891_v8  ;;  %v7978_v8 = vld [vmem:[#allocation10 + $0x3c8] ss:$16 sps:$4 sm:$0xff]  }
 0x3cb   :  { %5780 = vmatprep.mubr.bf16.mxu0 %v8366_v52  ;;  %5790 = vmatpush1.bf16.msra.mxu1 %v7894_v10  ;;  %v7912_v52 = vld [vmem:[#allocation10 + $0x268] ss:$16 sps:$4 sm:$0xff]   ;;  %v7983_v10 = vld [vmem:[#allocation10 + $0x1ec] ss:$16 sps:$4 sm:$0xff]  }
 0x3cc   :  { %5821 = vmatprep.mubr.bf16.mxu1 %v8370_v56  ;;  %5750 = vmatprep.subr.bf16.mxu0 %v7899_v14  ;;  %v7915_v56 = vld [vmem:[#allocation10 + $0x88] ss:$16 sps:$4 sm:$0xff]   ;;  %v7986_v14 = vld [vmem:[#allocation10 + $0x3ec] ss:$16 sps:$4 sm:$0xff]  }
 0x3cd   :  { %5791 = vmatprep.subr.bf16.mxu1 %v7902_v15  ;;  %v7981_v15 = vld [vmem:[#allocation10 + $0x1e8] ss:$16 sps:$4 sm:$0xff]  }
 0x3ce   :  { %5751 = vmatpush1.bf16.msra.mxu0 %v7897_v17  ;;  %v7984_v17 = vld [vmem:[#allocation10 + $0x3e8] ss:$16 sps:$4 sm:$0xff]  }
 0x3cf   :  { %5792 = vmatpush1.bf16.msra.mxu1 %v7900_v0  ;;  %5752 = vmatprep.subr.bf16.mxu0 %v7905_v18 }
 0x3d0   :  { %5793 = vmatprep.subr.bf16.mxu1 %v7908_v19 }
 0x3d2   :  { %5753 = vmatpush1.bf16.msra.mxu0 %v7903_v21 }
 0x3d3   :  { %5794 = vmatpush1.bf16.msra.mxu1 %v7906_v22  ;;  %5754 = vmatprep.subr.bf16.mxu0 %v7911_v23 }
 0x3d4   :  { %5795 = vmatprep.subr.bf16.mxu1 %v7914_v24 }
 0x3d6   :  { %5755 = vmatpush1.bf16.msra.mxu0 %v7909_v13 }
 0x3d7   :  { %5796 = vmatpush1.bf16.msra.mxu1 %v7912_v52  ;;  %5756 = vmatprep.subr.bf16.mxu0 %v7917_v26 }
 0x3d8   :  { %5797 = vmatprep.subr.bf16.mxu1 %v7920_v27 }
 0x3da   :  { %5757 = vmatpush1.bf16.msra.mxu0 %v7915_v56 }
 0x3db   :  { %5798 = vmatpush1.bf16.msra.mxu1 %v7918_v28  ;;  %5758 = vmatprep.subr.bf16.mxu0 %v7923_v11 }
 0x3dc   :  { %5799 = vmatprep.subr.bf16.mxu1 %v7926_v30 }
 0x3de   :  { %5759 = vmatpush1.bf16.msra.mxu0 %v7921_v31 }
 0x3df   :  { %5800 = vmatpush1.bf16.msra.mxu1 %v7924_v32  ;;  %5760 = vmatprep.subr.bf16.mxu0 %v7929_v33 }
 0x3e0   :  { %5801 = vmatprep.subr.bf16.mxu1 %v7932_v35  ;;  %v8136_v35 = vmov 1966171168  }
 0x3e2   :  { %5761 = vmatpush1.bf16.msra.mxu0 %v7927_v36  ;;  %v5883_v36 = vunpack.c.l.s4 %v8136_v35 }
 0x3e3   :  { %5802 = vmatpush1.bf16.msra.mxu1 %v7930_v37  ;;  %5762 = vmatprep.subr.bf16.mxu0 %v7935_v20  ;;  %v6760_v20 = vld.sshfl [vmem:[%s8415_s9] sm:$0x33 pattern:$0x75316420] }
 0x3e4   :  { %5803 = vmatprep.subr.bf16.mxu1 %v7938_v38  ;;  %v5884_v37 = vunpack.c.0.s8 %v5883_v36  ;;  %v5881_v38 = vcombine.high %v6760_v20, %v6760_v20 }
 0x3e6   :  { %5763 = vmatpush1.bf16.msra.mxu0 %v7933_v39  ;;  %v5887_v39 = vsub.s32 %v5884_v37, %v8316_v46 }
 0x3e7   :  { %5804 = vmatpush1.bf16.msra.mxu1 %v7936_v40  ;;  %5764 = vmatprep.subr.bf16.mxu0 %v7941_v41 }
 0x3e8   :  { %5805 = vmatprep.subr.bf16.mxu1 %v7944_v25  ;;  %v5895_v40 = vrot.slane %v5881_v38, %v5887_v39  ;;  %v5888_v41 = vrot.slane %v6760_v20, %v5887_v39 }
 0x3ea   :  { %5765 = vmatpush1.bf16.msra.mxu0 %v7939_v54  ;;  %v5897_v25 = vcombine.high %v5895_v40, %v5895_v40  ;;  %v5830_v54 = vld [vmem:[%s8414_s8] sm:$0xf] }
 0x3eb   :  { %5806 = vmatpush1.bf16.msra.mxu1 %v7942_v42  ;;  %5766 = vmatprep.subr.bf16.mxu0 %v7947_v43 }
 0x3ec   :  { %5807 = vmatprep.subr.bf16.mxu1 %v7950_v44 }
 0x3ee   :  { %5767 = vmatpush1.bf16.msra.mxu0 %v7945_v45  ;;  %v5835_v45 = vrot.slane %v5830_v54, %v8342_v29 }
 0x3ef   :  { %5808 = vmatpush1.bf16.msra.mxu1 %v7948_v1  ;;  %5768 = vmatprep.subr.bf16.mxu0 %v7953_v2 }
 0x3f0   :  { %5809 = vmatprep.subr.bf16.mxu1 %v7956_v47 }
 0x3f2   :  { %5769 = vmatpush1.bf16.msra.mxu0 %v7951_v48  ;;  %v5839_v48 = vrot.slane %v5830_v54, %v8345_v60 }
 0x3f3   :  { %5810 = vmatpush1.bf16.msra.mxu1 %v7954_v49  ;;  %5770 = vmatprep.subr.bf16.mxu0 %v7959_v50 }
 0x3f4   :  { %5811 = vmatprep.subr.bf16.mxu1 %v7962_v53 }
 0x3f6   :  { %5771 = vmatpush1.bf16.msra.mxu0 %v7957_v55 }
 0x3f7   :  { %5812 = vmatpush1.bf16.msra.mxu1 %v7960_v57  ;;  %5772 = vmatprep.subr.bf16.mxu0 %v7965_v58 }
 0x3f8   :  { %5813 = vmatprep.subr.bf16.mxu1 %v7968_v59 }
 0x3fa   :  { %5773 = vmatpush1.bf16.msra.mxu0 %v7963_v63 }
 0x3fb   :  { %5814 = vmatpush1.bf16.msra.mxu1 %v7966_v3  ;;  %5774 = vmatprep.subr.bf16.mxu0 %v7971_v16 }
 0x3fc   :  { %5815 = vmatprep.subr.bf16.mxu1 %v7974_v34 }
 0x3fe   :  { %5775 = vmatpush1.bf16.msra.mxu0 %v7969_v62 }
 0x3ff   :  { %5816 = vmatpush1.bf16.msra.mxu1 %v7972_v4  ;;  %5776 = vmatprep.subr.bf16.mxu0 %v7977_v5 }
 0x400   :  { %5817 = vmatprep.subr.bf16.mxu1 %v7980_v6  ;;  %v5843_v6 = vrot.slane %v5830_v54, %v8319_v51 }
 0x402   :  { %5777 = vmatpush1.bf16.msra.mxu0 %v7975_v7 }
 0x403   :  { %5818 = vmatpush1.bf16.msra.mxu1 %v7978_v8  ;;  %5778 = vmatprep.subr.bf16.mxu0 %v7983_v10 }
 0x404   :  { %5819 = vmatprep.subr.bf16.mxu1 %v7986_v14  ;;  %v5847_v14 = vrot.slane %v5830_v54, %v8348_v61 }
 0x406   :  { %5779 = vmatpush1.bf16.msra.mxu0 %v7981_v15 }
 0x407   :  { %5820 = vmatpush1.bf16.msra.mxu1 %v7984_v17 }
 0x409   :  { %5781 = vmatmul.mubr.bf16.vlgmr.msra.gmra.mrb[20].mxu0 %v8382_v9 }
 0x40a   :  { %5822 = vmatmul.mubr.bf16.vlgmr.msra.gmra.mrb[20].mxu1 %v8384_v12  ;;  %5974 = vmatprep.mubr.bf16.mxu0 %v5897_v25 }
 0x40b   :  { %5934 = vmatprep.mubr.bf16.mxu1 %v5895_v40 }
 0x41c   :  { %v4896_v0 = vpop.f32.mrb[8].mxu0  ;;  %v4937_v18 = vpop.f32.mrb[8].mxu1 }
 0x41d   :  { %v4938_v19 = vadd.f32 %v4937_v18, %v4896_v0  ;;  %v4898_v21 = vpop.f32.mrb[9].mxu0  ;;  %v4939_v22 = vpop.f32.mrb[9].mxu1 }
 0x41e   :  { %v4940_v23 = vadd.f32 %v4939_v22, %v4898_v21  ;;  %v4900_v24 = vpop.f32.mrb[10].mxu0  ;;  %v4941_v13 = vpop.f32.mrb[10].mxu1 }
 0x41f   :  { %v4901_v52 = vpop.f32.mrb[11].mxu0  ;;  %v4942_v26 = vpop.f32.mrb[11].mxu1 }
 0x45c   :  { %v4978_v27 = vpop.f32.mrb[12].mxu0  ;;  %v5019_v56 = vpop.f32.mrb[12].mxu1 }
 0x45d   :  { %v5020_v28 = vadd.f32 %v5019_v56, %v4978_v27  ;;  %v4980_v11 = vpop.f32.mrb[13].mxu0  ;;  %v5021_v30 = vpop.f32.mrb[13].mxu1  ;;  %v5896_v56 = vcombine.high %v5888_v41, %v5888_v41 }
 0x45e   :  { %v5022_v31 = vadd.f32 %v5021_v30, %v4980_v11  ;;  %v4982_v32 = vpop.f32.mrb[14].mxu0  ;;  %v5023_v9 = vpop.f32.mrb[14].mxu1 }
 0x45f   :  { %v4983_v33 = vpop.f32.mrb[15].mxu0  ;;  %v5024_v12 = vpop.f32.mrb[15].mxu1 }
 0x49c   :  { %v5700_v42 = vpop.f32.mrb[16].mxu0 }
 0x49d   :  { %v5701_v43 = vadd.f32 %v5700_v42, %v4938_v19  ;;  %v5741_v44 = vpop.f32.mrb[16].mxu1  ;;  %v5702_v1 = vpop.f32.mrb[17].mxu0 }
 0x49e   :  { %v5703_v2 = vadd.f32 %v5702_v1, %v4940_v23  ;;  %v5743_v47 = vpop.f32.mrb[17].mxu1  ;;  %v5704_v46 = vpop.f32.mrb[18].mxu0 }
 0x49f   :  { %v5742_v49 = vadd.f32 %v5741_v44, %v5701_v43  ;;  %v5745_v50 = vpop.f32.mrb[18].mxu1  ;;  %v5705_v53 = vpop.f32.mrb[19].mxu0 }
 0x4a0   :  { %v5744_v55 = vadd.f32 %v5743_v47, %v5703_v2  ;;  %v5746_v57 = vpop.f32.mrb[19].mxu1 }
 0x4a1   :  { %v5852_v58 = vadd.f32 %v5835_v45, %v5742_v49 }
 0x4a2   :  { %v5853_v59 = vadd.f32 %v5839_v48, %v5744_v55 }
 0x4a3   :  { %vm5856_vm8 = vcmp.ge.f32.partialorder %v5852_v58, 0.0  ;;  %v5860_v63 = vmul.f32 0.01, %v5852_v58 }
 0x4a4   :  { %v5861_v3 = vmul.f32 0.01, %v5853_v59  ;;  %vm5857_vm9 = vcmp.ge.f32.partialorder %v5853_v59, 0.0 }
 0x4a5   :  { %v5864_v16 = vsel %vm5856_vm8, %v5852_v58, %v5860_v63 }
 0x4a6   :  { %v5865_v34 = vsel %vm5857_vm9, %v5853_v59, %v5861_v3  ;;  %v5869_v62 = vpack.c.bf16 %v5864_v16, %v5864_v16 }
 0x4a7   :  { %v5870_v29 = vpack.c.bf16 %v5865_v34, %v5865_v34 }
 0x4a9   :  { %5902 = vmatprep.subr.bf16.mxu1 %v5870_v29 }
 0x4aa   :  { %5903 = vmatpush1.bf16.xpose.msra.mxu1 %v5869_v62 }
 0x4b1   :  { %5935 = vmatmul.mubr.bf16.vlgmr.msra.gmra.mrb[24].mxu1 %v5888_v41 }
 0x4dc   :  { %v5782_v60 = vpop.f32.mrb[20].mxu0 }
 0x4dd   :  { %v5783_v4 = vadd.f32 %v5782_v60, %v5020_v28  ;;  %v5823_v5 = vpop.f32.mrb[20].mxu1  ;;  %v5784_v7 = vpop.f32.mrb[21].mxu0 }
 0x4de   :  { %v5785_v8 = vadd.f32 %v5784_v7, %v5022_v31  ;;  %v5825_v10 = vpop.f32.mrb[21].mxu1  ;;  %v5786_v15 = vpop.f32.mrb[22].mxu0 }
 0x4df   :  { %v5824_v17 = vadd.f32 %v5823_v5, %v5783_v4  ;;  %v5827_v0 = vpop.f32.mrb[22].mxu1  ;;  %v5787_v18 = vpop.f32.mrb[23].mxu0 }
 0x4e0   :  { %v5826_v19 = vadd.f32 %v5825_v10, %v5785_v8  ;;  %v5828_v21 = vpop.f32.mrb[23].mxu1 }
 0x4e1   :  { %v5854_v22 = vadd.f32 %v5843_v6, %v5824_v17 }
 0x4e2   :  { %v5855_v23 = vadd.f32 %v5847_v14, %v5826_v19 }
 0x4e3   :  { %vm5858_vm10 = vcmp.ge.f32.partialorder %v5854_v22, 0.0  ;;  %v5862_v24 = vmul.f32 0.01, %v5854_v22 }
 0x4e4   :  { %v5863_v13 = vmul.f32 0.01, %v5855_v23  ;;  %vm5859_vm11 = vcmp.ge.f32.partialorder %v5855_v23, 0.0 }
 0x4e5   :  { %v5866_v52 = vsel %vm5858_vm10, %v5854_v22, %v5862_v24 }
 0x4e6   :  { %v5867_v26 = vsel %vm5859_vm11, %v5855_v23, %v5863_v13  ;;  %v5871_v27 = vpack.c.bf16 %v5866_v52, %v5866_v52 }
 0x4e7   :  { %v5872_v51 = vpack.c.bf16 %v5867_v26, %v5867_v26 }
 0x4e9   :  { %5942 = vmatprep.subr.bf16.mxu0 %v5872_v51 }
 0x4ea   :  { %5943 = vmatpush1.bf16.xpose.msra.mxu0 %v5871_v27 }
 0x4f1   :  { %5975 = vmatmul.mubr.bf16.vlgmr.msra.gmra.mrb[24].mxu0 %v5896_v56 }
 0x584   :  { %v5936_v61 = vpop.f32.mrb[24].mxu1 }
 0x585   :  { %v5938_v28 = vpop.f32.mrb[25].mxu1 }
 0x586   :  { %v5939_v11 = vpop.f32.mrb[26].mxu1 }
 0x587   :  { %v5940_v30 = vpop.f32.mrb[27].mxu1 }
 0x5c4   :  { %v5976_v31 = vpop.f32.mrb[24].mxu0 }
 0x5c5   :  { %v5977_v32 = vadd.f32 %v5976_v31, %v5936_v61  ;;  %v5978_v9 = vpop.f32.mrb[25].mxu0 }
 0x5c6   :  { %v5979_v33 = vpop.f32.mrb[26].mxu0 }
 0x5c7   :  { %5983 = vst.msk [vmem:[%s8416_s10] sm:$0x1] %vm5982_vm12, %v5977_v32  ;;  %v5980_v12 = vpop.f32.mrb[27].mxu0 }
 0x5c8   :  { %5988 = vsyncpa [#allocation3], 1 }
 0x5c9   :  { %5989 = vsyncpa [#allocation5], 1 }
 0x5ca   :  { %5990 = vsyncpa [#allocation8], 1 }
 0x5cb   :  { %5991 = vsyncpa [#allocation11], 1 }

</bundles_post_ra>
